<compile_context>
chip_gen: v7x
topology: tpu7x:2x2x1
jax: 0.10.0
libtpu: 0.0.40
codegen_flags: <defaults>
</compile_context>

<pallas_src>
import jax
import jax.numpy as jnp
from jax.experimental import pallas as pl
from jax.experimental.pallas import tpu as pltpu

HID = 768          # BERT hidden size
FEAT_DIM = 12      # feature_dim in Model_Feature.__init__


def _head_kernel(pooled_ref, o2_ref, o3_ref, feat_ref,
                 w1a_ref, w1b_ref, b1_ref,        # mlp1 : Linear(2*768 -> 768), split, bf16
                 wa_ref, wb_ref, b_ref,           # mlp  : Linear(2*768 -> 12),  split, f32
                 w2_ref, b2_ref,                  # mlp2 : Linear(12 -> 12)
                 w3a_ref, w3b_ref, b3_ref,        # mlp3 : Linear(24 -> 2),      split
                 out_ref):
    # out1 = relu(mlp1(concat([output2, output3], dim=1)))
    # Weights are bf16 in HBM/VMEM; cast activations to bf16 so the MXU runs
    # native bf16 x bf16 with f32 accumulation.
    o2 = o2_ref[...].astype(jnp.bfloat16)
    o3 = o3_ref[...].astype(jnp.bfloat16)
    h1 = (jnp.dot(o2, w1a_ref[...], preferred_element_type=jnp.float32)
          + jnp.dot(o3, w1b_ref[...], preferred_element_type=jnp.float32)
          + b1_ref[...])
    h1 = jnp.maximum(h1, 0.0)

    # out = relu(mlp(concat([output, out1], dim=1)))  (split matmul, single bias add)
    h = (jnp.dot(pooled_ref[...], wa_ref[...], preferred_element_type=jnp.float32)
         + jnp.dot(h1, wb_ref[...], preferred_element_type=jnp.float32)
         + b_ref[...])
    h = jnp.maximum(h, 0.0)

    # out_f = relu(mlp2(feature))
    hf = jnp.maximum(
        jnp.dot(feat_ref[...], w2_ref[...], preferred_element_type=jnp.float32)
        + b2_ref[...], 0.0)

    # sigmoid(mlp3(concat((out, out_f), dim=1)))
    logits = (jnp.dot(h, w3a_ref[...], preferred_element_type=jnp.float32)
              + jnp.dot(hf, w3b_ref[...], preferred_element_type=jnp.float32)
              + b3_ref[...])
    out_ref[...] = jax.nn.sigmoid(logits)


def _full_spec(shape):
    # Single grid point: each ref is the whole array, resident in VMEM.
    return pl.BlockSpec(shape, lambda i: (0,) * len(shape))


def prepare_head_params(params):
    """One-time (load-time) preparation of the head parameters.

    Splits the concat-folded weights and casts the dominant mlp1 weights to
    bf16, so no slice/cast ops run inside the traced per-call wrapper.
    """
    (w1, b1, w, b, w2, b2, w3, b3) = params
    return (
        jnp.asarray(w1[:HID], jnp.bfloat16),     # w1a [768,768] bf16
        jnp.asarray(w1[HID:], jnp.bfloat16),     # w1b [768,768] bf16
        jnp.asarray(b1[None, :], jnp.float32),   # b1  [1,768]
        jnp.asarray(w[:HID], jnp.float32),       # wa  [768,12]
        jnp.asarray(w[HID:], jnp.float32),       # wb  [768,12]
        jnp.asarray(b[None, :], jnp.float32),    # b   [1,12]
        jnp.asarray(w2, jnp.float32),            # w2  [12,12]
        jnp.asarray(b2[None, :], jnp.float32),   # b2  [1,12]
        jnp.asarray(w3[:FEAT_DIM], jnp.float32), # w3a [12,2]
        jnp.asarray(w3[FEAT_DIM:], jnp.float32), # w3b [12,2]
        jnp.asarray(b3[None, :], jnp.float32),   # b3  [1,2]
    )


def model_feature_head(pooled, oag_emb, oag_pap, feature, head_params):
    """Pallas implementation of the Model_Feature MLP head.

    head_params must come from prepare_head_params (pre-split, bf16 mlp1 weights).
    """
    B = pooled.shape[0]
    ins = (pooled, oag_emb, oag_pap, feature) + tuple(head_params)

    # Advisory cost estimate so XLA schedules this small DMA-bound call well
    # against the surrounding (BERT / OAG-BERT) encoder work.
    flops = 2 * B * (2 * HID * HID          # mlp1 (split)
                     + 2 * HID * FEAT_DIM   # mlp  (split)
                     + FEAT_DIM * FEAT_DIM  # mlp2
                     + 2 * FEAT_DIM * 2)    # mlp3 (split)
    bytes_accessed = sum(int(x.size) * x.dtype.itemsize for x in ins) + B * 2 * 4
    cost = pl.CostEstimate(flops=flops,
                           transcendentals=B * 2,      # sigmoid
                           bytes_accessed=bytes_accessed)

    return pl.pallas_call(
        _head_kernel,
        out_shape=jax.ShapeDtypeStruct((B, 2), jnp.float32),
        grid=(1,),
        in_specs=[_full_spec(x.shape) for x in ins],
        out_specs=_full_spec((B, 2)),
        compiler_params=pltpu.CompilerParams(
            dimension_semantics=("arbitrary",),
            vmem_limit_bytes=32 * 1024 * 1024),
        cost_estimate=cost,
    )(*ins)


def init_params(key):
    """Deterministic synthetic parameters matching Model_Feature.__init__ shapes (f32)."""
    ks = jax.random.split(key, 8)
    def lin(kw, kb, fan_in, fan_out):
        bound = 1.0 / jnp.sqrt(fan_in)
        W = jax.random.uniform(kw, (fan_in, fan_out), jnp.float32, -bound, bound)
        bias = jax.random.uniform(kb, (fan_out,), jnp.float32, -bound, bound)
        return W, bias
    w1, b1 = lin(ks[0], ks[1], 2 * HID, HID)        # mlp1
    w, b = lin(ks[2], ks[3], 2 * HID, FEAT_DIM)     # mlp
    w2, b2 = lin(ks[4], ks[5], FEAT_DIM, FEAT_DIM)  # mlp2
    w3, b3 = lin(ks[6], ks[7], 2 * FEAT_DIM, 2)     # mlp3
    return (w1, b1, w, b, w2, b2, w3, b3)


def _reference(pooled, oag_emb, oag_pap, feature, params, bf16_mlp1=False):
    (w1, b1, w, b, w2, b2, w3, b3) = params
    if bf16_mlp1:
        # Match the kernel's bf16 storage of the mlp1 weights / activations.
        w1 = w1.astype(jnp.bfloat16).astype(jnp.float32)
        oag_emb = oag_emb.astype(jnp.bfloat16).astype(jnp.float32)
        oag_pap = oag_pap.astype(jnp.bfloat16).astype(jnp.float32)
    h1 = jax.nn.relu(jnp.concatenate([oag_emb, oag_pap], axis=1) @ w1 + b1)
    h = jax.nn.relu(jnp.concatenate([pooled, h1], axis=1) @ w + b)
    hf = jax.nn.relu(feature @ w2 + b2)
    return jax.nn.sigmoid(jnp.concatenate([h, hf], axis=1) @ w3 + b3)


if __name__ == "__main__":
    # TODO(synk): the bert_model / oagbert encoders (tokenization + transformer
    # stacks inside process_oag_token / build_inputs) are external modules; their
    # pooled outputs are fed to the kernel as inputs instead of being re-implemented.
    B = 8
    key = jax.random.PRNGKey(0)
    k_p, k_o2, k_o3, k_f, k_w = jax.random.split(key, 5)

    pooled = jax.random.normal(k_p, (B, HID), jnp.float32)     # bert_model(...)[1]
    oag_emb = jax.random.normal(k_o2, (B, HID), jnp.float32)   # process_oag_token(oag_token)
    oag_pap = jax.random.normal(k_o3, (B, HID), jnp.float32)   # process_oag_token(oag_token_paper)
    feature = jax.random.normal(k_f, (B, FEAT_DIM), jnp.float32)

    params = init_params(k_w)
    head_params = prepare_head_params(params)   # done once at load time

    out = model_feature_head(pooled, oag_emb, oag_pap, feature, head_params)
    out = jax.block_until_ready(out)
    assert out.shape == (B, 2)

    # Tight check vs a reference that uses the same bf16-rounded mlp1 weights.
    ref_bf16 = _reference(pooled, oag_emb, oag_pap, feature, params, bf16_mlp1=True)
    assert jnp.allclose(out, ref_bf16, atol=1e-2), "mismatch vs bf16-weight reference"

    # Sanity check vs the full-f32 reference (bf16 weight storage -> looser tol;
    # output is post-sigmoid so the practical impact is negligible).
    ref_f32 = _reference(pooled, oag_emb, oag_pap, feature, params, bf16_mlp1=False)
    assert jnp.allclose(out, ref_f32, atol=5e-2), "mismatch vs f32 reference"

    print("KERNEL_OK")
</pallas_src>

<mosaic_0001>
module attributes {stable_mosaic.version = 11 : i64} {
  func.func @_head_kernel(%arg0: i32, %arg1: memref<8x768xf32, #tpu.memory_space<vmem>>, %arg2: memref<8x768xf32, #tpu.memory_space<vmem>>, %arg3: memref<8x768xf32, #tpu.memory_space<vmem>>, %arg4: memref<8x12xf32, #tpu.memory_space<vmem>>, %arg5: memref<768x768xbf16, #tpu.memory_space<vmem>>, %arg6: memref<768x768xbf16, #tpu.memory_space<vmem>>, %arg7: memref<1x768xf32, #tpu.memory_space<vmem>>, %arg8: memref<768x12xf32, #tpu.memory_space<vmem>>, %arg9: memref<768x12xf32, #tpu.memory_space<vmem>>, %arg10: memref<1x12xf32, #tpu.memory_space<vmem>>, %arg11: memref<12x12xf32, #tpu.memory_space<vmem>>, %arg12: memref<1x12xf32, #tpu.memory_space<vmem>>, %arg13: memref<12x2xf32, #tpu.memory_space<vmem>>, %arg14: memref<12x2xf32, #tpu.memory_space<vmem>>, %arg15: memref<1x2xf32, #tpu.memory_space<vmem>>, %arg16: memref<8x2xf32, #tpu.memory_space<vmem>>) attributes {dimension_semantics = [#tpu.dimension_semantics<arbitrary>], iteration_bounds = array<i64: 1>, scalar_prefetch = 0 : i64, scratch_operands = 0 : i64, tpu.core_type = #tpu.core_type<tc>, window_params = [{pipeline_mode = #tpu.pipeline_mode<synchronous>, transform_indices = @transform_0, window_bounds = array<i64: 8, 768>}, {pipeline_mode = #tpu.pipeline_mode<synchronous>, transform_indices = @transform_1, window_bounds = array<i64: 8, 768>}, {pipeline_mode = #tpu.pipeline_mode<synchronous>, transform_indices = @transform_2, window_bounds = array<i64: 8, 768>}, {pipeline_mode = #tpu.pipeline_mode<synchronous>, transform_indices = @transform_3, window_bounds = array<i64: 8, 12>}, {pipeline_mode = #tpu.pipeline_mode<synchronous>, transform_indices = @transform_4, window_bounds = array<i64: 768, 768>}, {pipeline_mode = #tpu.pipeline_mode<synchronous>, transform_indices = @transform_5, window_bounds = array<i64: 768, 768>}, {pipeline_mode = #tpu.pipeline_mode<synchronous>, transform_indices = @transform_6, window_bounds = array<i64: 1, 768>}, {pipeline_mode = #tpu.pipeline_mode<synchronous>, transform_indices = @transform_7, window_bounds = array<i64: 768, 12>}, {pipeline_mode = #tpu.pipeline_mode<synchronous>, transform_indices = @transform_8, window_bounds = array<i64: 768, 12>}, {pipeline_mode = #tpu.pipeline_mode<synchronous>, transform_indices = @transform_9, window_bounds = array<i64: 1, 12>}, {pipeline_mode = #tpu.pipeline_mode<synchronous>, transform_indices = @transform_10, window_bounds = array<i64: 12, 12>}, {pipeline_mode = #tpu.pipeline_mode<synchronous>, transform_indices = @transform_11, window_bounds = array<i64: 1, 12>}, {pipeline_mode = #tpu.pipeline_mode<synchronous>, transform_indices = @transform_12, window_bounds = array<i64: 12, 2>}, {pipeline_mode = #tpu.pipeline_mode<synchronous>, transform_indices = @transform_13, window_bounds = array<i64: 12, 2>}, {pipeline_mode = #tpu.pipeline_mode<synchronous>, transform_indices = @transform_14, window_bounds = array<i64: 1, 2>}, {pipeline_mode = #tpu.pipeline_mode<synchronous>, transform_indices = @transform_15, window_bounds = array<i64: 8, 2>}]} {
    %c0 = arith.constant 0 : index
    %c0_0 = arith.constant 0 : index
    %0 = vector.load %arg2[%c0, %c0_0] : memref<8x768xf32, #tpu.memory_space<vmem>>, vector<8x768xf32>
    %1 = arith.truncf %0 : vector<8x768xf32> to vector<8x768xbf16>
    %c0_1 = arith.constant 0 : index
    %c0_2 = arith.constant 0 : index
    %2 = vector.load %arg3[%c0_1, %c0_2] : memref<8x768xf32, #tpu.memory_space<vmem>>, vector<8x768xf32>
    %3 = arith.truncf %2 : vector<8x768xf32> to vector<8x768xbf16>
    %c0_3 = arith.constant 0 : index
    %c0_4 = arith.constant 0 : index
    %4 = vector.load %arg5[%c0_3, %c0_4] : memref<768x768xbf16, #tpu.memory_space<vmem>>, vector<768x768xbf16>
    %cst = arith.constant dense<0.000000e+00> : vector<8x768xf32>
    %5 = tpu.matmul %1, %4, %cst {dimension_numbers = #tpu.dot_dimension_numbers<[1], [0], [0], [1], [0, 0, 1, 1], [], []>} : vector<8x768xbf16>, vector<768x768xbf16>, vector<8x768xf32> -> vector<8x768xf32>
    %c0_5 = arith.constant 0 : index
    %c0_6 = arith.constant 0 : index
    %6 = vector.load %arg6[%c0_5, %c0_6] : memref<768x768xbf16, #tpu.memory_space<vmem>>, vector<768x768xbf16>
    %cst_7 = arith.constant dense<0.000000e+00> : vector<8x768xf32>
    %7 = tpu.matmul %3, %6, %cst_7 {dimension_numbers = #tpu.dot_dimension_numbers<[1], [0], [0], [1], [0, 0, 1, 1], [], []>} : vector<8x768xbf16>, vector<768x768xbf16>, vector<8x768xf32> -> vector<8x768xf32>
    %8 = arith.addf %5, %7 : vector<8x768xf32>
    %c0_8 = arith.constant 0 : index
    %c0_9 = arith.constant 0 : index
    %9 = vector.load %arg7[%c0_8, %c0_9] : memref<1x768xf32, #tpu.memory_space<vmem>>, vector<1x768xf32>
    %10 = vector.broadcast %9 : vector<1x768xf32> to vector<8x768xf32>
    %11 = arith.addf %8, %10 : vector<8x768xf32>
    %cst_10 = arith.constant 0.000000e+00 : f32
    %12 = vector.broadcast %cst_10 : f32 to vector<8x768xf32>
    %13 = arith.maximumf %11, %12 : vector<8x768xf32>
    %c0_11 = arith.constant 0 : index
    %c0_12 = arith.constant 0 : index
    %14 = vector.load %arg1[%c0_11, %c0_12] : memref<8x768xf32, #tpu.memory_space<vmem>>, vector<8x768xf32>
    %c0_13 = arith.constant 0 : index
    %c0_14 = arith.constant 0 : index
    %15 = vector.load %arg8[%c0_13, %c0_14] : memref<768x12xf32, #tpu.memory_space<vmem>>, vector<768x12xf32>
    %cst_15 = arith.constant dense<0.000000e+00> : vector<8x12xf32>
    %16 = tpu.matmul %14, %15, %cst_15 {dimension_numbers = #tpu.dot_dimension_numbers<[1], [0], [0], [1], [0, 0, 1, 1], [], []>} : vector<8x768xf32>, vector<768x12xf32>, vector<8x12xf32> -> vector<8x12xf32>
    %c0_16 = arith.constant 0 : index
    %c0_17 = arith.constant 0 : index
    %17 = vector.load %arg9[%c0_16, %c0_17] : memref<768x12xf32, #tpu.memory_space<vmem>>, vector<768x12xf32>
    %cst_18 = arith.constant dense<0.000000e+00> : vector<8x12xf32>
    %18 = tpu.matmul %13, %17, %cst_18 {dimension_numbers = #tpu.dot_dimension_numbers<[1], [0], [0], [1], [0, 0, 1, 1], [], []>} : vector<8x768xf32>, vector<768x12xf32>, vector<8x12xf32> -> vector<8x12xf32>
    %19 = arith.addf %16, %18 : vector<8x12xf32>
    %c0_19 = arith.constant 0 : index
    %c0_20 = arith.constant 0 : index
    %20 = vector.load %arg10[%c0_19, %c0_20] : memref<1x12xf32, #tpu.memory_space<vmem>>, vector<1x12xf32>
    %21 = vector.broadcast %20 : vector<1x12xf32> to vector<8x12xf32>
    %22 = arith.addf %19, %21 : vector<8x12xf32>
    %cst_21 = arith.constant 0.000000e+00 : f32
    %23 = vector.broadcast %cst_21 : f32 to vector<8x12xf32>
    %24 = arith.maximumf %22, %23 : vector<8x12xf32>
    %c0_22 = arith.constant 0 : index
    %c0_23 = arith.constant 0 : index
    %25 = vector.load %arg4[%c0_22, %c0_23] : memref<8x12xf32, #tpu.memory_space<vmem>>, vector<8x12xf32>
    %c0_24 = arith.constant 0 : index
    %c0_25 = arith.constant 0 : index
    %26 = vector.load %arg11[%c0_24, %c0_25] : memref<12x12xf32, #tpu.memory_space<vmem>>, vector<12x12xf32>
    %cst_26 = arith.constant dense<0.000000e+00> : vector<8x12xf32>
    %27 = tpu.matmul %25, %26, %cst_26 {dimension_numbers = #tpu.dot_dimension_numbers<[1], [0], [0], [1], [0, 0, 1, 1], [], []>} : vector<8x12xf32>, vector<12x12xf32>, vector<8x12xf32> -> vector<8x12xf32>
    %c0_27 = arith.constant 0 : index
    %c0_28 = arith.constant 0 : index
    %28 = vector.load %arg12[%c0_27, %c0_28] : memref<1x12xf32, #tpu.memory_space<vmem>>, vector<1x12xf32>
    %29 = vector.broadcast %28 : vector<1x12xf32> to vector<8x12xf32>
    %30 = arith.addf %27, %29 : vector<8x12xf32>
    %cst_29 = arith.constant 0.000000e+00 : f32
    %31 = vector.broadcast %cst_29 : f32 to vector<8x12xf32>
    %32 = arith.maximumf %30, %31 : vector<8x12xf32>
    %c0_30 = arith.constant 0 : index
    %c0_31 = arith.constant 0 : index
    %33 = vector.load %arg13[%c0_30, %c0_31] : memref<12x2xf32, #tpu.memory_space<vmem>>, vector<12x2xf32>
    %cst_32 = arith.constant dense<0.000000e+00> : vector<8x2xf32>
    %34 = tpu.matmul %24, %33, %cst_32 {dimension_numbers = #tpu.dot_dimension_numbers<[1], [0], [0], [1], [0, 0, 1, 1], [], []>} : vector<8x12xf32>, vector<12x2xf32>, vector<8x2xf32> -> vector<8x2xf32>
    %c0_33 = arith.constant 0 : index
    %c0_34 = arith.constant 0 : index
    %35 = vector.load %arg14[%c0_33, %c0_34] : memref<12x2xf32, #tpu.memory_space<vmem>>, vector<12x2xf32>
    %cst_35 = arith.constant dense<0.000000e+00> : vector<8x2xf32>
    %36 = tpu.matmul %32, %35, %cst_35 {dimension_numbers = #tpu.dot_dimension_numbers<[1], [0], [0], [1], [0, 0, 1, 1], [], []>} : vector<8x12xf32>, vector<12x2xf32>, vector<8x2xf32> -> vector<8x2xf32>
    %37 = arith.addf %34, %36 : vector<8x2xf32>
    %c0_36 = arith.constant 0 : index
    %c0_37 = arith.constant 0 : index
    %38 = vector.load %arg15[%c0_36, %c0_37] : memref<1x2xf32, #tpu.memory_space<vmem>>, vector<1x2xf32>
    %39 = vector.broadcast %38 : vector<1x2xf32> to vector<8x2xf32>
    %40 = arith.addf %37, %39 : vector<8x2xf32>
    %41 = arith.negf %40 : vector<8x2xf32>
    %42 = math.exp %41 : vector<8x2xf32>
    %cst_38 = arith.constant 1.000000e+00 : f32
    %43 = vector.broadcast %cst_38 : f32 to vector<8x2xf32>
    %44 = arith.addf %43, %42 : vector<8x2xf32>
    %45 = arith.divf %43, %44 : vector<8x2xf32>
    %c0_39 = arith.constant 0 : index
    %c0_40 = arith.constant 0 : index
    %46 = vector.load %arg16[%c0_39, %c0_40] : memref<8x2xf32, #tpu.memory_space<vmem>>, vector<8x2xf32>
    tpu.vector_store %arg16[%c0_39, %c0_40], %45 {strides = array<i32>} : memref<8x2xf32, #tpu.memory_space<vmem>>, vector<8x2xf32>,
    return
  }
  func.func @transform_0(%arg0: i32) -> (i32, i32) {
    %c0_i32 = arith.constant 0 : i32
    %c0_i32_0 = arith.constant 0 : i32
    %c0_i32_1 = arith.constant 0 : i32
    return %c0_i32, %c0_i32_0 : i32, i32
  }
  func.func @transform_1(%arg0: i32) -> (i32, i32) {
    %c0_i32 = arith.constant 0 : i32
    %c0_i32_0 = arith.constant 0 : i32
    %c0_i32_1 = arith.constant 0 : i32
    return %c0_i32, %c0_i32_0 : i32, i32
  }
  func.func @transform_2(%arg0: i32) -> (i32, i32) {
    %c0_i32 = arith.constant 0 : i32
    %c0_i32_0 = arith.constant 0 : i32
    %c0_i32_1 = arith.constant 0 : i32
    return %c0_i32, %c0_i32_0 : i32, i32
  }
  func.func @transform_3(%arg0: i32) -> (i32, i32) {
    %c0_i32 = arith.constant 0 : i32
    %c0_i32_0 = arith.constant 0 : i32
    %c0_i32_1 = arith.constant 0 : i32
    return %c0_i32, %c0_i32_0 : i32, i32
  }
  func.func @transform_4(%arg0: i32) -> (i32, i32) {
    %c0_i32 = arith.constant 0 : i32
    %c0_i32_0 = arith.constant 0 : i32
    %c0_i32_1 = arith.constant 0 : i32
    return %c0_i32, %c0_i32_0 : i32, i32
  }
  func.func @transform_5(%arg0: i32) -> (i32, i32) {
    %c0_i32 = arith.constant 0 : i32
    %c0_i32_0 = arith.constant 0 : i32
    %c0_i32_1 = arith.constant 0 : i32
    return %c0_i32, %c0_i32_0 : i32, i32
  }
  func.func @transform_6(%arg0: i32) -> (i32, i32) {
    %c0_i32 = arith.constant 0 : i32
    %c0_i32_0 = arith.constant 0 : i32
    %c0_i32_1 = arith.constant 0 : i32
    return %c0_i32, %c0_i32_0 : i32, i32
  }
  func.func @transform_7(%arg0: i32) -> (i32, i32) {
    %c0_i32 = arith.constant 0 : i32
    %c0_i32_0 = arith.constant 0 : i32
    %c0_i32_1 = arith.constant 0 : i32
    return %c0_i32, %c0_i32_0 : i32, i32
  }
  func.func @transform_8(%arg0: i32) -> (i32, i32) {
    %c0_i32 = arith.constant 0 : i32
    %c0_i32_0 = arith.constant 0 : i32
    %c0_i32_1 = arith.constant 0 : i32
    return %c0_i32, %c0_i32_0 : i32, i32
  }
  func.func @transform_9(%arg0: i32) -> (i32, i32) {
    %c0_i32 = arith.constant 0 : i32
    %c0_i32_0 = arith.constant 0 : i32
    %c0_i32_1 = arith.constant 0 : i32
    return %c0_i32, %c0_i32_0 : i32, i32
  }
  func.func @transform_10(%arg0: i32) -> (i32, i32) {
    %c0_i32 = arith.constant 0 : i32
    %c0_i32_0 = arith.constant 0 : i32
    %c0_i32_1 = arith.constant 0 : i32
    return %c0_i32, %c0_i32_0 : i32, i32
  }
  func.func @transform_11(%arg0: i32) -> (i32, i32) {
    %c0_i32 = arith.constant 0 : i32
    %c0_i32_0 = arith.constant 0 : i32
    %c0_i32_1 = arith.constant 0 : i32
    return %c0_i32, %c0_i32_0 : i32, i32
  }
  func.func @transform_12(%arg0: i32) -> (i32, i32) {
    %c0_i32 = arith.constant 0 : i32
    %c0_i32_0 = arith.constant 0 : i32
    %c0_i32_1 = arith.constant 0 : i32
    return %c0_i32, %c0_i32_0 : i32, i32
  }
  func.func @transform_13(%arg0: i32) -> (i32, i32) {
    %c0_i32 = arith.constant 0 : i32
    %c0_i32_0 = arith.constant 0 : i32
    %c0_i32_1 = arith.constant 0 : i32
    return %c0_i32, %c0_i32_0 : i32, i32
  }
  func.func @transform_14(%arg0: i32) -> (i32, i32) {
    %c0_i32 = arith.constant 0 : i32
    %c0_i32_0 = arith.constant 0 : i32
    %c0_i32_1 = arith.constant 0 : i32
    return %c0_i32, %c0_i32_0 : i32, i32
  }
  func.func @transform_15(%arg0: i32) -> (i32, i32) {
    %c0_i32 = arith.constant 0 : i32
    %c0_i32_0 = arith.constant 0 : i32
    %c0_i32_1 = arith.constant 0 : i32
    return %c0_i32, %c0_i32_0 : i32, i32
  }
}

</mosaic_0001>

<bundles_post_ra>
// kernel: tpu_custom_call.1
= control target key start
LH: loop header
LB: loop body
LE: loop exit
PB: predicated region body
PF: predicated region fallthrough
CT: control target
= control target key end

     0   :  { %20 = vsyncpa [#allocation3], 0  ;;  %s8510_s0 = inlined_call_operand.hbm [shape: f32[8,768], index: 0, kind: input, shape index: {}]   ;;  %s8511_s1 = inlined_call_operand.hbm [shape: f32[8,768], index: 1, kind: input, shape index: {}]   ;;  %s8512_s2 = inlined_call_operand.hbm [shape: f32[8,768], index: 2, kind: input, shape index: {}]   ;;  %s8513_s3 = inlined_call_operand.hbm [shape: f32[8,12], index: 3, kind: input, shape index: {}]   ;;  %s8514_s4 = inlined_call_operand.hbm [shape: bf16[768,768], index: 4, kind: input, shape index: {}]   ;;  %s8515_s5 = inlined_call_operand.hbm [shape: bf16[768,768], index: 5, kind: input, shape index: {}]   ;;  %s8516_s6 = inlined_call_operand.hbm [shape: f32[1,768], index: 6, kind: input, shape index: {}]   ;;  %s8517_s7 = inlined_call_operand.vmem [shape: f32[768,12], index: 7, kind: input, shape index: {}]   ;;  %s8518_s8 = inlined_call_operand.vmem [shape: f32[768,12], index: 8, kind: input, shape index: {}]   ;;  %s8519_s9 = inlined_call_operand.hbm [shape: f32[1,12], index: 9, kind: input, shape index: {}]   ;;  %s8520_s10 = inlined_call_operand.hbm [shape: f32[12,12], index: 10, kind: input, shape index: {}]   ;;  %s8521_s11 = inlined_call_operand.hbm [shape: f32[1,12], index: 11, kind: input, shape index: {}]   ;;  %s8522_s12 = inlined_call_operand.vmem [shape: f32[12,2], index: 12, kind: input, shape index: {}]   ;;  %s8523_s13 = inlined_call_operand.vmem [shape: f32[12,2], index: 13, kind: input, shape index: {}]   ;;  %s8524_s14 = inlined_call_operand.hbm [shape: f32[1,2], index: 14, kind: input, shape index: {}]   ;;  %s8525_s15 = inlined_call_operand.vmem [shape: f32[8,2], index: 15, kind: output, shape index: {}]  }
   0x1   :  { %21 = vsyncpa [#allocation5], 0 }
   0x2   :  { %22 = vsyncpa [#allocation8], 0 }
   0x3   :  { %23 = vsyncpa [#allocation11], 0 }
   0x4   :  { %24 = vsyncpa [#allocation14], 0 }
   0x5   :  { %25 = vsyncpa [#allocation17], 0  ;;  %s7514_s18 = smov [#allocation4]   ;;  %s7515_s20 = smov [#allocation7]  }
   0x6   :  { %s42_s19 = sshll.u32 %s7514_s18, 4  ;;  %s62_s21 = sshll.u32 %s7515_s20, 4  ;;  %s43_s19 = int_to_ptr.vmem [resolvable:$true] %s42_s19  ;;  %s63_s21 = int_to_ptr.vmem [resolvable:$true] %s62_s21 }
   0x7   :  { %s7260_s24 = scalar_lea.hbm %s8511_s1, 768 }
   0x8   :  { %p7261_p0 = scmp.ne.s32.totalorder %s8511_s1, %s7260_s24  ;;  %p7264_p1 = scmp.lt.u32.totalorder %s7260_s24, %s8511_s1 }
   0xa   :  { %p7266_p2 = pnand %p7264_p1, %p7261_p0 }
   0xc   :  { %7269 = shalt.err (!%p7266_p2)
}
   0xd   :  { %s7270_s29 = scalar_lea.vmem %s43_s19, 768  ;;  %p7275_p4 = scmp.lt.s32.totalorder %s43_s19, %s43_s19 }
   0xe   :  { %p7271_p3 = scmp.ne.s32.totalorder %s43_s19, %s7270_s29  ;;  %p7276_p5 = scmp.lt.s32.totalorder %s7270_s29, %s7270_s29 }
  0x10   :  { %p7277_p6 = por %p7276_p5, %p7275_p4 }
  0x12   :  { %p7278_p7 = pnand %p7277_p6, %p7271_p3 }
  0x14   :  { %7281 = shalt.err (!%p7278_p7)
}
  0x15   :  { %45 = dma.hbm_to_vmem [thread:$0]  %s8511_s1, 768, %s43_s19, [#allocation5]  }
  0x16   :  { %s7282_s20 = scalar_lea.hbm %s8513_s3, 128 }
  0x17   :  { %p7283_p8 = scmp.ne.s32.totalorder %s8513_s3, %s7282_s20  ;;  %p7286_p9 = scmp.lt.u32.totalorder %s7282_s20, %s8513_s3 }
  0x19   :  { %p7288_p10 = pnand %p7286_p9, %p7283_p8 }
  0x1b   :  { %7291 = shalt.err (!%p7288_p10)
}
  0x1c   :  { %s7292_s26 = scalar_lea.vmem %s63_s21, 128  ;;  %p7297_p12 = scmp.lt.s32.totalorder %s63_s21, %s63_s21 }
  0x1d   :  { %p7293_p11 = scmp.ne.s32.totalorder %s63_s21, %s7292_s26  ;;  %p7298_p13 = scmp.lt.s32.totalorder %s7292_s26, %s7292_s26 }
  0x1f   :  { %p7299_p0 = por %p7298_p13, %p7297_p12 }
  0x21   :  { %p7300_p1 = pnand %p7299_p0, %p7293_p11 }
  0x23   :  { %7303 = shalt.err (!%p7300_p1)
}
  0x24   :  { %65 = dma.hbm_to_vmem [thread:$0]  %s8513_s3, 128, %s63_s21, [#allocation8]  }
  0x25   :  { %s7516_s27 = smov [#allocation10]   ;;  %s7517_s29 = smov [#allocation13]  }
  0x26   :  { %s83_s28 = sshll.u32 %s7516_s27, 4  ;;  %s110_s30 = sshll.u32 %s7517_s29, 4  ;;  %s84_s28 = int_to_ptr.vmem [resolvable:$true] %s83_s28  ;;  %s7637_s30 = int_to_ptr.vmem [resolvable:$true] %s110_s30 }
  0x27   :  { %s7304_s18 = scalar_lea.hbm %s8515_s5, 36864 }
  0x28   :  { %p7305_p2 = scmp.ne.s32.totalorder %s8515_s5, %s7304_s18  ;;  %p7308_p3 = scmp.lt.u32.totalorder %s7304_s18, %s8515_s5 }
  0x2a   :  { %p7310_p4 = pnand %p7308_p3, %p7305_p2 }
  0x2c   :  { %7313 = shalt.err (!%p7310_p4)
}
  0x2d   :  { %s7314_s3 = scalar_lea.vmem %s84_s28, 36864  ;;  %p7319_p6 = scmp.lt.s32.totalorder %s84_s28, %s84_s28 }
  0x2e   :  { %p7315_p5 = scmp.ne.s32.totalorder %s84_s28, %s7314_s3  ;;  %p7320_p7 = scmp.lt.s32.totalorder %s7314_s3, %s7314_s3 }
  0x30   :  { %p7321_p8 = por %p7320_p7, %p7319_p6 }
  0x32   :  { %p7322_p9 = pnand %p7321_p8, %p7315_p5 }
  0x34   :  { %7325 = shalt.err (!%p7322_p9)
}
  0x35   :  { %s7518_s21 = smov 384   ;;  %s7519_s25 = smov 24  }
  0x36   :  { %89 = dma.hbm_to_vmem [thread:$0]  %s8515_s5, 36864, %s84_s28, [#allocation11], %s7518_s21, %s7518_s21, %s7519_s25  }
  0x37   :  { %s7326_s29 = scalar_lea.hbm %s8519_s9, 16 }
  0x38   :  { %p7327_p10 = scmp.ne.s32.totalorder %s8519_s9, %s7326_s29  ;;  %p7330_p11 = scmp.lt.u32.totalorder %s7326_s29, %s8519_s9 }
  0x3a   :  { %p7332_p12 = pnand %p7330_p11, %p7327_p10 }
  0x3c   :  { %7335 = shalt.err (!%p7332_p12)
}
  0x3d   :  { %s7336_s22 = scalar_lea.vmem %s7637_s30, 16  ;;  %s7340_s5 = scalar_lea.vmem %s7637_s30, 32 }
  0x3e   :  { %p7337_p13 = scmp.ne.s32.totalorder %s7637_s30, %s7336_s22  ;;  %p7341_p0 = scmp.lt.s32.totalorder %s7637_s30, %s7637_s30 }
  0x3f   :  { %p7342_p1 = scmp.lt.s32.totalorder %s7340_s5, %s7336_s22 }
  0x41   :  { %p7343_p2 = por %p7342_p1, %p7341_p0 }
  0x43   :  { %p7344_p3 = pnand %p7343_p2, %p7337_p13 }
  0x45   :  { %7347 = shalt.err (!%p7344_p3)
}
  0x46   :  { %113 = dma.hbm_to_vmem [thread:$0]  %s8519_s9, 16, %s7637_s30, [#allocation14]  }
  0x47   :  { %s7520_s24 = smov [#allocation16]   ;;  %s7521_s26 = smov [#allocation2]  }
  0x48   :  { %s132_s3 = sshll.u32 %s7520_s24, 4  ;;  %s32_s1 = sshll.u32 %s7521_s26, 4  ;;  %s133_s3 = int_to_ptr.vmem [resolvable:$true] %s132_s3  ;;  %s33_s1 = int_to_ptr.vmem [resolvable:$true] %s32_s1 }
  0x49   :  { %s7348_s29 = scalar_lea.hbm %s8521_s11, 16 }
  0x4a   :  { %p7349_p4 = scmp.ne.s32.totalorder %s8521_s11, %s7348_s29  ;;  %p7352_p5 = scmp.lt.u32.totalorder %s7348_s29, %s8521_s11 }
  0x4c   :  { %p7354_p6 = pnand %p7352_p5, %p7349_p4 }
  0x4e   :  { %7357 = shalt.err (!%p7354_p6)
}
  0x4f   :  { %s7358_s9 = scalar_lea.vmem %s133_s3, 16  ;;  %s7362_s30 = scalar_lea.vmem %s133_s3, 32 }
  0x50   :  { %p7359_p7 = scmp.ne.s32.totalorder %s133_s3, %s7358_s9  ;;  %p7363_p8 = scmp.lt.s32.totalorder %s133_s3, %s133_s3 }
  0x51   :  { %p7364_p9 = scmp.lt.s32.totalorder %s7362_s30, %s7358_s9 }
  0x53   :  { %p7365_p10 = por %p7364_p9, %p7363_p8 }
  0x55   :  { %p7366_p11 = pnand %p7365_p10, %p7359_p7 }
  0x57   :  { %7369 = shalt.err (!%p7366_p11)
}
  0x58   :  { %135 = dma.hbm_to_vmem [thread:$0]  %s8521_s11, 16, %s133_s3, [#allocation17]  }
  0x59   :  { %s7370_s24 = scalar_lea.hbm %s8510_s0, 768 }
  0x5a   :  { %p7371_p12 = scmp.ne.s32.totalorder %s8510_s0, %s7370_s24  ;;  %p7374_p13 = scmp.lt.u32.totalorder %s7370_s24, %s8510_s0 }
  0x5c   :  { %p7376_p0 = pnand %p7374_p13, %p7371_p12 }
  0x5e   :  { %7379 = shalt.err (!%p7376_p0)
}
  0x5f   :  { %s7380_s16 = scalar_lea.vmem %s33_s1, 768  ;;  %p7385_p2 = scmp.lt.s32.totalorder %s33_s1, %s33_s1 }
  0x60   :  { %p7381_p1 = scmp.ne.s32.totalorder %s33_s1, %s7380_s16  ;;  %p7386_p3 = scmp.lt.s32.totalorder %s7380_s16, %s7380_s16 }
  0x62   :  { %p7387_p4 = por %p7386_p3, %p7385_p2 }
  0x64   :  { %p7388_p5 = pnand %p7387_p4, %p7381_p1 }
  0x66   :  { %7391 = shalt.err (!%p7388_p5)
}
  0x67   :  { %35 = dma.hbm_to_vmem [thread:$0]  %s8510_s0, 768, %s33_s1, [#allocation3]  }
  0x68   :  { %s7522_s17 = smov [#allocation6]   ;;  %s7523_s20 = smov [#allocation9]  }
  0x69   :  { %s52_s18 = sshll.u32 %s7522_s17, 4  ;;  %s71_s9 = sshll.u32 %s7523_s20, 4  ;;  %s53_s18 = int_to_ptr.vmem [resolvable:$true] %s52_s18  ;;  %s7696_s9 = int_to_ptr.vmem [resolvable:$true] %s71_s9 }
  0x6a   :  { %s7392_s5 = scalar_lea.hbm %s8512_s2, 768 }
  0x6b   :  { %p7393_p6 = scmp.ne.s32.totalorder %s8512_s2, %s7392_s5  ;;  %p7396_p7 = scmp.lt.u32.totalorder %s7392_s5, %s8512_s2 }
  0x6d   :  { %p7398_p8 = pnand %p7396_p7, %p7393_p6 }
  0x6f   :  { %7401 = shalt.err (!%p7398_p8)
}
  0x70   :  { %s7402_s0 = scalar_lea.vmem %s53_s18, 768  ;;  %p7407_p10 = scmp.lt.s32.totalorder %s53_s18, %s53_s18 }
  0x71   :  { %p7403_p9 = scmp.ne.s32.totalorder %s53_s18, %s7402_s0  ;;  %p7408_p11 = scmp.lt.s32.totalorder %s7402_s0, %s7402_s0 }
  0x73   :  { %p7409_p12 = por %p7408_p11, %p7407_p10 }
  0x75   :  { %p7410_p13 = pnand %p7409_p12, %p7403_p9 }
  0x77   :  { %7413 = shalt.err (!%p7410_p13)
}
  0x78   :  { %55 = dma.hbm_to_vmem [thread:$0]  %s8512_s2, 768, %s53_s18, [#allocation5]  }
  0x79   :  { %s7414_s16 = scalar_lea.hbm %s8514_s4, 36864 }
  0x7a   :  { %p7415_p0 = scmp.ne.s32.totalorder %s8514_s4, %s7414_s16  ;;  %p7418_p1 = scmp.lt.u32.totalorder %s7414_s16, %s8514_s4 }
  0x7c   :  { %p7420_p2 = pnand %p7418_p1, %p7415_p0 }
  0x7e   :  { %7423 = shalt.err (!%p7420_p2)
}
  0x7f   :  { %s7424_s30 = scalar_lea.vmem %s7696_s9, 36864  ;;  %p7429_p4 = scmp.lt.s32.totalorder %s7696_s9, %s7696_s9 }
  0x80   :  { %p7425_p3 = scmp.ne.s32.totalorder %s7696_s9, %s7424_s30  ;;  %p7430_p5 = scmp.lt.s32.totalorder %s7424_s30, %s7424_s30 }
  0x82   :  { %p7431_p6 = por %p7430_p5, %p7429_p4 }
  0x84   :  { %p7432_p7 = pnand %p7431_p6, %p7425_p3 }
  0x86   :  { %7435 = shalt.err (!%p7432_p7)
}
  0x87   :  { %77 = dma.hbm_to_vmem [thread:$0]  %s8514_s4, 36864, %s7696_s9, [#allocation8], %s7518_s21, %s7518_s21, %s7519_s25  }
  0x88   :  { %s7524_s22 = smov [#allocation12]   ;;  %s7525_s28 = smov [#allocation15]  }
  0x89   :  { %s96_s5 = sshll.u32 %s7524_s22, 4  ;;  %s119_s23 = sshll.u32 %s7525_s28, 4  ;;  %s97_s5 = int_to_ptr.vmem [resolvable:$true] %s96_s5  ;;  %s7730_s23 = int_to_ptr.vmem [resolvable:$true] %s119_s23 }
  0x8a   :  { %s7436_s0 = scalar_lea.hbm %s8516_s6, 96 }
  0x8b   :  { %p7437_p8 = scmp.ne.s32.totalorder %s8516_s6, %s7436_s0  ;;  %p7440_p9 = scmp.lt.u32.totalorder %s7436_s0, %s8516_s6 }
  0x8d   :  { %p7442_p10 = pnand %p7440_p9, %p7437_p8 }
  0x8f   :  { %7445 = shalt.err (!%p7442_p10)
}
  0x90   :  { %s7446_s4 = scalar_lea.vmem %s97_s5, 96  ;;  %p7451_p12 = scmp.lt.s32.totalorder %s97_s5, %s97_s5 }
  0x91   :  { %p7447_p11 = scmp.ne.s32.totalorder %s97_s5, %s7446_s4  ;;  %p7452_p13 = scmp.lt.s32.totalorder %s7446_s4, %s7446_s4 }
  0x93   :  { %p7453_p0 = por %p7452_p13, %p7451_p12 }
  0x95   :  { %p7454_p1 = pnand %p7453_p0, %p7447_p11 }
  0x97   :  { %7457 = shalt.err (!%p7454_p1)
}
  0x98   :  { %99 = dma.hbm_to_vmem [thread:$0]  %s8516_s6, 96, %s97_s5, [#allocation11]  }
  0x99   :  { %s7458_s11 = scalar_lea.hbm %s8520_s10, 256 }
  0x9a   :  { %p7459_p2 = scmp.ne.s32.totalorder %s8520_s10, %s7458_s11  ;;  %p7462_p3 = scmp.lt.u32.totalorder %s7458_s11, %s8520_s10 }
  0x9c   :  { %p7464_p4 = pnand %p7462_p3, %p7459_p2 }
  0x9e   :  { %7467 = shalt.err (!%p7464_p4)
}
  0x9f   :  { %s7468_s2 = scalar_lea.vmem %s7730_s23, 256  ;;  %p7473_p6 = scmp.lt.s32.totalorder %s7730_s23, %s7730_s23 }
  0xa0   :  { %p7469_p5 = scmp.ne.s32.totalorder %s7730_s23, %s7468_s2  ;;  %p7474_p7 = scmp.lt.s32.totalorder %s7468_s2, %s7468_s2 }
  0xa2   :  { %p7475_p8 = por %p7474_p7, %p7473_p6 }
  0xa4   :  { %p7476_p9 = pnand %p7475_p8, %p7469_p5 }
  0xa6   :  { %7479 = shalt.err (!%p7476_p9)
}
  0xa7   :  { %s7526_s6 = smov 128   ;;  %s7527_s18 = smov 8  }
  0xa8   :  { %125 = dma.hbm_to_vmem [thread:$0]  %s8520_s10, 256, %s7730_s23, [#allocation14], %s7526_s6, %s7526_s6, %s7527_s18  }
  0xa9   :  { %s7528_s28 = smov [#allocation18]   ;;  %s7480_s1 = scalar_lea.hbm %s8524_s14, 16 }
  0xaa   :  { %s146_s24 = sshll.u32 %s7528_s28, 4  ;;  %p7481_p10 = scmp.ne.s32.totalorder %s8524_s14, %s7480_s1  ;;  %s147_s24 = int_to_ptr.vmem [resolvable:$true] %s146_s24 }
  0xab   :  { %p7484_p11 = scmp.lt.u32.totalorder %s7480_s1, %s8524_s14 }
  0xad   :  { %p7486_p12 = pnand %p7484_p11, %p7481_p10 }
  0xaf   :  { %7489 = shalt.err (!%p7486_p12)
}
  0xb0   :  { %s7490_s21 = scalar_lea.vmem %s147_s24, 16  ;;  %s7494_s10 = scalar_lea.vmem %s147_s24, 32 }
  0xb1   :  { %p7491_p13 = scmp.ne.s32.totalorder %s147_s24, %s7490_s21  ;;  %p7495_p0 = scmp.lt.s32.totalorder %s147_s24, %s147_s24 }
  0xb2   :  { %p7496_p1 = scmp.lt.s32.totalorder %s7494_s10, %s7490_s21 }
  0xb4   :  { %p7497_p2 = por %p7496_p1, %p7495_p0 }
  0xb6   :  { %p7498_p3 = pnand %p7497_p2, %p7491_p13 }
  0xb8   :  { %7501 = shalt.err (!%p7498_p3)
}
  0xb9   :  { %149 = dma.hbm_to_vmem [thread:$0]  %s8524_s14, 16, %s147_s24, [#allocation17]  }
  0xba   :  { %7502 = dma.done.wait [#allocation3], 768  }
  0xbb   :  { %7503 = vsyncadd [#allocation3], 4294966528 }
  0xbc   :  { %7504 = dma.done.wait [#allocation5], 1536  }
  0xbd   :  { %7505 = vsyncadd [#allocation5], 4294965760 }
  0xbe   :  { %7506 = dma.done.wait [#allocation8], 36992  }
  0xbf   :  { %7507 = vsyncadd [#allocation8], 4294930304 }
  0xc0   :  { %7508 = dma.done.wait [#allocation11], 36960  }
  0xc1   :  { %7509 = vsyncadd [#allocation11], 4294930336 }
  0xc2   :  { %7510 = dma.done.wait [#allocation14], 272  }
  0xc3   :  { %7511 = vsyncadd [#allocation14], 4294967024 }
  0xc4   :  { %7512 = dma.done.wait [#allocation17], 32  }
  0xc5   :  { %7513 = vsyncadd [#allocation17], 4294967264  ;;  %v6392_v0 = vld [vmem:[#allocation10 + $0x4] ss:$24 sps:$4 sm:$0xff]   ;;  %v6396_v2 = vld [vmem:[#allocation10] ss:$24 sps:$4 sm:$0xff]  }
  0xc6   :  { %v6394_v1 = vld [vmem:[#allocation10 + $0x304] ss:$24 sps:$4 sm:$0xff]   ;;  %2223 = vmatprep.subr.bf16.mxu0 %v6392_v0  ;;  %v6397_v3 = vld [vmem:[#allocation10 + $0x300] ss:$24 sps:$4 sm:$0xff]   ;;  %v6398_v4 = vld [vmem:[#allocation10 + $0x34] ss:$24 sps:$4 sm:$0xff]  }
  0xc7   :  { %2264 = vmatprep.subr.bf16.mxu1 %v6394_v1  ;;  %2224 = vmatpush1.bf16.msra.mxu0 %v6396_v2  ;;  %v6400_v5 = vld [vmem:[#allocation10 + $0x334] ss:$24 sps:$4 sm:$0xff]   ;;  %v6402_v6 = vld [vmem:[#allocation10 + $0x30] ss:$24 sps:$4 sm:$0xff]   ;;  %v6404_v8 = vld [vmem:[#allocation10 + $0x64] ss:$24 sps:$4 sm:$0xff]  }
  0xc8   :  { %2265 = vmatpush1.bf16.msra.mxu1 %v6397_v3  ;;  %2225 = vmatprep.subr.bf16.mxu0 %v6398_v4  ;;  %v6403_v7 = vld [vmem:[#allocation10 + $0x330] ss:$24 sps:$4 sm:$0xff]   ;;  %v6406_v9 = vld [vmem:[#allocation10 + $0x364] ss:$24 sps:$4 sm:$0xff]   ;;  %v6408_v10 = vld [vmem:[#allocation10 + $0x60] ss:$24 sps:$4 sm:$0xff]  }
  0xc9   :  { %2266 = vmatprep.subr.bf16.mxu1 %v6400_v5  ;;  %v6409_v11 = vld [vmem:[#allocation10 + $0x360] ss:$24 sps:$4 sm:$0xff]   ;;  %v6410_v12 = vld [vmem:[#allocation10 + $0x94] ss:$24 sps:$4 sm:$0xff]   ;;  %v6414_v14 = vld [vmem:[#allocation10 + $0x90] ss:$24 sps:$4 sm:$0xff]  }
  0xca   :  { %v6412_v13 = vld [vmem:[#allocation10 + $0x394] ss:$24 sps:$4 sm:$0xff]   ;;  %v6415_v15 = vld [vmem:[#allocation10 + $0x390] ss:$24 sps:$4 sm:$0xff]   ;;  %v6416_v16 = vld [vmem:[#allocation10 + $0xc4] ss:$24 sps:$4 sm:$0xff]  }
  0xcb   :  { %2226 = vmatpush1.bf16.msra.mxu0 %v6402_v6  ;;  %v6418_v17 = vld [vmem:[#allocation10 + $0x3c4] ss:$24 sps:$4 sm:$0xff]   ;;  %v6420_v18 = vld [vmem:[#allocation10 + $0xc0] ss:$24 sps:$4 sm:$0xff]   ;;  %v6422_v20 = vld [vmem:[#allocation10 + $0xf4] ss:$24 sps:$4 sm:$0xff]  }
  0xcc   :  { %2267 = vmatpush1.bf16.msra.mxu1 %v6403_v7  ;;  %2227 = vmatprep.subr.bf16.mxu0 %v6404_v8  ;;  %v6421_v19 = vld [vmem:[#allocation10 + $0x3c0] ss:$24 sps:$4 sm:$0xff]   ;;  %v6424_v21 = vld [vmem:[#allocation10 + $0x3f4] ss:$24 sps:$4 sm:$0xff]   ;;  %v6426_v22 = vld [vmem:[#allocation10 + $0xf0] ss:$24 sps:$4 sm:$0xff]  }
  0xcd   :  { %2268 = vmatprep.subr.bf16.mxu1 %v6406_v9  ;;  %v6427_v23 = vld [vmem:[#allocation10 + $0x3f0] ss:$24 sps:$4 sm:$0xff]   ;;  %v6428_v24 = vld [vmem:[#allocation10 + $0x124] ss:$24 sps:$4 sm:$0xff]   ;;  %v6432_v26 = vld [vmem:[#allocation10 + $0x120] ss:$24 sps:$4 sm:$0xff]  }
  0xce   :  { %v6430_v25 = vld [vmem:[#allocation10 + $0x424] ss:$24 sps:$4 sm:$0xff]   ;;  %v6433_v27 = vld [vmem:[#allocation10 + $0x420] ss:$24 sps:$4 sm:$0xff]   ;;  %v6434_v28 = vld [vmem:[#allocation10 + $0x154] ss:$24 sps:$4 sm:$0xff]  }
  0xcf   :  { %2228 = vmatpush1.bf16.msra.mxu0 %v6408_v10  ;;  %v6436_v29 = vld [vmem:[#allocation10 + $0x454] ss:$24 sps:$4 sm:$0xff]   ;;  %v6438_v30 = vld [vmem:[#allocation10 + $0x150] ss:$24 sps:$4 sm:$0xff]   ;;  %v6440_v32 = vld [vmem:[#allocation10 + $0x184] ss:$24 sps:$4 sm:$0xff]  }
  0xd0   :  { %2269 = vmatpush1.bf16.msra.mxu1 %v6409_v11  ;;  %2229 = vmatprep.subr.bf16.mxu0 %v6410_v12  ;;  %v6439_v31 = vld [vmem:[#allocation10 + $0x450] ss:$24 sps:$4 sm:$0xff]   ;;  %v6442_v33 = vld [vmem:[#allocation10 + $0x484] ss:$24 sps:$4 sm:$0xff]   ;;  %v6444_v34 = vld [vmem:[#allocation10 + $0x180] ss:$24 sps:$4 sm:$0xff]  }
  0xd1   :  { %2270 = vmatprep.subr.bf16.mxu1 %v6412_v13  ;;  %v6445_v35 = vld [vmem:[#allocation10 + $0x480] ss:$24 sps:$4 sm:$0xff]   ;;  %v6446_v36 = vld [vmem:[#allocation10 + $0x1b4] ss:$24 sps:$4 sm:$0xff]   ;;  %v6450_v38 = vld [vmem:[#allocation10 + $0x1b0] ss:$24 sps:$4 sm:$0xff]  }
  0xd2   :  { %v6448_v37 = vld [vmem:[#allocation10 + $0x4b4] ss:$24 sps:$4 sm:$0xff]   ;;  %v6451_v39 = vld [vmem:[#allocation10 + $0x4b0] ss:$24 sps:$4 sm:$0xff]   ;;  %v6452_v40 = vld [vmem:[#allocation10 + $0x1e4] ss:$24 sps:$4 sm:$0xff]  }
  0xd3   :  { %2230 = vmatpush1.bf16.msra.mxu0 %v6414_v14  ;;  %v6454_v41 = vld [vmem:[#allocation10 + $0x4e4] ss:$24 sps:$4 sm:$0xff]   ;;  %v6456_v42 = vld [vmem:[#allocation10 + $0x1e0] ss:$24 sps:$4 sm:$0xff]   ;;  %v6458_v44 = vld [vmem:[#allocation10 + $0x214] ss:$24 sps:$4 sm:$0xff]  }
  0xd4   :  { %2271 = vmatpush1.bf16.msra.mxu1 %v6415_v15  ;;  %2231 = vmatprep.subr.bf16.mxu0 %v6416_v16  ;;  %v6457_v43 = vld [vmem:[#allocation10 + $0x4e0] ss:$24 sps:$4 sm:$0xff]   ;;  %v6460_v45 = vld [vmem:[#allocation10 + $0x514] ss:$24 sps:$4 sm:$0xff]   ;;  %v6462_v47 = vld [vmem:[#allocation10 + $0x210] ss:$24 sps:$4 sm:$0xff]  }
  0xd5   :  { %2272 = vmatprep.subr.bf16.mxu1 %v6418_v17  ;;  %v196_v46 = vld [vmem:[#allocation6 + $0x8] sm:$0xff]  ;;  %v198_v50 = vld [vmem:[#allocation6 + $0x18] sm:$0xff]  ;;  %v195_v4 = vld [vmem:[#allocation6] sm:$0xff]  ;;  %vm7530_vm0 = vmmov 0   ;;  %vm5086_vm1 = vcmask 1043456   ;;  %vm7532_vm2 = vmmov 1  }
  0xd6   :  { %v6463_v48 = vld [vmem:[#allocation10 + $0x510] ss:$24 sps:$4 sm:$0xff]   ;;  %v7773_v49 = vpack.c.bf16 %v196_v46, %v196_v46  ;;  %v6464_v51 = vld [vmem:[#allocation10 + $0x244] ss:$24 sps:$4 sm:$0xff]   ;;  %v7775_v52 = vpack.c.bf16 %v198_v50, %v198_v50  ;;  %v6468_v54 = vld [vmem:[#allocation10 + $0x240] ss:$24 sps:$4 sm:$0xff]   ;;  %v7779_v8 = vpack.c.bf16 %v195_v4, %v195_v4 }
  0xd7   :  { %2232 = vmatpush1.bf16.msra.mxu0 %v6420_v18  ;;  %v6466_v53 = vld [vmem:[#allocation10 + $0x544] ss:$24 sps:$4 sm:$0xff]   ;;  %v6469_v55 = vld [vmem:[#allocation10 + $0x540] ss:$24 sps:$4 sm:$0xff]   ;;  %v6470_v56 = vld [vmem:[#allocation10 + $0x274] ss:$24 sps:$4 sm:$0xff]  }
  0xd8   :  { %2273 = vmatpush1.bf16.msra.mxu1 %v6421_v19  ;;  %2233 = vmatprep.subr.bf16.mxu0 %v6422_v20  ;;  %v6472_v57 = vld [vmem:[#allocation10 + $0x574] ss:$24 sps:$4 sm:$0xff]   ;;  %v6474_v58 = vld [vmem:[#allocation10 + $0x270] ss:$24 sps:$4 sm:$0xff]   ;;  %v6476_v60 = vld [vmem:[#allocation10 + $0x2a4] ss:$24 sps:$4 sm:$0xff]  }
  0xd9   :  { %2274 = vmatprep.subr.bf16.mxu1 %v6424_v21  ;;  %2255 = vmatprep.mubr.bf16.mxu0 %v7773_v49  ;;  %v6475_v59 = vld [vmem:[#allocation10 + $0x570] ss:$24 sps:$4 sm:$0xff]   ;;  %v6478_v61 = vld [vmem:[#allocation10 + $0x5a4] ss:$24 sps:$4 sm:$0xff]   ;;  %v6480_v62 = vld [vmem:[#allocation10 + $0x2a0] ss:$24 sps:$4 sm:$0xff]  }
  0xda   :  { %2296 = vmatprep.mubr.bf16.mxu1 %v7775_v52  ;;  %v6481_v63 = vld [vmem:[#allocation10 + $0x5a0] ss:$24 sps:$4 sm:$0xff]   ;;  %v6482_v0 = vld [vmem:[#allocation10 + $0x2d4] ss:$24 sps:$4 sm:$0xff]   ;;  %v6486_v2 = vld [vmem:[#allocation10 + $0x2d0] ss:$24 sps:$4 sm:$0xff]  }
  0xdb   :  { %2234 = vmatpush1.bf16.msra.mxu0 %v6426_v22  ;;  %v6484_v1 = vld [vmem:[#allocation10 + $0x5d4] ss:$24 sps:$4 sm:$0xff]   ;;  %v6487_v3 = vld [vmem:[#allocation10 + $0x5d0] ss:$24 sps:$4 sm:$0xff]   ;;  %v197_v5 = vld [vmem:[#allocation6 + $0x10] sm:$0xff]  ;;  %vm5082_vm4 = vcmask 97280  }
  0xdc   :  { %2275 = vmatpush1.bf16.msra.mxu1 %v6427_v23  ;;  %2235 = vmatprep.subr.bf16.mxu0 %v6428_v24  ;;  %v6490_v6 = vld [vmem:[#allocation10 + $0x604] ss:$24 sps:$4 sm:$0xff]   ;;  %v7781_v9 = vpack.c.bf16 %v197_v5, %v197_v5  ;;  %v6488_v10 = vld [vmem:[#allocation10 + $0x600] ss:$24 sps:$4 sm:$0xff]   ;;  %v6496_v12 = vld [vmem:[#allocation10 + $0x634] ss:$24 sps:$4 sm:$0xff]  }
  0xdd   :  { %2276 = vmatprep.subr.bf16.mxu1 %v6430_v25  ;;  %v6493_v7 = vld [vmem:[#allocation10 + $0xc] ss:$24 sps:$4 sm:$0xff]   ;;  %v6491_v11 = vld [vmem:[#allocation10 + $0x8] ss:$24 sps:$4 sm:$0xff]   ;;  %v6499_v13 = vld [vmem:[#allocation10 + $0x3c] ss:$24 sps:$4 sm:$0xff]  }
  0xde   :  { %v6494_v14 = vld [vmem:[#allocation10 + $0x630] ss:$24 sps:$4 sm:$0xff]   ;;  %v6502_v16 = vld [vmem:[#allocation10 + $0x664] ss:$24 sps:$4 sm:$0xff]   ;;  %v6500_v18 = vld [vmem:[#allocation10 + $0x660] ss:$24 sps:$4 sm:$0xff]  }
  0xdf   :  { %2236 = vmatpush1.bf16.msra.mxu0 %v6432_v26  ;;  %v6497_v15 = vld [vmem:[#allocation10 + $0x38] ss:$24 sps:$4 sm:$0xff]   ;;  %v6505_v17 = vld [vmem:[#allocation10 + $0x6c] ss:$24 sps:$4 sm:$0xff]   ;;  %v6503_v19 = vld [vmem:[#allocation10 + $0x68] ss:$24 sps:$4 sm:$0xff]  }
  0xe0   :  { %2277 = vmatpush1.bf16.msra.mxu1 %v6433_v27  ;;  %2237 = vmatprep.subr.bf16.mxu0 %v6434_v28  ;;  %v6508_v20 = vld [vmem:[#allocation10 + $0x694] ss:$24 sps:$4 sm:$0xff]   ;;  %v6506_v22 = vld [vmem:[#allocation10 + $0x690] ss:$24 sps:$4 sm:$0xff]   ;;  %v6514_v24 = vld [vmem:[#allocation10 + $0x6c4] ss:$24 sps:$4 sm:$0xff]  }
  0xe1   :  { %2278 = vmatprep.subr.bf16.mxu1 %v6436_v29  ;;  %v6511_v21 = vld [vmem:[#allocation10 + $0x9c] ss:$24 sps:$4 sm:$0xff]   ;;  %v6509_v23 = vld [vmem:[#allocation10 + $0x98] ss:$24 sps:$4 sm:$0xff]   ;;  %v6517_v25 = vld [vmem:[#allocation10 + $0xcc] ss:$24 sps:$4 sm:$0xff]  }
  0xe2   :  { %v6512_v26 = vld [vmem:[#allocation10 + $0x6c0] ss:$24 sps:$4 sm:$0xff]   ;;  %v6520_v28 = vld [vmem:[#allocation10 + $0x6f4] ss:$24 sps:$4 sm:$0xff]   ;;  %v6574_v4 = vld [vmem:[#allocation10 + $0x8a4] ss:$24 sps:$4 sm:$0xff]  }
  0xe3   :  { %2238 = vmatpush1.bf16.msra.mxu0 %v6438_v30  ;;  %v6515_v27 = vld [vmem:[#allocation10 + $0xc8] ss:$24 sps:$4 sm:$0xff]   ;;  %v6523_v29 = vld [vmem:[#allocation10 + $0xfc] ss:$24 sps:$4 sm:$0xff]   ;;  %v6545_v50 = vld [vmem:[#allocation10 + $0x1b8] ss:$24 sps:$4 sm:$0xff]  }
  0xe4   :  { %2279 = vmatpush1.bf16.msra.mxu1 %v6439_v31  ;;  %2239 = vmatprep.subr.bf16.mxu0 %v6440_v32  ;;  %v6518_v30 = vld [vmem:[#allocation10 + $0x6f0] ss:$24 sps:$4 sm:$0xff]   ;;  %v6526_v32 = vld [vmem:[#allocation10 + $0x724] ss:$24 sps:$4 sm:$0xff]   ;;  %v6544_v46 = vld [vmem:[#allocation10 + $0x7b4] ss:$24 sps:$4 sm:$0xff]  }
  0xe5   :  { %2280 = vmatprep.subr.bf16.mxu1 %v6442_v33  ;;  %v6521_v31 = vld [vmem:[#allocation10 + $0xf8] ss:$24 sps:$4 sm:$0xff]   ;;  %v6529_v33 = vld [vmem:[#allocation10 + $0x12c] ss:$24 sps:$4 sm:$0xff]   ;;  %vm8477_vm3 = vmpackc.low %vm5086_vm1, %vm7532_vm2  ;;  %vm5331_vm5 = vcmask 15360  }
  0xe6   :  { %v6577_v5 = vld [vmem:[#allocation10 + $0x2ac] ss:$24 sps:$4 sm:$0xff]  }
  0xe7   :  { %2240 = vmatpush1.bf16.msra.mxu0 %v6444_v34  ;;  %v200_v34 = vld [vmem:[#allocation6 + $0x28] sm:$0xff] }
  0xe8   :  { %2281 = vmatpush1.bf16.msra.mxu1 %v6445_v35  ;;  %2241 = vmatprep.subr.bf16.mxu0 %v6446_v36  ;;  %v7786_v35 = vpack.c.bf16 %v200_v34, %v200_v34  ;;  %v6524_v36 = vld [vmem:[#allocation10 + $0x720] ss:$24 sps:$4 sm:$0xff]  }
  0xe9   :  { %2282 = vmatprep.subr.bf16.mxu1 %v6448_v37  ;;  %v6527_v37 = vld [vmem:[#allocation10 + $0x128] ss:$24 sps:$4 sm:$0xff]  }
  0xea   :  { %v6608_v34 = vld [vmem:[#allocation10 + $0x3c8] ss:$24 sps:$4 sm:$0xff]  }
  0xeb   :  { %2242 = vmatpush1.bf16.msra.mxu0 %v6450_v38  ;;  %v6532_v38 = vld [vmem:[#allocation10 + $0x754] ss:$24 sps:$4 sm:$0xff]  }
  0xec   :  { %2283 = vmatpush1.bf16.msra.mxu1 %v6451_v39  ;;  %2243 = vmatprep.subr.bf16.mxu0 %v6452_v40  ;;  %v6535_v39 = vld [vmem:[#allocation10 + $0x15c] ss:$24 sps:$4 sm:$0xff]   ;;  %v6530_v40 = vld [vmem:[#allocation10 + $0x750] ss:$24 sps:$4 sm:$0xff]  }
  0xed   :  { %2284 = vmatprep.subr.bf16.mxu1 %v6454_v41  ;;  %v6533_v41 = vld [vmem:[#allocation10 + $0x158] ss:$24 sps:$4 sm:$0xff]  }
  0xef   :  { %2244 = vmatpush1.bf16.msra.mxu0 %v6456_v42  ;;  %v6538_v42 = vld [vmem:[#allocation10 + $0x784] ss:$24 sps:$4 sm:$0xff]  }
  0xf0   :  { %2285 = vmatpush1.bf16.msra.mxu1 %v6457_v43  ;;  %2245 = vmatprep.subr.bf16.mxu0 %v6458_v44  ;;  %v6541_v43 = vld [vmem:[#allocation10 + $0x18c] ss:$24 sps:$4 sm:$0xff]   ;;  %v6536_v44 = vld [vmem:[#allocation10 + $0x780] ss:$24 sps:$4 sm:$0xff]  }
  0xf1   :  { %2286 = vmatprep.subr.bf16.mxu1 %v6460_v45  ;;  %v6539_v45 = vld [vmem:[#allocation10 + $0x188] ss:$24 sps:$4 sm:$0xff]  }
  0xf3   :  { %2246 = vmatpush1.bf16.msra.mxu0 %v6462_v47  ;;  %v6547_v47 = vld [vmem:[#allocation10 + $0x1bc] ss:$24 sps:$4 sm:$0xff]  }
  0xf4   :  { %2287 = vmatpush1.bf16.msra.mxu1 %v6463_v48  ;;  %2247 = vmatprep.subr.bf16.mxu0 %v6464_v51  ;;  %v6542_v48 = vld [vmem:[#allocation10 + $0x7b0] ss:$24 sps:$4 sm:$0xff]   ;;  %v6550_v51 = vld [vmem:[#allocation10 + $0x7e4] ss:$24 sps:$4 sm:$0xff]  }
  0xf5   :  { %2288 = vmatprep.subr.bf16.mxu1 %v6466_v53  ;;  %v6553_v53 = vld [vmem:[#allocation10 + $0x1ec] ss:$24 sps:$4 sm:$0xff]  }
  0xf7   :  { %2248 = vmatpush1.bf16.msra.mxu0 %v6468_v54  ;;  %v6548_v54 = vld [vmem:[#allocation10 + $0x7e0] ss:$24 sps:$4 sm:$0xff]  }
  0xf8   :  { %2289 = vmatpush1.bf16.msra.mxu1 %v6469_v55  ;;  %2249 = vmatprep.subr.bf16.mxu0 %v6470_v56  ;;  %v6551_v55 = vld [vmem:[#allocation10 + $0x1e8] ss:$24 sps:$4 sm:$0xff]   ;;  %v6556_v56 = vld [vmem:[#allocation10 + $0x814] ss:$24 sps:$4 sm:$0xff]  }
  0xf9   :  { %2290 = vmatprep.subr.bf16.mxu1 %v6472_v57  ;;  %v6559_v57 = vld [vmem:[#allocation10 + $0x21c] ss:$24 sps:$4 sm:$0xff]  }
  0xfb   :  { %2250 = vmatpush1.bf16.msra.mxu0 %v6474_v58  ;;  %v6554_v58 = vld [vmem:[#allocation10 + $0x810] ss:$24 sps:$4 sm:$0xff]  }
  0xfc   :  { %2291 = vmatpush1.bf16.msra.mxu1 %v6475_v59  ;;  %2251 = vmatprep.subr.bf16.mxu0 %v6476_v60  ;;  %v6557_v59 = vld [vmem:[#allocation10 + $0x218] ss:$24 sps:$4 sm:$0xff]   ;;  %v6562_v60 = vld [vmem:[#allocation10 + $0x844] ss:$24 sps:$4 sm:$0xff]  }
  0xfd   :  { %2292 = vmatprep.subr.bf16.mxu1 %v6478_v61  ;;  %v6565_v61 = vld [vmem:[#allocation10 + $0x24c] ss:$24 sps:$4 sm:$0xff]  }
  0xff   :  { %2252 = vmatpush1.bf16.msra.mxu0 %v6480_v62  ;;  %v6560_v62 = vld [vmem:[#allocation10 + $0x840] ss:$24 sps:$4 sm:$0xff]  }
 0x100   :  { %2293 = vmatpush1.bf16.msra.mxu1 %v6481_v63  ;;  %2253 = vmatprep.subr.bf16.mxu0 %v6482_v0  ;;  %v6563_v63 = vld [vmem:[#allocation10 + $0x248] ss:$24 sps:$4 sm:$0xff]   ;;  %v6568_v0 = vld [vmem:[#allocation10 + $0x874] ss:$24 sps:$4 sm:$0xff]  }
 0x101   :  { %2294 = vmatprep.subr.bf16.mxu1 %v6484_v1  ;;  %v6571_v1 = vld [vmem:[#allocation10 + $0x27c] ss:$24 sps:$4 sm:$0xff]  }
 0x103   :  { %2254 = vmatpush1.bf16.msra.mxu0 %v6486_v2  ;;  %v6566_v2 = vld [vmem:[#allocation10 + $0x870] ss:$24 sps:$4 sm:$0xff]  }
 0x104   :  { %2295 = vmatpush1.bf16.msra.mxu1 %v6487_v3  ;;  %2305 = vmatprep.subr.bf16.mxu0 %v6490_v6  ;;  %v6569_v3 = vld [vmem:[#allocation10 + $0x278] ss:$24 sps:$4 sm:$0xff]  }
 0x105   :  { %2346 = vmatprep.subr.bf16.mxu1 %v6493_v7  ;;  %v6572_v6 = vld [vmem:[#allocation10 + $0x8a0] ss:$24 sps:$4 sm:$0xff]  }
 0x106   :  { %2256 = vmatmul.mubr.bf16.vlgmr.msra.gmra.mrb[0].mxu0 %v7779_v8  ;;  %v6575_v7 = vld [vmem:[#allocation10 + $0x2a8] ss:$24 sps:$4 sm:$0xff]  }
 0x107   :  { %2297 = vmatmul.mubr.bf16.vlgmr.msra.gmra.mrb[0].mxu1 %v7781_v9  ;;  %2306 = vmatpush1.bf16.msra.mxu0 %v6488_v10  ;;  %v6580_v10 = vld [vmem:[#allocation10 + $0x8d4] ss:$24 sps:$4 sm:$0xff]  }
 0x108   :  { %2347 = vmatpush1.bf16.msra.mxu1 %v6491_v11  ;;  %2307 = vmatprep.subr.bf16.mxu0 %v6496_v12  ;;  %v6583_v11 = vld [vmem:[#allocation10 + $0x2dc] ss:$24 sps:$4 sm:$0xff]   ;;  %v6578_v12 = vld [vmem:[#allocation10 + $0x8d0] ss:$24 sps:$4 sm:$0xff]  }
 0x109   :  { %2348 = vmatprep.subr.bf16.mxu1 %v6499_v13  ;;  %2378 = vmatprep.mubr.bf16.mxu1 %v7773_v49  ;;  %v6581_v13 = vld [vmem:[#allocation10 + $0x2d8] ss:$24 sps:$4 sm:$0xff]  }
 0x10a   :  { %2337 = vmatprep.mubr.bf16.mxu0 %v7786_v35 }
 0x10b   :  { %2308 = vmatpush1.bf16.msra.mxu0 %v6494_v14  ;;  %v199_v14 = vld [vmem:[#allocation6 + $0x20] sm:$0xff] }
 0x10c   :  { %2349 = vmatpush1.bf16.msra.mxu1 %v6497_v15  ;;  %2309 = vmatprep.subr.bf16.mxu0 %v6502_v16  ;;  %v6586_v15 = vld [vmem:[#allocation10 + $0x30c] ss:$24 sps:$4 sm:$0xff]  }
 0x10d   :  { %2350 = vmatprep.subr.bf16.mxu1 %v6505_v17  ;;  %v6589_v16 = vld [vmem:[#allocation10 + $0x60c] ss:$24 sps:$4 sm:$0xff]   ;;  %v7789_v17 = vpack.c.bf16 %v199_v14, %v199_v14 }
 0x10e   :  { %v6673_v14 = vld [vmem:[#allocation10 + $0x8ac] ss:$24 sps:$4 sm:$0xff]  }
 0x10f   :  { %2310 = vmatpush1.bf16.msra.mxu0 %v6500_v18  ;;  %v6584_v18 = vld [vmem:[#allocation10 + $0x308] ss:$24 sps:$4 sm:$0xff]  }
 0x110   :  { %2351 = vmatpush1.bf16.msra.mxu1 %v6503_v19  ;;  %2311 = vmatprep.subr.bf16.mxu0 %v6508_v20  ;;  %v6587_v19 = vld [vmem:[#allocation10 + $0x608] ss:$24 sps:$4 sm:$0xff]   ;;  %v6592_v20 = vld [vmem:[#allocation10 + $0x33c] ss:$24 sps:$4 sm:$0xff]  }
 0x111   :  { %2352 = vmatprep.subr.bf16.mxu1 %v6511_v21  ;;  %v6595_v21 = vld [vmem:[#allocation10 + $0x63c] ss:$24 sps:$4 sm:$0xff]  }
 0x113   :  { %2312 = vmatpush1.bf16.msra.mxu0 %v6506_v22  ;;  %v6590_v22 = vld [vmem:[#allocation10 + $0x338] ss:$24 sps:$4 sm:$0xff]  }
 0x114   :  { %2353 = vmatpush1.bf16.msra.mxu1 %v6509_v23  ;;  %2313 = vmatprep.subr.bf16.mxu0 %v6514_v24  ;;  %v6593_v23 = vld [vmem:[#allocation10 + $0x638] ss:$24 sps:$4 sm:$0xff]   ;;  %v6598_v24 = vld [vmem:[#allocation10 + $0x36c] ss:$24 sps:$4 sm:$0xff]  }
 0x115   :  { %2354 = vmatprep.subr.bf16.mxu1 %v6517_v25  ;;  %v6601_v25 = vld [vmem:[#allocation10 + $0x66c] ss:$24 sps:$4 sm:$0xff]  }
 0x117   :  { %2314 = vmatpush1.bf16.msra.mxu0 %v6512_v26  ;;  %v6596_v26 = vld [vmem:[#allocation10 + $0x368] ss:$24 sps:$4 sm:$0xff]  }
 0x118   :  { %2355 = vmatpush1.bf16.msra.mxu1 %v6515_v27  ;;  %2315 = vmatprep.subr.bf16.mxu0 %v6520_v28  ;;  %v6599_v27 = vld [vmem:[#allocation10 + $0x668] ss:$24 sps:$4 sm:$0xff]   ;;  %v6604_v28 = vld [vmem:[#allocation10 + $0x39c] ss:$24 sps:$4 sm:$0xff]  }
 0x119   :  { %2356 = vmatprep.subr.bf16.mxu1 %v6523_v29  ;;  %v6607_v29 = vld [vmem:[#allocation10 + $0x69c] ss:$24 sps:$4 sm:$0xff]  }
 0x11b   :  { %2316 = vmatpush1.bf16.msra.mxu0 %v6518_v30  ;;  %v6602_v30 = vld [vmem:[#allocation10 + $0x398] ss:$24 sps:$4 sm:$0xff]  }
 0x11c   :  { %2357 = vmatpush1.bf16.msra.mxu1 %v6521_v31  ;;  %2317 = vmatprep.subr.bf16.mxu0 %v6526_v32  ;;  %v6605_v31 = vld [vmem:[#allocation10 + $0x698] ss:$24 sps:$4 sm:$0xff]   ;;  %v6610_v32 = vld [vmem:[#allocation10 + $0x3cc] ss:$24 sps:$4 sm:$0xff]  }
 0x11d   :  { %2358 = vmatprep.subr.bf16.mxu1 %v6529_v33  ;;  %v6613_v33 = vld [vmem:[#allocation10 + $0x6cc] ss:$24 sps:$4 sm:$0xff]  }
 0x11f   :  { %2318 = vmatpush1.bf16.msra.mxu0 %v6524_v36  ;;  %v6611_v36 = vld [vmem:[#allocation10 + $0x6c8] ss:$24 sps:$4 sm:$0xff]  }
 0x120   :  { %2359 = vmatpush1.bf16.msra.mxu1 %v6527_v37  ;;  %2319 = vmatprep.subr.bf16.mxu0 %v6532_v38  ;;  %v6616_v37 = vld [vmem:[#allocation10 + $0x3fc] ss:$24 sps:$4 sm:$0xff]  }
 0x121   :  { %2360 = vmatprep.subr.bf16.mxu1 %v6535_v39  ;;  %v6619_v38 = vld [vmem:[#allocation10 + $0x6fc] ss:$24 sps:$4 sm:$0xff]   ;;  %v6614_v39 = vld [vmem:[#allocation10 + $0x3f8] ss:$24 sps:$4 sm:$0xff]  }
 0x123   :  { %2320 = vmatpush1.bf16.msra.mxu0 %v6530_v40  ;;  %v6617_v40 = vld [vmem:[#allocation10 + $0x6f8] ss:$24 sps:$4 sm:$0xff]  }
 0x124   :  { %2361 = vmatpush1.bf16.msra.mxu1 %v6533_v41  ;;  %2321 = vmatprep.subr.bf16.mxu0 %v6538_v42  ;;  %v6622_v41 = vld [vmem:[#allocation10 + $0x42c] ss:$24 sps:$4 sm:$0xff]  }
 0x125   :  { %2362 = vmatprep.subr.bf16.mxu1 %v6541_v43  ;;  %v6625_v42 = vld [vmem:[#allocation10 + $0x72c] ss:$24 sps:$4 sm:$0xff]   ;;  %v6620_v43 = vld [vmem:[#allocation10 + $0x428] ss:$24 sps:$4 sm:$0xff]  }
 0x127   :  { %2322 = vmatpush1.bf16.msra.mxu0 %v6536_v44  ;;  %v6623_v44 = vld [vmem:[#allocation10 + $0x728] ss:$24 sps:$4 sm:$0xff]  }
 0x128   :  { %2363 = vmatpush1.bf16.msra.mxu1 %v6539_v45  ;;  %2323 = vmatprep.subr.bf16.mxu0 %v6544_v46  ;;  %v6628_v45 = vld [vmem:[#allocation10 + $0x45c] ss:$24 sps:$4 sm:$0xff]  }
 0x129   :  { %2364 = vmatprep.subr.bf16.mxu1 %v6547_v47  ;;  %v6631_v46 = vld [vmem:[#allocation10 + $0x75c] ss:$24 sps:$4 sm:$0xff]   ;;  %v6626_v47 = vld [vmem:[#allocation10 + $0x458] ss:$24 sps:$4 sm:$0xff]  }
 0x12b   :  { %2324 = vmatpush1.bf16.msra.mxu0 %v6542_v48  ;;  %v6629_v48 = vld [vmem:[#allocation10 + $0x758] ss:$24 sps:$4 sm:$0xff]  }
 0x12c   :  { %2365 = vmatpush1.bf16.msra.mxu1 %v6545_v50  ;;  %2325 = vmatprep.subr.bf16.mxu0 %v6550_v51  ;;  %v6634_v50 = vld [vmem:[#allocation10 + $0x48c] ss:$24 sps:$4 sm:$0xff]  }
 0x12d   :  { %2366 = vmatprep.subr.bf16.mxu1 %v6553_v53  ;;  %v6637_v51 = vld [vmem:[#allocation10 + $0x78c] ss:$24 sps:$4 sm:$0xff]   ;;  %v6632_v53 = vld [vmem:[#allocation10 + $0x488] ss:$24 sps:$4 sm:$0xff]  }
 0x12f   :  { %2326 = vmatpush1.bf16.msra.mxu0 %v6548_v54  ;;  %v6635_v54 = vld [vmem:[#allocation10 + $0x788] ss:$24 sps:$4 sm:$0xff]  }
 0x130   :  { %2367 = vmatpush1.bf16.msra.mxu1 %v6551_v55  ;;  %2327 = vmatprep.subr.bf16.mxu0 %v6556_v56  ;;  %v6640_v55 = vld [vmem:[#allocation10 + $0x4bc] ss:$24 sps:$4 sm:$0xff]  }
 0x131   :  { %2368 = vmatprep.subr.bf16.mxu1 %v6559_v57  ;;  %v6643_v56 = vld [vmem:[#allocation10 + $0x7bc] ss:$24 sps:$4 sm:$0xff]   ;;  %v6638_v57 = vld [vmem:[#allocation10 + $0x4b8] ss:$24 sps:$4 sm:$0xff]  }
 0x133   :  { %2328 = vmatpush1.bf16.msra.mxu0 %v6554_v58  ;;  %v6641_v58 = vld [vmem:[#allocation10 + $0x7b8] ss:$24 sps:$4 sm:$0xff]  }
 0x134   :  { %2369 = vmatpush1.bf16.msra.mxu1 %v6557_v59  ;;  %2329 = vmatprep.subr.bf16.mxu0 %v6562_v60  ;;  %v6646_v59 = vld [vmem:[#allocation10 + $0x4ec] ss:$24 sps:$4 sm:$0xff]  }
 0x135   :  { %2370 = vmatprep.subr.bf16.mxu1 %v6565_v61  ;;  %v6649_v60 = vld [vmem:[#allocation10 + $0x7ec] ss:$24 sps:$4 sm:$0xff]   ;;  %v6644_v61 = vld [vmem:[#allocation10 + $0x4e8] ss:$24 sps:$4 sm:$0xff]  }
 0x137   :  { %2330 = vmatpush1.bf16.msra.mxu0 %v6560_v62  ;;  %v6647_v62 = vld [vmem:[#allocation10 + $0x7e8] ss:$24 sps:$4 sm:$0xff]  }
 0x138   :  { %2371 = vmatpush1.bf16.msra.mxu1 %v6563_v63  ;;  %2331 = vmatprep.subr.bf16.mxu0 %v6568_v0  ;;  %v6652_v63 = vld [vmem:[#allocation10 + $0x51c] ss:$24 sps:$4 sm:$0xff]  }
 0x139   :  { %2372 = vmatprep.subr.bf16.mxu1 %v6571_v1  ;;  %v6655_v0 = vld [vmem:[#allocation10 + $0x81c] ss:$24 sps:$4 sm:$0xff]   ;;  %v6650_v1 = vld [vmem:[#allocation10 + $0x518] ss:$24 sps:$4 sm:$0xff]  }
 0x13b   :  { %2332 = vmatpush1.bf16.msra.mxu0 %v6566_v2  ;;  %v6653_v2 = vld [vmem:[#allocation10 + $0x818] ss:$24 sps:$4 sm:$0xff]  }
 0x13c   :  { %2373 = vmatpush1.bf16.msra.mxu1 %v6569_v3  ;;  %2333 = vmatprep.subr.bf16.mxu0 %v6574_v4  ;;  %v6658_v3 = vld [vmem:[#allocation10 + $0x54c] ss:$24 sps:$4 sm:$0xff]  }
 0x13d   :  { %2374 = vmatprep.subr.bf16.mxu1 %v6577_v5  ;;  %v6661_v4 = vld [vmem:[#allocation10 + $0x84c] ss:$24 sps:$4 sm:$0xff]   ;;  %v6656_v5 = vld [vmem:[#allocation10 + $0x548] ss:$24 sps:$4 sm:$0xff]  }
 0x13f   :  { %2334 = vmatpush1.bf16.msra.mxu0 %v6572_v6  ;;  %v6659_v6 = vld [vmem:[#allocation10 + $0x848] ss:$24 sps:$4 sm:$0xff]  }
 0x140   :  { %2375 = vmatpush1.bf16.msra.mxu1 %v6575_v7  ;;  %2335 = vmatprep.subr.bf16.mxu0 %v6580_v10  ;;  %v6664_v7 = vld [vmem:[#allocation10 + $0x57c] ss:$24 sps:$4 sm:$0xff]  }
 0x141   :  { %2376 = vmatprep.subr.bf16.mxu1 %v6583_v11  ;;  %v6667_v10 = vld [vmem:[#allocation10 + $0x87c] ss:$24 sps:$4 sm:$0xff]   ;;  %v6662_v11 = vld [vmem:[#allocation10 + $0x578] ss:$24 sps:$4 sm:$0xff]  }
 0x143   :  { %2336 = vmatpush1.bf16.msra.mxu0 %v6578_v12  ;;  %v6665_v12 = vld [vmem:[#allocation10 + $0x878] ss:$24 sps:$4 sm:$0xff]  }
 0x144   :  { %2377 = vmatpush1.bf16.msra.mxu1 %v6581_v13  ;;  %2387 = vmatprep.subr.bf16.mxu0 %v6586_v15  ;;  %v6670_v13 = vld [vmem:[#allocation10 + $0x5ac] ss:$24 sps:$4 sm:$0xff]   ;;  %v6668_v15 = vld [vmem:[#allocation10 + $0x5a8] ss:$24 sps:$4 sm:$0xff]  }
 0x145   :  { %2428 = vmatprep.subr.bf16.mxu1 %v6589_v16  ;;  %v6671_v16 = vld [vmem:[#allocation10 + $0x8a8] ss:$24 sps:$4 sm:$0xff]  }
 0x146   :  { %2338 = vmatmul.mubr.bf16.vlgmr.msra.gmra.mrb[4].mxu0 %v7789_v17 }
 0x147   :  { %2379 = vmatmul.mubr.bf16.vlgmr.msra.gmra.mrb[4].mxu1 %v7779_v8  ;;  %2388 = vmatpush1.bf16.msra.mxu0 %v6584_v18  ;;  %v6676_v18 = vld [vmem:[#allocation10 + $0x5dc] ss:$24 sps:$4 sm:$0xff]  }
 0x148   :  { %2429 = vmatpush1.bf16.msra.mxu1 %v6587_v19  ;;  %2389 = vmatprep.subr.bf16.mxu0 %v6592_v20  ;;  %v6679_v19 = vld [vmem:[#allocation10 + $0x8dc] ss:$24 sps:$4 sm:$0xff]   ;;  %v6674_v20 = vld [vmem:[#allocation10 + $0x5d8] ss:$24 sps:$4 sm:$0xff]  }
 0x149   :  { %2430 = vmatprep.subr.bf16.mxu1 %v6595_v21  ;;  %2419 = vmatprep.mubr.bf16.mxu0 %v7775_v52  ;;  %v6677_v21 = vld [vmem:[#allocation10 + $0x8d8] ss:$24 sps:$4 sm:$0xff]  }
 0x14a   :  { %2460 = vmatprep.mubr.bf16.mxu1 %v7786_v35 }
 0x14b   :  { %2390 = vmatpush1.bf16.msra.mxu0 %v6590_v22  ;;  %v6682_v22 = vld [vmem:[#allocation10 + $0x14] ss:$24 sps:$4 sm:$0xff]  }
 0x14c   :  { %2431 = vmatpush1.bf16.msra.mxu1 %v6593_v23  ;;  %2391 = vmatprep.subr.bf16.mxu0 %v6598_v24  ;;  %v6685_v23 = vld [vmem:[#allocation10 + $0x314] ss:$24 sps:$4 sm:$0xff]   ;;  %v6680_v24 = vld [vmem:[#allocation10 + $0x10] ss:$24 sps:$4 sm:$0xff]  }
 0x14d   :  { %2432 = vmatprep.subr.bf16.mxu1 %v6601_v25  ;;  %v6683_v25 = vld [vmem:[#allocation10 + $0x310] ss:$24 sps:$4 sm:$0xff]  }
 0x14f   :  { %2392 = vmatpush1.bf16.msra.mxu0 %v6596_v26  ;;  %v6688_v26 = vld [vmem:[#allocation10 + $0x44] ss:$24 sps:$4 sm:$0xff]  }
 0x150   :  { %2433 = vmatpush1.bf16.msra.mxu1 %v6599_v27  ;;  %2393 = vmatprep.subr.bf16.mxu0 %v6604_v28  ;;  %v6691_v27 = vld [vmem:[#allocation10 + $0x344] ss:$24 sps:$4 sm:$0xff]   ;;  %v6686_v28 = vld [vmem:[#allocation10 + $0x40] ss:$24 sps:$4 sm:$0xff]  }
 0x151   :  { %2434 = vmatprep.subr.bf16.mxu1 %v6607_v29  ;;  %v6689_v29 = vld [vmem:[#allocation10 + $0x340] ss:$24 sps:$4 sm:$0xff]  }
 0x153   :  { %2394 = vmatpush1.bf16.msra.mxu0 %v6602_v30  ;;  %v6694_v30 = vld [vmem:[#allocation10 + $0x74] ss:$24 sps:$4 sm:$0xff]  }
 0x154   :  { %2435 = vmatpush1.bf16.msra.mxu1 %v6605_v31  ;;  %2395 = vmatprep.subr.bf16.mxu0 %v6610_v32  ;;  %v6697_v31 = vld [vmem:[#allocation10 + $0x374] ss:$24 sps:$4 sm:$0xff]   ;;  %v6692_v32 = vld [vmem:[#allocation10 + $0x70] ss:$24 sps:$4 sm:$0xff]  }
 0x155   :  { %2436 = vmatprep.subr.bf16.mxu1 %v6613_v33  ;;  %v6695_v33 = vld [vmem:[#allocation10 + $0x370] ss:$24 sps:$4 sm:$0xff]  }
 0x157   :  { %2396 = vmatpush1.bf16.msra.mxu0 %v6608_v34  ;;  %v6700_v34 = vld [vmem:[#allocation10 + $0xa4] ss:$24 sps:$4 sm:$0xff]  }
 0x158   :  { %2437 = vmatpush1.bf16.msra.mxu1 %v6611_v36  ;;  %2397 = vmatprep.subr.bf16.mxu0 %v6616_v37  ;;  %v6703_v36 = vld [vmem:[#allocation10 + $0x3a4] ss:$24 sps:$4 sm:$0xff]   ;;  %v6698_v37 = vld [vmem:[#allocation10 + $0xa0] ss:$24 sps:$4 sm:$0xff]  }
 0x159   :  { %2438 = vmatprep.subr.bf16.mxu1 %v6619_v38  ;;  %v6701_v38 = vld [vmem:[#allocation10 + $0x3a0] ss:$24 sps:$4 sm:$0xff]  }
 0x15b   :  { %2398 = vmatpush1.bf16.msra.mxu0 %v6614_v39  ;;  %v6706_v39 = vld [vmem:[#allocation10 + $0xd4] ss:$24 sps:$4 sm:$0xff]  }
 0x15c   :  { %2439 = vmatpush1.bf16.msra.mxu1 %v6617_v40  ;;  %2399 = vmatprep.subr.bf16.mxu0 %v6622_v41  ;;  %v6709_v40 = vld [vmem:[#allocation10 + $0x3d4] ss:$24 sps:$4 sm:$0xff]   ;;  %v6712_v41 = vld [vmem:[#allocation10 + $0x104] ss:$24 sps:$4 sm:$0xff]  }
 0x15d   :  { %2440 = vmatprep.subr.bf16.mxu1 %v6625_v42  ;;  %v6715_v42 = vld [vmem:[#allocation10 + $0x404] ss:$24 sps:$4 sm:$0xff]  }
 0x15f   :  { %2400 = vmatpush1.bf16.msra.mxu0 %v6620_v43  ;;  %v6710_v43 = vld [vmem:[#allocation10 + $0x100] ss:$24 sps:$4 sm:$0xff]  }
 0x160   :  { %2441 = vmatpush1.bf16.msra.mxu1 %v6623_v44  ;;  %2401 = vmatprep.subr.bf16.mxu0 %v6628_v45  ;;  %v6713_v44 = vld [vmem:[#allocation10 + $0x400] ss:$24 sps:$4 sm:$0xff]   ;;  %v6718_v45 = vld [vmem:[#allocation10 + $0x134] ss:$24 sps:$4 sm:$0xff]  }
 0x161   :  { %2442 = vmatprep.subr.bf16.mxu1 %v6631_v46  ;;  %v6721_v46 = vld [vmem:[#allocation10 + $0x434] ss:$24 sps:$4 sm:$0xff]  }
 0x163   :  { %2402 = vmatpush1.bf16.msra.mxu0 %v6626_v47  ;;  %v6716_v47 = vld [vmem:[#allocation10 + $0x130] ss:$24 sps:$4 sm:$0xff]  }
 0x164   :  { %2443 = vmatpush1.bf16.msra.mxu1 %v6629_v48  ;;  %2403 = vmatprep.subr.bf16.mxu0 %v6634_v50  ;;  %v6719_v48 = vld [vmem:[#allocation10 + $0x430] ss:$24 sps:$4 sm:$0xff]   ;;  %v6724_v50 = vld [vmem:[#allocation10 + $0x164] ss:$24 sps:$4 sm:$0xff]  }
 0x165   :  { %2444 = vmatprep.subr.bf16.mxu1 %v6637_v51  ;;  %v6727_v51 = vld [vmem:[#allocation10 + $0x464] ss:$24 sps:$4 sm:$0xff]  }
 0x167   :  { %2404 = vmatpush1.bf16.msra.mxu0 %v6632_v53  ;;  %v6722_v53 = vld [vmem:[#allocation10 + $0x160] ss:$24 sps:$4 sm:$0xff]  }
 0x168   :  { %2445 = vmatpush1.bf16.msra.mxu1 %v6635_v54  ;;  %2405 = vmatprep.subr.bf16.mxu0 %v6640_v55  ;;  %v6725_v54 = vld [vmem:[#allocation10 + $0x460] ss:$24 sps:$4 sm:$0xff]   ;;  %v6730_v55 = vld [vmem:[#allocation10 + $0x194] ss:$24 sps:$4 sm:$0xff]  }
 0x169   :  { %2446 = vmatprep.subr.bf16.mxu1 %v6643_v56  ;;  %v6733_v56 = vld [vmem:[#allocation10 + $0x494] ss:$24 sps:$4 sm:$0xff]  }
 0x16b   :  { %2406 = vmatpush1.bf16.msra.mxu0 %v6638_v57  ;;  %v6728_v57 = vld [vmem:[#allocation10 + $0x190] ss:$24 sps:$4 sm:$0xff]  }
 0x16c   :  { %2447 = vmatpush1.bf16.msra.mxu1 %v6641_v58  ;;  %2407 = vmatprep.subr.bf16.mxu0 %v6646_v59  ;;  %v6731_v58 = vld [vmem:[#allocation10 + $0x490] ss:$24 sps:$4 sm:$0xff]   ;;  %v6736_v59 = vld [vmem:[#allocation10 + $0x1c4] ss:$24 sps:$4 sm:$0xff]  }
 0x16d   :  { %2448 = vmatprep.subr.bf16.mxu1 %v6649_v60  ;;  %v6739_v60 = vld [vmem:[#allocation10 + $0x4c4] ss:$24 sps:$4 sm:$0xff]  }
 0x16f   :  { %2408 = vmatpush1.bf16.msra.mxu0 %v6644_v61  ;;  %v6734_v61 = vld [vmem:[#allocation10 + $0x1c0] ss:$24 sps:$4 sm:$0xff]  }
 0x170   :  { %2449 = vmatpush1.bf16.msra.mxu1 %v6647_v62  ;;  %2409 = vmatprep.subr.bf16.mxu0 %v6652_v63  ;;  %v6737_v62 = vld [vmem:[#allocation10 + $0x4c0] ss:$24 sps:$4 sm:$0xff]   ;;  %v6742_v63 = vld [vmem:[#allocation10 + $0x1f4] ss:$24 sps:$4 sm:$0xff]  }
 0x171   :  { %2450 = vmatprep.subr.bf16.mxu1 %v6655_v0  ;;  %v6745_v0 = vld [vmem:[#allocation10 + $0x4f4] ss:$24 sps:$4 sm:$0xff]  }
 0x173   :  { %2410 = vmatpush1.bf16.msra.mxu0 %v6650_v1  ;;  %v6740_v1 = vld [vmem:[#allocation10 + $0x1f0] ss:$24 sps:$4 sm:$0xff]  }
 0x174   :  { %2451 = vmatpush1.bf16.msra.mxu1 %v6653_v2  ;;  %2411 = vmatprep.subr.bf16.mxu0 %v6658_v3  ;;  %v6743_v2 = vld [vmem:[#allocation10 + $0x4f0] ss:$24 sps:$4 sm:$0xff]   ;;  %v6748_v3 = vld [vmem:[#allocation10 + $0x224] ss:$24 sps:$4 sm:$0xff]  }
 0x175   :  { %2452 = vmatprep.subr.bf16.mxu1 %v6661_v4  ;;  %v6751_v4 = vld [vmem:[#allocation10 + $0x524] ss:$24 sps:$4 sm:$0xff]  }
 0x177   :  { %2412 = vmatpush1.bf16.msra.mxu0 %v6656_v5  ;;  %v6746_v5 = vld [vmem:[#allocation10 + $0x220] ss:$24 sps:$4 sm:$0xff]  }
 0x178   :  { %2453 = vmatpush1.bf16.msra.mxu1 %v6659_v6  ;;  %2413 = vmatprep.subr.bf16.mxu0 %v6664_v7  ;;  %v6749_v6 = vld [vmem:[#allocation10 + $0x520] ss:$24 sps:$4 sm:$0xff]   ;;  %v6754_v7 = vld [vmem:[#allocation10 + $0x254] ss:$24 sps:$4 sm:$0xff]  }
 0x179   :  { %2454 = vmatprep.subr.bf16.mxu1 %v6667_v10  ;;  %v6757_v10 = vld [vmem:[#allocation10 + $0x554] ss:$24 sps:$4 sm:$0xff]  }
 0x17b   :  { %2414 = vmatpush1.bf16.msra.mxu0 %v6662_v11  ;;  %v6752_v11 = vld [vmem:[#allocation10 + $0x250] ss:$24 sps:$4 sm:$0xff]  }
 0x17c   :  { %2455 = vmatpush1.bf16.msra.mxu1 %v6665_v12  ;;  %2415 = vmatprep.subr.bf16.mxu0 %v6670_v13  ;;  %v6755_v12 = vld [vmem:[#allocation10 + $0x550] ss:$24 sps:$4 sm:$0xff]   ;;  %v6760_v13 = vld [vmem:[#allocation10 + $0x284] ss:$24 sps:$4 sm:$0xff]  }
 0x17d   :  { %2456 = vmatprep.subr.bf16.mxu1 %v6673_v14  ;;  %v6763_v14 = vld [vmem:[#allocation10 + $0x584] ss:$24 sps:$4 sm:$0xff]  }
 0x17f   :  { %2416 = vmatpush1.bf16.msra.mxu0 %v6668_v15  ;;  %v6758_v15 = vld [vmem:[#allocation10 + $0x280] ss:$24 sps:$4 sm:$0xff]  }
 0x180   :  { %2457 = vmatpush1.bf16.msra.mxu1 %v6671_v16  ;;  %2417 = vmatprep.subr.bf16.mxu0 %v6676_v18  ;;  %v6761_v16 = vld [vmem:[#allocation10 + $0x580] ss:$24 sps:$4 sm:$0xff]   ;;  %v6766_v18 = vld [vmem:[#allocation10 + $0x2b4] ss:$24 sps:$4 sm:$0xff]  }
 0x181   :  { %2458 = vmatprep.subr.bf16.mxu1 %v6679_v19  ;;  %v6769_v19 = vld [vmem:[#allocation10 + $0x5b4] ss:$24 sps:$4 sm:$0xff]  }
 0x183   :  { %2418 = vmatpush1.bf16.msra.mxu0 %v6674_v20  ;;  %v6764_v20 = vld [vmem:[#allocation10 + $0x2b0] ss:$24 sps:$4 sm:$0xff]  }
 0x184   :  { %2459 = vmatpush1.bf16.msra.mxu1 %v6677_v21  ;;  %2469 = vmatprep.subr.bf16.mxu0 %v6682_v22  ;;  %v6767_v21 = vld [vmem:[#allocation10 + $0x5b0] ss:$24 sps:$4 sm:$0xff]   ;;  %v6772_v22 = vld [vmem:[#allocation10 + $0x2e4] ss:$24 sps:$4 sm:$0xff]  }
 0x185   :  { %2510 = vmatprep.subr.bf16.mxu1 %v6685_v23  ;;  %v6775_v23 = vld [vmem:[#allocation10 + $0x5e4] ss:$24 sps:$4 sm:$0xff]  }
 0x186   :  { %2420 = vmatmul.mubr.bf16.vlgmr.msra.gmra.mrb[8].mxu0 %v7781_v9 }
 0x187   :  { %2461 = vmatmul.mubr.bf16.vlgmr.msra.gmra.mrb[8].mxu1 %v7789_v17  ;;  %2470 = vmatpush1.bf16.msra.mxu0 %v6680_v24  ;;  %v6770_v24 = vld [vmem:[#allocation10 + $0x2e0] ss:$24 sps:$4 sm:$0xff]  }
 0x188   :  { %2511 = vmatpush1.bf16.msra.mxu1 %v6683_v25  ;;  %2471 = vmatprep.subr.bf16.mxu0 %v6688_v26  ;;  %v6773_v25 = vld [vmem:[#allocation10 + $0x5e0] ss:$24 sps:$4 sm:$0xff]   ;;  %v6778_v26 = vld [vmem:[#allocation10 + $0x614] ss:$24 sps:$4 sm:$0xff]  }
 0x189   :  { %2512 = vmatprep.subr.bf16.mxu1 %v6691_v27  ;;  %2501 = vmatprep.mubr.bf16.mxu0 %v7773_v49  ;;  %v6704_v49 = vld [vmem:[#allocation10 + $0xd0] ss:$24 sps:$4 sm:$0xff]   ;;  %v6781_v27 = vld [vmem:[#allocation9 + $0x4] ss:$24 sps:$4 sm:$0xff]  }
 0x18a   :  { %2542 = vmatprep.mubr.bf16.mxu1 %v7775_v52  ;;  %v6707_v52 = vld [vmem:[#allocation10 + $0x3d0] ss:$24 sps:$4 sm:$0xff]  }
 0x18b   :  { %2472 = vmatpush1.bf16.msra.mxu0 %v6686_v28  ;;  %v6776_v28 = vld [vmem:[#allocation10 + $0x610] ss:$24 sps:$4 sm:$0xff]  }
 0x18c   :  { %2513 = vmatpush1.bf16.msra.mxu1 %v6689_v29  ;;  %2473 = vmatprep.subr.bf16.mxu0 %v6694_v30  ;;  %v6779_v29 = vld [vmem:[#allocation9] ss:$24 sps:$4 sm:$0xff]  }
 0x18d   :  { %2514 = vmatprep.subr.bf16.mxu1 %v6697_v31  ;;  %v184_v30 = vld [vmem:[#allocation4 + $0x8] sm:$0xff] }
 0x18e   :  { %v6784_v31 = vld [vmem:[#allocation10 + $0x644] ss:$24 sps:$4 sm:$0xff]  }
 0x18f   :  { %2474 = vmatpush1.bf16.msra.mxu0 %v6692_v32  ;;  %v6787_v32 = vld [vmem:[#allocation9 + $0x34] ss:$24 sps:$4 sm:$0xff]  }
 0x190   :  { %2515 = vmatpush1.bf16.msra.mxu1 %v6695_v33  ;;  %2475 = vmatprep.subr.bf16.mxu0 %v6700_v34  ;;  %v7799_v33 = vpack.c.bf16 %v184_v30, %v184_v30  ;;  %v6782_v34 = vld [vmem:[#allocation10 + $0x640] ss:$24 sps:$4 sm:$0xff]   ;;  %v6857_v30 = vld [vmem:[#allocation9 + $0x270] ss:$24 sps:$4 sm:$0xff]  }
 0x191   :  { %2516 = vmatprep.subr.bf16.mxu1 %v6703_v36  ;;  %v6785_v36 = vld [vmem:[#allocation9 + $0x30] ss:$24 sps:$4 sm:$0xff]  }
 0x193   :  { %2476 = vmatpush1.bf16.msra.mxu0 %v6698_v37  ;;  %v6790_v37 = vld [vmem:[#allocation10 + $0x674] ss:$24 sps:$4 sm:$0xff]  }
 0x194   :  { %2517 = vmatpush1.bf16.msra.mxu1 %v6701_v38  ;;  %2477 = vmatprep.subr.bf16.mxu0 %v6706_v39  ;;  %v6793_v38 = vld [vmem:[#allocation9 + $0x64] ss:$24 sps:$4 sm:$0xff]   ;;  %v6788_v39 = vld [vmem:[#allocation10 + $0x670] ss:$24 sps:$4 sm:$0xff]  }
 0x195   :  { %2518 = vmatprep.subr.bf16.mxu1 %v6709_v40  ;;  %v6791_v40 = vld [vmem:[#allocation9 + $0x60] ss:$24 sps:$4 sm:$0xff]  }
 0x197   :  { %2478 = vmatpush1.bf16.msra.mxu0 %v6704_v49  ;;  %v6796_v49 = vld [vmem:[#allocation10 + $0x6a4] ss:$24 sps:$4 sm:$0xff]  }
 0x198   :  { %2519 = vmatpush1.bf16.msra.mxu1 %v6707_v52  ;;  %2479 = vmatprep.subr.bf16.mxu0 %v6712_v41  ;;  %v6797_v52 = vld [vmem:[#allocation9 + $0x90] ss:$24 sps:$4 sm:$0xff]   ;;  %v6802_v41 = vld [vmem:[#allocation10 + $0x6d4] ss:$24 sps:$4 sm:$0xff]  }
 0x199   :  { %2520 = vmatprep.subr.bf16.mxu1 %v6715_v42  ;;  %v6805_v42 = vld [vmem:[#allocation9 + $0xc4] ss:$24 sps:$4 sm:$0xff]  }
 0x19b   :  { %2480 = vmatpush1.bf16.msra.mxu0 %v6710_v43  ;;  %v6803_v43 = vld [vmem:[#allocation9 + $0xc0] ss:$24 sps:$4 sm:$0xff]  }
 0x19c   :  { %2521 = vmatpush1.bf16.msra.mxu1 %v6713_v44  ;;  %2481 = vmatprep.subr.bf16.mxu0 %v6718_v45  ;;  %v6808_v44 = vld [vmem:[#allocation10 + $0x704] ss:$24 sps:$4 sm:$0xff]   ;;  %v6811_v45 = vld [vmem:[#allocation9 + $0xf4] ss:$24 sps:$4 sm:$0xff]  }
 0x19d   :  { %2522 = vmatprep.subr.bf16.mxu1 %v6721_v46  ;;  %v6806_v46 = vld [vmem:[#allocation10 + $0x700] ss:$24 sps:$4 sm:$0xff]  }
 0x19f   :  { %2482 = vmatpush1.bf16.msra.mxu0 %v6716_v47  ;;  %v6809_v47 = vld [vmem:[#allocation9 + $0xf0] ss:$24 sps:$4 sm:$0xff]  }
 0x1a0   :  { %2523 = vmatpush1.bf16.msra.mxu1 %v6719_v48  ;;  %2483 = vmatprep.subr.bf16.mxu0 %v6724_v50  ;;  %v6814_v48 = vld [vmem:[#allocation10 + $0x734] ss:$24 sps:$4 sm:$0xff]   ;;  %v6817_v50 = vld [vmem:[#allocation9 + $0x124] ss:$24 sps:$4 sm:$0xff]  }
 0x1a1   :  { %2524 = vmatprep.subr.bf16.mxu1 %v6727_v51 }
 0x1a3   :  { %2484 = vmatpush1.bf16.msra.mxu0 %v6722_v53 }
 0x1a4   :  { %2525 = vmatpush1.bf16.msra.mxu1 %v6725_v54  ;;  %2485 = vmatprep.subr.bf16.mxu0 %v6730_v55  ;;  %v6812_v54 = vld [vmem:[#allocation10 + $0x730] ss:$24 sps:$4 sm:$0xff]   ;;  %v6815_v55 = vld [vmem:[#allocation9 + $0x120] ss:$24 sps:$4 sm:$0xff]  }
 0x1a5   :  { %2526 = vmatprep.subr.bf16.mxu1 %v6733_v56 }
 0x1a7   :  { %2486 = vmatpush1.bf16.msra.mxu0 %v6728_v57 }
 0x1a8   :  { %2527 = vmatpush1.bf16.msra.mxu1 %v6731_v58  ;;  %2487 = vmatprep.subr.bf16.mxu0 %v6736_v59 }
 0x1a9   :  { %2528 = vmatprep.subr.bf16.mxu1 %v6739_v60 }
 0x1ab   :  { %2488 = vmatpush1.bf16.msra.mxu0 %v6734_v61 }
 0x1ac   :  { %2529 = vmatpush1.bf16.msra.mxu1 %v6737_v62  ;;  %2489 = vmatprep.subr.bf16.mxu0 %v6742_v63 }
 0x1ad   :  { %2530 = vmatprep.subr.bf16.mxu1 %v6745_v0  ;;  %v6820_v0 = vld [vmem:[#allocation10 + $0x764] ss:$24 sps:$4 sm:$0xff]  }
 0x1af   :  { %2490 = vmatpush1.bf16.msra.mxu0 %v6740_v1  ;;  %v6823_v1 = vld [vmem:[#allocation9 + $0x154] ss:$24 sps:$4 sm:$0xff]  }
 0x1b0   :  { %2531 = vmatpush1.bf16.msra.mxu1 %v6743_v2  ;;  %2491 = vmatprep.subr.bf16.mxu0 %v6748_v3  ;;  %v6818_v2 = vld [vmem:[#allocation10 + $0x760] ss:$24 sps:$4 sm:$0xff]   ;;  %v6821_v3 = vld [vmem:[#allocation9 + $0x150] ss:$24 sps:$4 sm:$0xff]  }
 0x1b1   :  { %2532 = vmatprep.subr.bf16.mxu1 %v6751_v4  ;;  %v6826_v4 = vld [vmem:[#allocation10 + $0x794] ss:$24 sps:$4 sm:$0xff]  }
 0x1b3   :  { %2492 = vmatpush1.bf16.msra.mxu0 %v6746_v5  ;;  %v6829_v5 = vld [vmem:[#allocation9 + $0x184] ss:$24 sps:$4 sm:$0xff]  }
 0x1b4   :  { %2533 = vmatpush1.bf16.msra.mxu1 %v6749_v6  ;;  %2493 = vmatprep.subr.bf16.mxu0 %v6754_v7  ;;  %v6824_v6 = vld [vmem:[#allocation10 + $0x790] ss:$24 sps:$4 sm:$0xff]   ;;  %v6827_v7 = vld [vmem:[#allocation9 + $0x180] ss:$24 sps:$4 sm:$0xff]  }
 0x1b5   :  { %2534 = vmatprep.subr.bf16.mxu1 %v6757_v10  ;;  %v6832_v10 = vld [vmem:[#allocation10 + $0x7c4] ss:$24 sps:$4 sm:$0xff]  }
 0x1b7   :  { %2494 = vmatpush1.bf16.msra.mxu0 %v6752_v11  ;;  %v6835_v11 = vld [vmem:[#allocation9 + $0x1b4] ss:$24 sps:$4 sm:$0xff]  }
 0x1b8   :  { %2535 = vmatpush1.bf16.msra.mxu1 %v6755_v12  ;;  %2495 = vmatprep.subr.bf16.mxu0 %v6760_v13  ;;  %v6830_v12 = vld [vmem:[#allocation10 + $0x7c0] ss:$24 sps:$4 sm:$0xff]   ;;  %v6833_v13 = vld [vmem:[#allocation9 + $0x1b0] ss:$24 sps:$4 sm:$0xff]  }
 0x1b9   :  { %2536 = vmatprep.subr.bf16.mxu1 %v6763_v14  ;;  %v6838_v14 = vld [vmem:[#allocation10 + $0x7f4] ss:$24 sps:$4 sm:$0xff]  }
 0x1bb   :  { %2496 = vmatpush1.bf16.msra.mxu0 %v6758_v15  ;;  %v6841_v15 = vld [vmem:[#allocation9 + $0x1e4] ss:$24 sps:$4 sm:$0xff]  }
 0x1bc   :  { %2537 = vmatpush1.bf16.msra.mxu1 %v6761_v16  ;;  %2497 = vmatprep.subr.bf16.mxu0 %v6766_v18  ;;  %v6836_v16 = vld [vmem:[#allocation10 + $0x7f0] ss:$24 sps:$4 sm:$0xff]   ;;  %v6839_v18 = vld [vmem:[#allocation9 + $0x1e0] ss:$24 sps:$4 sm:$0xff]  }
 0x1bd   :  { %2538 = vmatprep.subr.bf16.mxu1 %v6769_v19  ;;  %v6844_v19 = vld [vmem:[#allocation10 + $0x824] ss:$24 sps:$4 sm:$0xff]  }
 0x1bf   :  { %2498 = vmatpush1.bf16.msra.mxu0 %v6764_v20  ;;  %v6847_v20 = vld [vmem:[#allocation9 + $0x214] ss:$24 sps:$4 sm:$0xff]  }
 0x1c0   :  { %2539 = vmatpush1.bf16.msra.mxu1 %v6767_v21  ;;  %2499 = vmatprep.subr.bf16.mxu0 %v6772_v22  ;;  %v6842_v21 = vld [vmem:[#allocation10 + $0x820] ss:$24 sps:$4 sm:$0xff]   ;;  %v6845_v22 = vld [vmem:[#allocation9 + $0x210] ss:$24 sps:$4 sm:$0xff]  }
 0x1c1   :  { %2540 = vmatprep.subr.bf16.mxu1 %v6775_v23  ;;  %v6850_v23 = vld [vmem:[#allocation10 + $0x854] ss:$24 sps:$4 sm:$0xff]  }
 0x1c3   :  { %2500 = vmatpush1.bf16.msra.mxu0 %v6770_v24  ;;  %v6853_v24 = vld [vmem:[#allocation9 + $0x244] ss:$24 sps:$4 sm:$0xff]  }
 0x1c4   :  { %2541 = vmatpush1.bf16.msra.mxu1 %v6773_v25  ;;  %2551 = vmatprep.subr.bf16.mxu0 %v6778_v26  ;;  %v6848_v25 = vld [vmem:[#allocation10 + $0x850] ss:$24 sps:$4 sm:$0xff]   ;;  %v6851_v26 = vld [vmem:[#allocation9 + $0x240] ss:$24 sps:$4 sm:$0xff]  }
 0x1c5   :  { %4032 = vmatprep.subr.bf16.mxu1 %v6781_v27  ;;  %v6856_v27 = vld [vmem:[#allocation10 + $0x884] ss:$24 sps:$4 sm:$0xff]  }
 0x1c6   :  { %2502 = vmatmul.mubr.bf16.vlgmr.msra.gmra.mrb[12].mxu0 %v7779_v8  ;;  %v6799_v8 = vld [vmem:[#allocation9 + $0x94] ss:$24 sps:$4 sm:$0xff]  }
 0x1c7   :  { %2543 = vmatmul.mubr.bf16.vlgmr.msra.gmra.mrb[12].mxu1 %v7781_v9  ;;  %2552 = vmatpush1.bf16.msra.mxu0 %v6776_v28  ;;  %v6794_v9 = vld [vmem:[#allocation10 + $0x6a0] ss:$24 sps:$4 sm:$0xff]   ;;  %v6859_v28 = vld [vmem:[#allocation9 + $0x274] ss:$24 sps:$4 sm:$0xff]  }
 0x1c8   :  { %4033 = vmatpush1.bf16.msra.mxu1 %v6779_v29  ;;  %2553 = vmatprep.subr.bf16.mxu0 %v6784_v31  ;;  %v6854_v29 = vld [vmem:[#allocation10 + $0x880] ss:$24 sps:$4 sm:$0xff]   ;;  %v6862_v31 = vld [vmem:[#allocation10 + $0x8b4] ss:$24 sps:$4 sm:$0xff]  }
 0x1c9   :  { %4034 = vmatprep.subr.bf16.mxu1 %v6787_v32  ;;  %2583 = vmatprep.mubr.bf16.mxu0 %v7786_v35  ;;  %v6800_v35 = vld [vmem:[#allocation10 + $0x6d0] ss:$24 sps:$4 sm:$0xff]   ;;  %v6865_v32 = vld [vmem:[#allocation9 + $0x2a4] ss:$24 sps:$4 sm:$0xff]  }
 0x1ca   :  { %4064 = vmatprep.mubr.bf16.mxu1 %v7799_v33 }
 0x1cb   :  { %2554 = vmatpush1.bf16.msra.mxu0 %v6782_v34  ;;  %v6860_v34 = vld [vmem:[#allocation10 + $0x8b0] ss:$24 sps:$4 sm:$0xff]  }
 0x1cc   :  { %4035 = vmatpush1.bf16.msra.mxu1 %v6785_v36  ;;  %2555 = vmatprep.subr.bf16.mxu0 %v6790_v37  ;;  %v6863_v36 = vld [vmem:[#allocation9 + $0x2a0] ss:$24 sps:$4 sm:$0xff]   ;;  %v6868_v37 = vld [vmem:[#allocation10 + $0x8e4] ss:$24 sps:$4 sm:$0xff]  }
 0x1cd   :  { %4036 = vmatprep.subr.bf16.mxu1 %v6793_v38  ;;  %v6871_v38 = vld [vmem:[#allocation9 + $0x2d4] ss:$24 sps:$4 sm:$0xff]  }
 0x1cf   :  { %2556 = vmatpush1.bf16.msra.mxu0 %v6788_v39  ;;  %v6866_v39 = vld [vmem:[#allocation10 + $0x8e0] ss:$24 sps:$4 sm:$0xff]  }
 0x1d0   :  { %4037 = vmatpush1.bf16.msra.mxu1 %v6791_v40  ;;  %2557 = vmatprep.subr.bf16.mxu0 %v6796_v49  ;;  %v6869_v40 = vld [vmem:[#allocation9 + $0x2d0] ss:$24 sps:$4 sm:$0xff]   ;;  %v183_v49 = vld [vmem:[#allocation4] sm:$0xff] }
 0x1d1   :  { %4038 = vmatprep.subr.bf16.mxu1 %v6799_v8  ;;  %v6874_v8 = vld [vmem:[#allocation9 + $0x304] ss:$24 sps:$4 sm:$0xff]  }
 0x1d3   :  { %2558 = vmatpush1.bf16.msra.mxu0 %v6794_v9  ;;  %v6877_v9 = vld [vmem:[#allocation9 + $0x604] ss:$24 sps:$4 sm:$0xff]  }
 0x1d4   :  { %4039 = vmatpush1.bf16.msra.mxu1 %v6797_v52  ;;  %2559 = vmatprep.subr.bf16.mxu0 %v6802_v41  ;;  %v186_v52 = vld [vmem:[#allocation4 + $0x18] sm:$0xff]  ;;  %v188_v41 = vld [vmem:[#allocation4 + $0x28] sm:$0xff] }
 0x1d5   :  { %4040 = vmatprep.subr.bf16.mxu1 %v6805_v42  ;;  %v6872_v42 = vld [vmem:[#allocation9 + $0x300] ss:$24 sps:$4 sm:$0xff]  }
 0x1d7   :  { %2560 = vmatpush1.bf16.msra.mxu0 %v6800_v35  ;;  %v6875_v35 = vld [vmem:[#allocation9 + $0x600] ss:$24 sps:$4 sm:$0xff]  }
 0x1d8   :  { %4041 = vmatpush1.bf16.msra.mxu1 %v6803_v43  ;;  %2561 = vmatprep.subr.bf16.mxu0 %v6808_v44  ;;  %v7809_v43 = vpack.c.bf16 %v183_v49, %v183_v49  ;;  %v6880_v44 = vld [vmem:[#allocation9 + $0x334] ss:$24 sps:$4 sm:$0xff]   ;;  %v6941_v49 = vld [vmem:[#allocation9 + $0x810] ss:$24 sps:$4 sm:$0xff]  }
 0x1d9   :  { %4042 = vmatprep.subr.bf16.mxu1 %v6811_v45  ;;  %v2257_v51 = vpop.f32.mrb[0].mxu0  ;;  %v6883_v45 = vld [vmem:[#allocation9 + $0x634] ss:$24 sps:$4 sm:$0xff]  }
 0x1da   :  { %v2298_v53 = vpop.f32.mrb[0].mxu1  ;;  %v2259_v57 = vpop.f32.mrb[1].mxu0 }
 0x1db   :  { %v7805_v56 = vadd.f32 %v2298_v53, %v2257_v51  ;;  %v2300_v58 = vpop.f32.mrb[1].mxu1  ;;  %v2261_v60 = vpop.f32.mrb[2].mxu0  ;;  %2562 = vmatpush1.bf16.msra.mxu0 %v6806_v46  ;;  %v7811_v46 = vpack.c.bf16 %v186_v52, %v186_v52  ;;  %v6886_v51 = vld [vmem:[#allocation9 + $0x364] ss:$24 sps:$4 sm:$0xff]   ;;  %v6944_v52 = vld [vmem:[#allocation9 + $0x540] ss:$24 sps:$4 sm:$0xff]  }
 0x1dc   :  { %v7807_v59 = vadd.f32 %v2300_v58, %v2259_v57  ;;  %v2302_v61 = vpop.f32.mrb[2].mxu1  ;;  %4043 = vmatpush1.bf16.msra.mxu1 %v6809_v47  ;;  %v2262_v62 = vpop.f32.mrb[3].mxu0  ;;  %2563 = vmatprep.subr.bf16.mxu0 %v6814_v48  ;;  %v7813_v47 = vpack.c.bf16 %v188_v41, %v188_v41  ;;  %v6878_v48 = vld [vmem:[#allocation9 + $0x330] ss:$24 sps:$4 sm:$0xff]   ;;  %v6889_v53 = vld [vmem:[#allocation9 + $0x664] ss:$24 sps:$4 sm:$0xff]  }
 0x1dd   :  { %v2303_v63 = vpop.f32.mrb[3].mxu1  ;;  %4044 = vmatprep.subr.bf16.mxu1 %v6817_v50  ;;  %v6881_v50 = vld [vmem:[#allocation9 + $0x630] ss:$24 sps:$4 sm:$0xff]   ;;  %v6895_v57 = vld [vmem:[#allocation9 + $0x694] ss:$24 sps:$4 sm:$0xff]  }
 0x1de   :  { %v6890_v58 = vld [vmem:[#allocation9 + $0x390] ss:$24 sps:$4 sm:$0xff]   ;;  %v6898_v61 = vld [vmem:[#allocation9 + $0x3c4] ss:$24 sps:$4 sm:$0xff]   ;;  %v6896_v63 = vld [vmem:[#allocation9 + $0x3c0] ss:$24 sps:$4 sm:$0xff]  }
 0x1df   :  { %2564 = vmatpush1.bf16.msra.mxu0 %v6812_v54  ;;  %v6884_v54 = vld [vmem:[#allocation9 + $0x360] ss:$24 sps:$4 sm:$0xff]   ;;  %v6893_v60 = vld [vmem:[#allocation9 + $0x690] ss:$24 sps:$4 sm:$0xff]   ;;  %v6901_v62 = vld [vmem:[#allocation9 + $0x6c4] ss:$24 sps:$4 sm:$0xff]  }
 0x1e0   :  { %4045 = vmatpush1.bf16.msra.mxu1 %v6815_v55  ;;  %2565 = vmatprep.subr.bf16.mxu0 %v6820_v0  ;;  %v6887_v55 = vld [vmem:[#allocation9 + $0x660] ss:$24 sps:$4 sm:$0xff]  }
 0x1e1   :  { %4046 = vmatprep.subr.bf16.mxu1 %v6823_v1  ;;  %v6899_v0 = vld [vmem:[#allocation9 + $0x6c0] ss:$24 sps:$4 sm:$0xff]   ;;  %v6904_v1 = vld [vmem:[#allocation9 + $0x3f4] ss:$24 sps:$4 sm:$0xff]  }
 0x1e2   :  { %v6947_v41 = vld [vmem:[#allocation9 + $0x840] ss:$24 sps:$4 sm:$0xff]  }
 0x1e3   :  { %2566 = vmatpush1.bf16.msra.mxu0 %v6818_v2  ;;  %v6907_v2 = vld [vmem:[#allocation9 + $0x6f4] ss:$24 sps:$4 sm:$0xff]  }
 0x1e4   :  { %4047 = vmatpush1.bf16.msra.mxu1 %v6821_v3  ;;  %2567 = vmatprep.subr.bf16.mxu0 %v6826_v4  ;;  %v6902_v3 = vld [vmem:[#allocation9 + $0x3f0] ss:$24 sps:$4 sm:$0xff]  }
 0x1e5   :  { %4048 = vmatprep.subr.bf16.mxu1 %v6829_v5  ;;  %v6905_v4 = vld [vmem:[#allocation9 + $0x6f0] ss:$24 sps:$4 sm:$0xff]   ;;  %v6910_v5 = vld [vmem:[#allocation9 + $0x424] ss:$24 sps:$4 sm:$0xff]  }
 0x1e7   :  { %2568 = vmatpush1.bf16.msra.mxu0 %v6824_v6  ;;  %v6913_v6 = vld [vmem:[#allocation9 + $0x724] ss:$24 sps:$4 sm:$0xff]  }
 0x1e8   :  { %4049 = vmatpush1.bf16.msra.mxu1 %v6827_v7  ;;  %2569 = vmatprep.subr.bf16.mxu0 %v6832_v10 }
 0x1e9   :  { %4050 = vmatprep.subr.bf16.mxu1 %v6835_v11  ;;  %v6908_v11 = vld [vmem:[#allocation9 + $0x420] ss:$24 sps:$4 sm:$0xff]  }
 0x1eb   :  { %2570 = vmatpush1.bf16.msra.mxu0 %v6830_v12  ;;  %v6911_v12 = vld [vmem:[#allocation9 + $0x720] ss:$24 sps:$4 sm:$0xff]  }
 0x1ec   :  { %4051 = vmatpush1.bf16.msra.mxu1 %v6833_v13  ;;  %2571 = vmatprep.subr.bf16.mxu0 %v6838_v14 }
 0x1ed   :  { %4052 = vmatprep.subr.bf16.mxu1 %v6841_v15 }
 0x1ef   :  { %2572 = vmatpush1.bf16.msra.mxu0 %v6836_v16 }
 0x1f0   :  { %4053 = vmatpush1.bf16.msra.mxu1 %v6839_v18  ;;  %2573 = vmatprep.subr.bf16.mxu0 %v6844_v19 }
 0x1f1   :  { %4054 = vmatprep.subr.bf16.mxu1 %v6847_v20 }
 0x1f3   :  { %2574 = vmatpush1.bf16.msra.mxu0 %v6842_v21 }
 0x1f4   :  { %4055 = vmatpush1.bf16.msra.mxu1 %v6845_v22  ;;  %2575 = vmatprep.subr.bf16.mxu0 %v6850_v23  ;;  %v6916_v22 = vld [vmem:[#allocation9 + $0x454] ss:$24 sps:$4 sm:$0xff]  }
 0x1f5   :  { %4056 = vmatprep.subr.bf16.mxu1 %v6853_v24  ;;  %v6919_v23 = vld [vmem:[#allocation9 + $0x754] ss:$24 sps:$4 sm:$0xff]   ;;  %v6917_v24 = vld [vmem:[#allocation9 + $0x750] ss:$24 sps:$4 sm:$0xff]  }
 0x1f7   :  { %2576 = vmatpush1.bf16.msra.mxu0 %v6848_v25  ;;  %v6922_v25 = vld [vmem:[#allocation9 + $0x484] ss:$24 sps:$4 sm:$0xff]  }
 0x1f8   :  { %4057 = vmatpush1.bf16.msra.mxu1 %v6851_v26  ;;  %2577 = vmatprep.subr.bf16.mxu0 %v6856_v27  ;;  %v6925_v26 = vld [vmem:[#allocation9 + $0x784] ss:$24 sps:$4 sm:$0xff]   ;;  %v6923_v27 = vld [vmem:[#allocation9 + $0x780] ss:$24 sps:$4 sm:$0xff]  }
 0x1f9   :  { %4058 = vmatprep.subr.bf16.mxu1 %v6859_v28  ;;  %v6928_v28 = vld [vmem:[#allocation9 + $0x4b4] ss:$24 sps:$4 sm:$0xff]  }
 0x1fb   :  { %2578 = vmatpush1.bf16.msra.mxu0 %v6854_v29  ;;  %v6931_v29 = vld [vmem:[#allocation9 + $0x7b4] ss:$24 sps:$4 sm:$0xff]  }
 0x1fc   :  { %4059 = vmatpush1.bf16.msra.mxu1 %v6857_v30  ;;  %2579 = vmatprep.subr.bf16.mxu0 %v6862_v31  ;;  %v6926_v30 = vld [vmem:[#allocation9 + $0x4b0] ss:$24 sps:$4 sm:$0xff]  }
 0x1fd   :  { %4060 = vmatprep.subr.bf16.mxu1 %v6865_v32  ;;  %v6929_v31 = vld [vmem:[#allocation9 + $0x7b0] ss:$24 sps:$4 sm:$0xff]   ;;  %v6934_v32 = vld [vmem:[#allocation9 + $0x4e4] ss:$24 sps:$4 sm:$0xff]  }
 0x1ff   :  { %2580 = vmatpush1.bf16.msra.mxu0 %v6860_v34  ;;  %v6937_v34 = vld [vmem:[#allocation9 + $0x7e4] ss:$24 sps:$4 sm:$0xff]  }
 0x200   :  { %4061 = vmatpush1.bf16.msra.mxu1 %v6863_v36  ;;  %2581 = vmatprep.subr.bf16.mxu0 %v6868_v37  ;;  %v6932_v36 = vld [vmem:[#allocation9 + $0x4e0] ss:$24 sps:$4 sm:$0xff]  }
 0x201   :  { %4062 = vmatprep.subr.bf16.mxu1 %v6871_v38  ;;  %v6935_v37 = vld [vmem:[#allocation9 + $0x7e0] ss:$24 sps:$4 sm:$0xff]   ;;  %v6940_v38 = vld [vmem:[#allocation9 + $0x514] ss:$24 sps:$4 sm:$0xff]  }
 0x203   :  { %2582 = vmatpush1.bf16.msra.mxu0 %v6866_v39  ;;  %v6943_v39 = vld [vmem:[#allocation9 + $0x814] ss:$24 sps:$4 sm:$0xff]  }
 0x204   :  { %4063 = vmatpush1.bf16.msra.mxu1 %v6869_v40  ;;  %4073 = vmatprep.subr.bf16.mxu0 %v6874_v8  ;;  %v6938_v40 = vld [vmem:[#allocation9 + $0x510] ss:$24 sps:$4 sm:$0xff]   ;;  %v6946_v8 = vld [vmem:[#allocation9 + $0x544] ss:$24 sps:$4 sm:$0xff]  }
 0x205   :  { %4114 = vmatprep.subr.bf16.mxu1 %v6877_v9  ;;  %v6949_v9 = vld [vmem:[#allocation9 + $0x844] ss:$24 sps:$4 sm:$0xff]  }
 0x206   :  { %2584 = vmatmul.mubr.bf16.vlgmr.msra.gmra.mrb[16].mxu0 %v7789_v17  ;;  %v6892_v17 = vld [vmem:[#allocation9 + $0x394] ss:$24 sps:$4 sm:$0xff]  }
 0x207   :  { %4065 = vmatmul.mubr.bf16.vlgmr.msra.gmra.mrb[16].mxu1 %v7809_v43  ;;  %4074 = vmatpush1.bf16.msra.mxu0 %v6872_v42  ;;  %v6952_v42 = vld [vmem:[#allocation9 + $0x574] ss:$24 sps:$4 sm:$0xff]  }
 0x208   :  { %4115 = vmatpush1.bf16.msra.mxu1 %v6875_v35  ;;  %4075 = vmatprep.subr.bf16.mxu0 %v6880_v44  ;;  %v6955_v35 = vld [vmem:[#allocation9 + $0x874] ss:$24 sps:$4 sm:$0xff]   ;;  %v6950_v44 = vld [vmem:[#allocation9 + $0x570] ss:$24 sps:$4 sm:$0xff]  }
 0x209   :  { %4116 = vmatprep.subr.bf16.mxu1 %v6883_v45  ;;  %4105 = vmatprep.mubr.bf16.mxu0 %v7811_v46  ;;  %v6953_v45 = vld [vmem:[#allocation9 + $0x870] ss:$24 sps:$4 sm:$0xff]  }
 0x20a   :  { %4146 = vmatprep.mubr.bf16.mxu1 %v7813_v47 }
 0x20b   :  { %4076 = vmatpush1.bf16.msra.mxu0 %v6878_v48  ;;  %v6958_v48 = vld [vmem:[#allocation9 + $0x5a4] ss:$24 sps:$4 sm:$0xff]  }
 0x20c   :  { %4117 = vmatpush1.bf16.msra.mxu1 %v6881_v50  ;;  %4077 = vmatprep.subr.bf16.mxu0 %v6886_v51  ;;  %v6961_v50 = vld [vmem:[#allocation9 + $0x8a4] ss:$24 sps:$4 sm:$0xff]   ;;  %v6956_v51 = vld [vmem:[#allocation9 + $0x5a0] ss:$24 sps:$4 sm:$0xff]  }
 0x20d   :  { %4118 = vmatprep.subr.bf16.mxu1 %v6889_v53  ;;  %v6959_v53 = vld [vmem:[#allocation9 + $0x8a0] ss:$24 sps:$4 sm:$0xff]  }
 0x20f   :  { %4078 = vmatpush1.bf16.msra.mxu0 %v6884_v54  ;;  %v6964_v54 = vld [vmem:[#allocation9 + $0x5d4] ss:$24 sps:$4 sm:$0xff]  }
 0x210   :  { %4119 = vmatpush1.bf16.msra.mxu1 %v6887_v55  ;;  %4079 = vmatprep.subr.bf16.mxu0 %v6892_v17  ;;  %v6967_v55 = vld [vmem:[#allocation9 + $0x8d4] ss:$24 sps:$4 sm:$0xff]   ;;  %v6962_v17 = vld [vmem:[#allocation9 + $0x5d0] ss:$24 sps:$4 sm:$0xff]  }
 0x211   :  { %4120 = vmatprep.subr.bf16.mxu1 %v6895_v57  ;;  %v6965_v57 = vld [vmem:[#allocation9 + $0x8d0] ss:$24 sps:$4 sm:$0xff]  }
 0x213   :  { %4080 = vmatpush1.bf16.msra.mxu0 %v6890_v58  ;;  %v185_v58 = vld [vmem:[#allocation4 + $0x10] sm:$0xff] }
 0x214   :  { %4121 = vmatpush1.bf16.msra.mxu1 %v6893_v60  ;;  %4081 = vmatprep.subr.bf16.mxu0 %v6898_v61  ;;  %v187_v60 = vld [vmem:[#allocation4 + $0x20] sm:$0xff]  ;;  %v6970_v61 = vld [vmem:[#allocation9 + $0xc] ss:$24 sps:$4 sm:$0xff]  }
 0x215   :  { %4122 = vmatprep.subr.bf16.mxu1 %v6901_v62  ;;  %v6973_v62 = vld [vmem:[#allocation9 + $0x30c] ss:$24 sps:$4 sm:$0xff]  }
 0x217   :  { %4082 = vmatpush1.bf16.msra.mxu0 %v6896_v63  ;;  %v7829_v63 = vpack.c.bf16 %v185_v58, %v185_v58  ;;  %v7028_v58 = vld [vmem:[#allocation9 + $0x1e8] ss:$24 sps:$4 sm:$0xff]  }
 0x218   :  { %4123 = vmatpush1.bf16.msra.mxu1 %v6899_v0  ;;  %4083 = vmatprep.subr.bf16.mxu0 %v6904_v1  ;;  %v7831_v0 = vpack.c.bf16 %v187_v60, %v187_v60  ;;  %v6968_v1 = vld [vmem:[#allocation9 + $0x8] ss:$24 sps:$4 sm:$0xff]  }
 0x219   :  { %4124 = vmatprep.subr.bf16.mxu1 %v6907_v2  ;;  %v2339_v7 = vpop.f32.mrb[4].mxu0  ;;  %v6971_v2 = vld [vmem:[#allocation9 + $0x308] ss:$24 sps:$4 sm:$0xff]  }
 0x21a   :  { %v7819_v10 = vpop.f32.mrb[4].mxu1  ;;  %v7822_v13 = vadd.f32 %v2339_v7, %v7805_v56  ;;  %v2341_v14 = vpop.f32.mrb[5].mxu0  ;;  %v6914_v56 = vld [vmem:[#allocation9 + $0x450] ss:$24 sps:$4 sm:$0xff]   ;;  %v6982_v7 = vld [vmem:[#allocation9 + $0x6c] ss:$24 sps:$4 sm:$0xff]  }
 0x21b   :  { %v7824_v15 = vpop.f32.mrb[5].mxu1  ;;  %v7827_v16 = vadd.f32 %v2341_v14, %v7807_v59  ;;  %v2343_v18 = vpop.f32.mrb[6].mxu0  ;;  %4084 = vmatpush1.bf16.msra.mxu0 %v6902_v3  ;;  %v6920_v59 = vld [vmem:[#allocation9 + $0x480] ss:$24 sps:$4 sm:$0xff]   ;;  %v6976_v3 = vld [vmem:[#allocation9 + $0x3c] ss:$24 sps:$4 sm:$0xff]  }
 0x21c   :  { %v2384_v19 = vpop.f32.mrb[6].mxu1  ;;  %4125 = vmatpush1.bf16.msra.mxu1 %v6905_v4  ;;  %v2344_v20 = vpop.f32.mrb[7].mxu0  ;;  %4085 = vmatprep.subr.bf16.mxu0 %v6910_v5  ;;  %v6979_v4 = vld [vmem:[#allocation9 + $0x33c] ss:$24 sps:$4 sm:$0xff]   ;;  %v6974_v5 = vld [vmem:[#allocation9 + $0x38] ss:$24 sps:$4 sm:$0xff]  }
 0x21d   :  { %v2385_v21 = vpop.f32.mrb[7].mxu1  ;;  %4126 = vmatprep.subr.bf16.mxu1 %v6913_v6  ;;  %v6977_v6 = vld [vmem:[#allocation9 + $0x338] ss:$24 sps:$4 sm:$0xff]   ;;  %v6983_v14 = vld [vmem:[#allocation9 + $0x368] ss:$24 sps:$4 sm:$0xff]  }
 0x21e   :  { %v6988_v18 = vld [vmem:[#allocation9 + $0x9c] ss:$24 sps:$4 sm:$0xff]   ;;  %v6986_v20 = vld [vmem:[#allocation9 + $0x98] ss:$24 sps:$4 sm:$0xff]   ;;  %v7031_v60 = vld [vmem:[#allocation9 + $0x4e8] ss:$24 sps:$4 sm:$0xff]  }
 0x21f   :  { %4086 = vmatpush1.bf16.msra.mxu0 %v6908_v11  ;;  %v6985_v11 = vld [vmem:[#allocation9 + $0x36c] ss:$24 sps:$4 sm:$0xff]   ;;  %v6991_v19 = vld [vmem:[#allocation9 + $0x39c] ss:$24 sps:$4 sm:$0xff]   ;;  %v6989_v21 = vld [vmem:[#allocation9 + $0x398] ss:$24 sps:$4 sm:$0xff]  }
 0x220   :  { %4127 = vmatpush1.bf16.msra.mxu1 %v6911_v12  ;;  %4087 = vmatprep.subr.bf16.mxu0 %v6916_v22  ;;  %v6980_v12 = vld [vmem:[#allocation9 + $0x68] ss:$24 sps:$4 sm:$0xff]   ;;  %v6994_v22 = vld [vmem:[#allocation9 + $0xcc] ss:$24 sps:$4 sm:$0xff]  }
 0x221   :  { %4128 = vmatprep.subr.bf16.mxu1 %v6919_v23  ;;  %v6997_v23 = vld [vmem:[#allocation9 + $0x3cc] ss:$24 sps:$4 sm:$0xff]  }
 0x223   :  { %4088 = vmatpush1.bf16.msra.mxu0 %v6914_v56  ;;  %v6992_v56 = vld [vmem:[#allocation9 + $0xc8] ss:$24 sps:$4 sm:$0xff]  }
 0x224   :  { %4129 = vmatpush1.bf16.msra.mxu1 %v6917_v24  ;;  %4089 = vmatprep.subr.bf16.mxu0 %v6922_v25  ;;  %v6995_v24 = vld [vmem:[#allocation9 + $0x3c8] ss:$24 sps:$4 sm:$0xff]   ;;  %v7000_v25 = vld [vmem:[#allocation9 + $0xfc] ss:$24 sps:$4 sm:$0xff]  }
 0x225   :  { %4130 = vmatprep.subr.bf16.mxu1 %v6925_v26  ;;  %v7003_v26 = vld [vmem:[#allocation9 + $0x3fc] ss:$24 sps:$4 sm:$0xff]  }
 0x227   :  { %4090 = vmatpush1.bf16.msra.mxu0 %v6920_v59  ;;  %v6998_v59 = vld [vmem:[#allocation9 + $0xf8] ss:$24 sps:$4 sm:$0xff]  }
 0x228   :  { %4131 = vmatpush1.bf16.msra.mxu1 %v6923_v27  ;;  %4091 = vmatprep.subr.bf16.mxu0 %v6928_v28  ;;  %v7001_v27 = vld [vmem:[#allocation9 + $0x3f8] ss:$24 sps:$4 sm:$0xff]   ;;  %v7006_v28 = vld [vmem:[#allocation9 + $0x12c] ss:$24 sps:$4 sm:$0xff]  }
 0x229   :  { %4132 = vmatprep.subr.bf16.mxu1 %v6931_v29  ;;  %v7009_v29 = vld [vmem:[#allocation9 + $0x42c] ss:$24 sps:$4 sm:$0xff]  }
 0x22b   :  { %4092 = vmatpush1.bf16.msra.mxu0 %v6926_v30 }
 0x22c   :  { %4133 = vmatpush1.bf16.msra.mxu1 %v6929_v31  ;;  %4093 = vmatprep.subr.bf16.mxu0 %v6934_v32 }
 0x22d   :  { %4134 = vmatprep.subr.bf16.mxu1 %v6937_v34 }
 0x22f   :  { %4094 = vmatpush1.bf16.msra.mxu0 %v6932_v36 }
 0x230   :  { %4135 = vmatpush1.bf16.msra.mxu1 %v6935_v37  ;;  %4095 = vmatprep.subr.bf16.mxu0 %v6940_v38 }
 0x231   :  { %4136 = vmatprep.subr.bf16.mxu1 %v6943_v39 }
 0x233   :  { %4096 = vmatpush1.bf16.msra.mxu0 %v6938_v40  ;;  %v7004_v40 = vld [vmem:[#allocation9 + $0x128] ss:$24 sps:$4 sm:$0xff]  }
 0x234   :  { %4137 = vmatpush1.bf16.msra.mxu1 %v6941_v49  ;;  %4097 = vmatprep.subr.bf16.mxu0 %v6946_v8  ;;  %v7007_v49 = vld [vmem:[#allocation9 + $0x428] ss:$24 sps:$4 sm:$0xff]  }
 0x235   :  { %4138 = vmatprep.subr.bf16.mxu1 %v6949_v9 }
 0x237   :  { %4098 = vmatpush1.bf16.msra.mxu0 %v6944_v52 }
 0x238   :  { %4139 = vmatpush1.bf16.msra.mxu1 %v6947_v41  ;;  %4099 = vmatprep.subr.bf16.mxu0 %v6952_v42  ;;  %v7012_v41 = vld [vmem:[#allocation9 + $0x15c] ss:$24 sps:$4 sm:$0xff]  }
 0x239   :  { %4140 = vmatprep.subr.bf16.mxu1 %v6955_v35  ;;  %v7015_v42 = vld [vmem:[#allocation9 + $0x45c] ss:$24 sps:$4 sm:$0xff]  }
 0x23b   :  { %4100 = vmatpush1.bf16.msra.mxu0 %v6950_v44  ;;  %v7018_v44 = vld [vmem:[#allocation9 + $0x18c] ss:$24 sps:$4 sm:$0xff]  }
 0x23c   :  { %4141 = vmatpush1.bf16.msra.mxu1 %v6953_v45  ;;  %4101 = vmatprep.subr.bf16.mxu0 %v6958_v48  ;;  %v7021_v45 = vld [vmem:[#allocation9 + $0x48c] ss:$24 sps:$4 sm:$0xff]   ;;  %v7016_v48 = vld [vmem:[#allocation9 + $0x188] ss:$24 sps:$4 sm:$0xff]  }
 0x23d   :  { %4142 = vmatprep.subr.bf16.mxu1 %v6961_v50  ;;  %v7019_v50 = vld [vmem:[#allocation9 + $0x488] ss:$24 sps:$4 sm:$0xff]  }
 0x23f   :  { %4102 = vmatpush1.bf16.msra.mxu0 %v6956_v51  ;;  %v7024_v51 = vld [vmem:[#allocation9 + $0x1bc] ss:$24 sps:$4 sm:$0xff]  }
 0x240   :  { %4143 = vmatpush1.bf16.msra.mxu1 %v6959_v53  ;;  %4103 = vmatprep.subr.bf16.mxu0 %v6964_v54  ;;  %v7027_v53 = vld [vmem:[#allocation9 + $0x4bc] ss:$24 sps:$4 sm:$0xff]   ;;  %v7022_v54 = vld [vmem:[#allocation9 + $0x1b8] ss:$24 sps:$4 sm:$0xff]  }
 0x241   :  { %4144 = vmatprep.subr.bf16.mxu1 %v6967_v55  ;;  %v7025_v55 = vld [vmem:[#allocation9 + $0x4b8] ss:$24 sps:$4 sm:$0xff]  }
 0x243   :  { %4104 = vmatpush1.bf16.msra.mxu0 %v6962_v17  ;;  %v7030_v17 = vld [vmem:[#allocation9 + $0x1ec] ss:$24 sps:$4 sm:$0xff]  }
 0x244   :  { %4145 = vmatpush1.bf16.msra.mxu1 %v6965_v57  ;;  %4155 = vmatprep.subr.bf16.mxu0 %v6970_v61  ;;  %v7033_v57 = vld [vmem:[#allocation9 + $0x4ec] ss:$24 sps:$4 sm:$0xff]   ;;  %v7036_v61 = vld [vmem:[#allocation9 + $0x21c] ss:$24 sps:$4 sm:$0xff]  }
 0x245   :  { %4196 = vmatprep.subr.bf16.mxu1 %v6973_v62  ;;  %v7039_v62 = vld [vmem:[#allocation9 + $0x51c] ss:$24 sps:$4 sm:$0xff]  }
 0x246   :  { %4106 = vmatmul.mubr.bf16.vlgmr.msra.gmra.mrb[20].mxu0 %v7829_v63 }
 0x247   :  { %4147 = vmatmul.mubr.bf16.vlgmr.msra.gmra.mrb[20].mxu1 %v7831_v0  ;;  %4156 = vmatpush1.bf16.msra.mxu0 %v6968_v1  ;;  %v7034_v1 = vld [vmem:[#allocation9 + $0x218] ss:$24 sps:$4 sm:$0xff]  }
 0x248   :  { %4197 = vmatpush1.bf16.msra.mxu1 %v6971_v2  ;;  %4157 = vmatprep.subr.bf16.mxu0 %v6976_v3  ;;  %v7037_v2 = vld [vmem:[#allocation9 + $0x518] ss:$24 sps:$4 sm:$0xff]   ;;  %v7042_v3 = vld [vmem:[#allocation9 + $0x24c] ss:$24 sps:$4 sm:$0xff]  }
 0x249   :  { %4198 = vmatprep.subr.bf16.mxu1 %v6979_v4  ;;  %4187 = vmatprep.mubr.bf16.mxu0 %v7799_v33  ;;  %v7045_v4 = vld [vmem:[#allocation9 + $0x54c] ss:$24 sps:$4 sm:$0xff]  }
 0x24a   :  { %4228 = vmatprep.mubr.bf16.mxu1 %v7811_v46 }
 0x24b   :  { %4158 = vmatpush1.bf16.msra.mxu0 %v6974_v5  ;;  %v7040_v5 = vld [vmem:[#allocation9 + $0x248] ss:$24 sps:$4 sm:$0xff]  }
 0x24c   :  { %4199 = vmatpush1.bf16.msra.mxu1 %v6977_v6  ;;  %4159 = vmatprep.subr.bf16.mxu0 %v6982_v7  ;;  %v7043_v6 = vld [vmem:[#allocation9 + $0x548] ss:$24 sps:$4 sm:$0xff]   ;;  %v7048_v7 = vld [vmem:[#allocation9 + $0x27c] ss:$24 sps:$4 sm:$0xff]  }
 0x24d   :  { %4200 = vmatprep.subr.bf16.mxu1 %v6985_v11  ;;  %v7051_v11 = vld [vmem:[#allocation9 + $0x57c] ss:$24 sps:$4 sm:$0xff]  }
 0x24f   :  { %4160 = vmatpush1.bf16.msra.mxu0 %v6980_v12  ;;  %v7046_v12 = vld [vmem:[#allocation9 + $0x278] ss:$24 sps:$4 sm:$0xff]  }
 0x250   :  { %4201 = vmatpush1.bf16.msra.mxu1 %v6983_v14  ;;  %4161 = vmatprep.subr.bf16.mxu0 %v6988_v18  ;;  %v7049_v14 = vld [vmem:[#allocation9 + $0x578] ss:$24 sps:$4 sm:$0xff]   ;;  %v7054_v18 = vld [vmem:[#allocation9 + $0x2ac] ss:$24 sps:$4 sm:$0xff]  }
 0x251   :  { %4202 = vmatprep.subr.bf16.mxu1 %v6991_v19  ;;  %v7057_v19 = vld [vmem:[#allocation9 + $0x5ac] ss:$24 sps:$4 sm:$0xff]  }
 0x253   :  { %4162 = vmatpush1.bf16.msra.mxu0 %v6986_v20  ;;  %v7052_v20 = vld [vmem:[#allocation9 + $0x2a8] ss:$24 sps:$4 sm:$0xff]  }
 0x254   :  { %4203 = vmatpush1.bf16.msra.mxu1 %v6989_v21  ;;  %4163 = vmatprep.subr.bf16.mxu0 %v6994_v22  ;;  %v7055_v21 = vld [vmem:[#allocation9 + $0x5a8] ss:$24 sps:$4 sm:$0xff]   ;;  %v7060_v22 = vld [vmem:[#allocation9 + $0x2dc] ss:$24 sps:$4 sm:$0xff]  }
 0x255   :  { %4204 = vmatprep.subr.bf16.mxu1 %v6997_v23  ;;  %v7063_v23 = vld [vmem:[#allocation9 + $0x5dc] ss:$24 sps:$4 sm:$0xff]  }
 0x257   :  { %4164 = vmatpush1.bf16.msra.mxu0 %v6992_v56  ;;  %v7058_v56 = vld [vmem:[#allocation9 + $0x2d8] ss:$24 sps:$4 sm:$0xff]  }
 0x258   :  { %4205 = vmatpush1.bf16.msra.mxu1 %v6995_v24  ;;  %4165 = vmatprep.subr.bf16.mxu0 %v7000_v25  ;;  %v7061_v24 = vld [vmem:[#allocation9 + $0x5d8] ss:$24 sps:$4 sm:$0xff]   ;;  %v7066_v25 = vld [vmem:[#allocation9 + $0x60c] ss:$24 sps:$4 sm:$0xff]  }
 0x259   :  { %4206 = vmatprep.subr.bf16.mxu1 %v7003_v26  ;;  %v2421_v30 = vpop.f32.mrb[8].mxu0  ;;  %v7069_v26 = vld [vmem:[#allocation9 + $0x14] ss:$24 sps:$4 sm:$0xff]  }
 0x25a   :  { %v2462_v31 = vpop.f32.mrb[8].mxu1  ;;  %v2422_v32 = vadd.f32 %v2421_v30, %v7819_v10  ;;  %v2423_v34 = vpop.f32.mrb[9].mxu0  ;;  %v7010_v10 = vld [vmem:[#allocation9 + $0x158] ss:$24 sps:$4 sm:$0xff]  }
 0x25b   :  { %v2464_v36 = vpop.f32.mrb[9].mxu1  ;;  %v2424_v37 = vadd.f32 %v2423_v34, %v7824_v15  ;;  %v2425_v38 = vpop.f32.mrb[10].mxu0  ;;  %4166 = vmatpush1.bf16.msra.mxu0 %v6998_v59  ;;  %v7013_v15 = vld [vmem:[#allocation9 + $0x458] ss:$24 sps:$4 sm:$0xff]   ;;  %v7064_v59 = vld [vmem:[#allocation9 + $0x608] ss:$24 sps:$4 sm:$0xff]  }
 0x25c   :  { %v2466_v39 = vpop.f32.mrb[10].mxu1  ;;  %4207 = vmatpush1.bf16.msra.mxu1 %v7001_v27  ;;  %v7839_v8 = vadd.f32 %v2462_v31, %v2422_v32  ;;  %v2426_v9 = vpop.f32.mrb[11].mxu0  ;;  %4167 = vmatprep.subr.bf16.mxu0 %v7006_v28  ;;  %v7067_v27 = vld [vmem:[#allocation9 + $0x10] ss:$24 sps:$4 sm:$0xff]   ;;  %v7072_v28 = vld [vmem:[#allocation9 + $0x63c] ss:$24 sps:$4 sm:$0xff]  }
 0x25d   :  { %v2467_v52 = vpop.f32.mrb[11].mxu1  ;;  %4208 = vmatprep.subr.bf16.mxu1 %v7009_v29  ;;  %v7841_v35 = vadd.f32 %v2464_v36, %v2424_v37  ;;  %v7075_v29 = vld [vmem:[#allocation9 + $0x44] ss:$24 sps:$4 sm:$0xff]   ;;  %v7070_v30 = vld [vmem:[#allocation9 + $0x638] ss:$24 sps:$4 sm:$0xff]  }
 0x25e   :  { %v7073_v31 = vld [vmem:[#allocation9 + $0x40] ss:$24 sps:$4 sm:$0xff]   ;;  %v7078_v32 = vld [vmem:[#allocation9 + $0x66c] ss:$24 sps:$4 sm:$0xff]   ;;  %v7079_v37 = vld [vmem:[#allocation9 + $0x70] ss:$24 sps:$4 sm:$0xff]  }
 0x25f   :  { %4168 = vmatpush1.bf16.msra.mxu0 %v7004_v40  ;;  %v7081_v34 = vld [vmem:[#allocation9 + $0x74] ss:$24 sps:$4 sm:$0xff]   ;;  %v7076_v36 = vld [vmem:[#allocation9 + $0x668] ss:$24 sps:$4 sm:$0xff]   ;;  %v7087_v39 = vld [vmem:[#allocation9 + $0xa4] ss:$24 sps:$4 sm:$0xff]  }
 0x260   :  { %4209 = vmatpush1.bf16.msra.mxu1 %v7007_v49  ;;  %4169 = vmatprep.subr.bf16.mxu0 %v7012_v41  ;;  %v7084_v38 = vld [vmem:[#allocation9 + $0x69c] ss:$24 sps:$4 sm:$0xff]   ;;  %v7082_v40 = vld [vmem:[#allocation9 + $0x698] ss:$24 sps:$4 sm:$0xff]   ;;  %v7090_v9 = vld [vmem:[#allocation9 + $0x6cc] ss:$24 sps:$4 sm:$0xff]  }
 0x261   :  { %4210 = vmatprep.subr.bf16.mxu1 %v7015_v42  ;;  %v7085_v49 = vld [vmem:[#allocation9 + $0xa0] ss:$24 sps:$4 sm:$0xff]   ;;  %v7093_v52 = vld [vmem:[#allocation9 + $0xd4] ss:$24 sps:$4 sm:$0xff]  }
 0x262   :  { %v7088_v41 = vld [vmem:[#allocation9 + $0x6c8] ss:$24 sps:$4 sm:$0xff]   ;;  %v7096_v42 = vld [vmem:[#allocation9 + $0x6fc] ss:$24 sps:$4 sm:$0xff]  }
 0x263   :  { %4170 = vmatpush1.bf16.msra.mxu0 %v7010_v10  ;;  %v7099_v10 = vld [vmem:[#allocation9 + $0x104] ss:$24 sps:$4 sm:$0xff]  }
 0x264   :  { %4211 = vmatpush1.bf16.msra.mxu1 %v7013_v15  ;;  %4171 = vmatprep.subr.bf16.mxu0 %v7018_v44  ;;  %v7094_v15 = vld [vmem:[#allocation9 + $0x6f8] ss:$24 sps:$4 sm:$0xff]  }
 0x265   :  { %4212 = vmatprep.subr.bf16.mxu1 %v7021_v45  ;;  %v7097_v44 = vld [vmem:[#allocation9 + $0x100] ss:$24 sps:$4 sm:$0xff]   ;;  %v7102_v45 = vld [vmem:[#allocation9 + $0x72c] ss:$24 sps:$4 sm:$0xff]  }
 0x267   :  { %4172 = vmatpush1.bf16.msra.mxu0 %v7016_v48  ;;  %v7105_v48 = vld [vmem:[#allocation9 + $0x134] ss:$24 sps:$4 sm:$0xff]  }
 0x268   :  { %4213 = vmatpush1.bf16.msra.mxu1 %v7019_v50  ;;  %4173 = vmatprep.subr.bf16.mxu0 %v7024_v51 }
 0x269   :  { %4214 = vmatprep.subr.bf16.mxu1 %v7027_v53 }
 0x26b   :  { %4174 = vmatpush1.bf16.msra.mxu0 %v7022_v54 }
 0x26c   :  { %4215 = vmatpush1.bf16.msra.mxu1 %v7025_v55  ;;  %4175 = vmatprep.subr.bf16.mxu0 %v7030_v17 }
 0x26d   :  { %4216 = vmatprep.subr.bf16.mxu1 %v7033_v57 }
 0x26f   :  { %4176 = vmatpush1.bf16.msra.mxu0 %v7028_v58 }
 0x270   :  { %4217 = vmatpush1.bf16.msra.mxu1 %v7031_v60  ;;  %4177 = vmatprep.subr.bf16.mxu0 %v7036_v61  ;;  %v7100_v60 = vld [vmem:[#allocation9 + $0x728] ss:$24 sps:$4 sm:$0xff]  }
 0x271   :  { %4218 = vmatprep.subr.bf16.mxu1 %v7039_v62  ;;  %v7103_v61 = vld [vmem:[#allocation9 + $0x130] ss:$24 sps:$4 sm:$0xff]  }
 0x273   :  { %4178 = vmatpush1.bf16.msra.mxu0 %v7034_v1 }
 0x274   :  { %4219 = vmatpush1.bf16.msra.mxu1 %v7037_v2  ;;  %4179 = vmatprep.subr.bf16.mxu0 %v7042_v3  ;;  %v7108_v2 = vld [vmem:[#allocation9 + $0x75c] ss:$24 sps:$4 sm:$0xff]  }
 0x275   :  { %4220 = vmatprep.subr.bf16.mxu1 %v7045_v4  ;;  %v7111_v3 = vld [vmem:[#allocation9 + $0x164] ss:$24 sps:$4 sm:$0xff]   ;;  %v7106_v4 = vld [vmem:[#allocation9 + $0x758] ss:$24 sps:$4 sm:$0xff]  }
 0x277   :  { %4180 = vmatpush1.bf16.msra.mxu0 %v7040_v5  ;;  %v7109_v5 = vld [vmem:[#allocation9 + $0x160] ss:$24 sps:$4 sm:$0xff]  }
 0x278   :  { %4221 = vmatpush1.bf16.msra.mxu1 %v7043_v6  ;;  %4181 = vmatprep.subr.bf16.mxu0 %v7048_v7  ;;  %v7114_v6 = vld [vmem:[#allocation9 + $0x78c] ss:$24 sps:$4 sm:$0xff]  }
 0x279   :  { %4222 = vmatprep.subr.bf16.mxu1 %v7051_v11  ;;  %v7117_v7 = vld [vmem:[#allocation9 + $0x194] ss:$24 sps:$4 sm:$0xff]   ;;  %v7112_v11 = vld [vmem:[#allocation9 + $0x788] ss:$24 sps:$4 sm:$0xff]  }
 0x27b   :  { %4182 = vmatpush1.bf16.msra.mxu0 %v7046_v12  ;;  %v7115_v12 = vld [vmem:[#allocation9 + $0x190] ss:$24 sps:$4 sm:$0xff]  }
 0x27c   :  { %4223 = vmatpush1.bf16.msra.mxu1 %v7049_v14  ;;  %4183 = vmatprep.subr.bf16.mxu0 %v7054_v18  ;;  %v7120_v14 = vld [vmem:[#allocation9 + $0x7bc] ss:$24 sps:$4 sm:$0xff]  }
 0x27d   :  { %4224 = vmatprep.subr.bf16.mxu1 %v7057_v19  ;;  %v7123_v18 = vld [vmem:[#allocation9 + $0x1c4] ss:$24 sps:$4 sm:$0xff]   ;;  %v7118_v19 = vld [vmem:[#allocation9 + $0x7b8] ss:$24 sps:$4 sm:$0xff]  }
 0x27f   :  { %4184 = vmatpush1.bf16.msra.mxu0 %v7052_v20  ;;  %v7121_v20 = vld [vmem:[#allocation9 + $0x1c0] ss:$24 sps:$4 sm:$0xff]  }
 0x280   :  { %4225 = vmatpush1.bf16.msra.mxu1 %v7055_v21  ;;  %4185 = vmatprep.subr.bf16.mxu0 %v7060_v22  ;;  %v7126_v21 = vld [vmem:[#allocation9 + $0x7ec] ss:$24 sps:$4 sm:$0xff]  }
 0x281   :  { %4226 = vmatprep.subr.bf16.mxu1 %v7063_v23  ;;  %v7129_v22 = vld [vmem:[#allocation9 + $0x1f4] ss:$24 sps:$4 sm:$0xff]   ;;  %v7124_v23 = vld [vmem:[#allocation9 + $0x7e8] ss:$24 sps:$4 sm:$0xff]  }
 0x283   :  { %4186 = vmatpush1.bf16.msra.mxu0 %v7058_v56  ;;  %v7127_v56 = vld [vmem:[#allocation9 + $0x1f0] ss:$24 sps:$4 sm:$0xff]  }
 0x284   :  { %4227 = vmatpush1.bf16.msra.mxu1 %v7061_v24  ;;  %4237 = vmatprep.subr.bf16.mxu0 %v7066_v25  ;;  %v7132_v24 = vld [vmem:[#allocation9 + $0x81c] ss:$24 sps:$4 sm:$0xff]  }
 0x285   :  { %4278 = vmatprep.subr.bf16.mxu1 %v7069_v26  ;;  %v7135_v25 = vld [vmem:[#allocation9 + $0x224] ss:$24 sps:$4 sm:$0xff]   ;;  %v7130_v26 = vld [vmem:[#allocation9 + $0x818] ss:$24 sps:$4 sm:$0xff]  }
 0x286   :  { %4188 = vmatmul.mubr.bf16.vlgmr.msra.gmra.mrb[24].mxu0 %v7809_v43 }
 0x287   :  { %4229 = vmatmul.mubr.bf16.vlgmr.msra.gmra.mrb[24].mxu1 %v7829_v63  ;;  %4238 = vmatpush1.bf16.msra.mxu0 %v7064_v59  ;;  %v7133_v59 = vld [vmem:[#allocation9 + $0x220] ss:$24 sps:$4 sm:$0xff]  }
 0x288   :  { %4279 = vmatpush1.bf16.msra.mxu1 %v7067_v27  ;;  %4239 = vmatprep.subr.bf16.mxu0 %v7072_v28  ;;  %v7138_v27 = vld [vmem:[#allocation9 + $0x84c] ss:$24 sps:$4 sm:$0xff]  }
 0x289   :  { %4280 = vmatprep.subr.bf16.mxu1 %v7075_v29  ;;  %4269 = vmatprep.mubr.bf16.mxu0 %v7813_v47  ;;  %v7141_v28 = vld [vmem:[#allocation9 + $0x254] ss:$24 sps:$4 sm:$0xff]   ;;  %v7136_v29 = vld [vmem:[#allocation9 + $0x848] ss:$24 sps:$4 sm:$0xff]  }
 0x28a   :  { %4310 = vmatprep.mubr.bf16.mxu1 %v7799_v33  ;;  %v7091_v33 = vld [vmem:[#allocation9 + $0xd0] ss:$24 sps:$4 sm:$0xff]  }
 0x28b   :  { %4240 = vmatpush1.bf16.msra.mxu0 %v7070_v30  ;;  %v7139_v30 = vld [vmem:[#allocation9 + $0x250] ss:$24 sps:$4 sm:$0xff]  }
 0x28c   :  { %4281 = vmatpush1.bf16.msra.mxu1 %v7073_v31  ;;  %4241 = vmatprep.subr.bf16.mxu0 %v7078_v32  ;;  %v7144_v31 = vld [vmem:[#allocation9 + $0x87c] ss:$24 sps:$4 sm:$0xff]  }
 0x28d   :  { %4282 = vmatprep.subr.bf16.mxu1 %v7081_v34  ;;  %v7147_v32 = vld [vmem:[#allocation9 + $0x284] ss:$24 sps:$4 sm:$0xff]   ;;  %v7142_v34 = vld [vmem:[#allocation9 + $0x878] ss:$24 sps:$4 sm:$0xff]  }
 0x28f   :  { %4242 = vmatpush1.bf16.msra.mxu0 %v7076_v36  ;;  %v7145_v36 = vld [vmem:[#allocation9 + $0x280] ss:$24 sps:$4 sm:$0xff]  }
 0x290   :  { %4283 = vmatpush1.bf16.msra.mxu1 %v7079_v37  ;;  %4243 = vmatprep.subr.bf16.mxu0 %v7084_v38  ;;  %v7150_v37 = vld [vmem:[#allocation9 + $0x8ac] ss:$24 sps:$4 sm:$0xff]  }
 0x291   :  { %4284 = vmatprep.subr.bf16.mxu1 %v7087_v39  ;;  %v7153_v38 = vld [vmem:[#allocation9 + $0x2b4] ss:$24 sps:$4 sm:$0xff]   ;;  %v7148_v39 = vld [vmem:[#allocation9 + $0x8a8] ss:$24 sps:$4 sm:$0xff]  }
 0x293   :  { %4244 = vmatpush1.bf16.msra.mxu0 %v7082_v40  ;;  %v7151_v40 = vld [vmem:[#allocation9 + $0x2b0] ss:$24 sps:$4 sm:$0xff]  }
 0x294   :  { %4285 = vmatpush1.bf16.msra.mxu1 %v7085_v49  ;;  %4245 = vmatprep.subr.bf16.mxu0 %v7090_v9  ;;  %v7156_v49 = vld [vmem:[#allocation9 + $0x8dc] ss:$24 sps:$4 sm:$0xff]  }
 0x295   :  { %4286 = vmatprep.subr.bf16.mxu1 %v7093_v52  ;;  %v7159_v9 = vld [vmem:[#allocation9 + $0x2e4] ss:$24 sps:$4 sm:$0xff]   ;;  %v7154_v52 = vld [vmem:[#allocation9 + $0x8d8] ss:$24 sps:$4 sm:$0xff]  }
 0x297   :  { %4246 = vmatpush1.bf16.msra.mxu0 %v7088_v41  ;;  %v7157_v41 = vld [vmem:[#allocation9 + $0x2e0] ss:$24 sps:$4 sm:$0xff]  }
 0x298   :  { %4287 = vmatpush1.bf16.msra.mxu1 %v7091_v33  ;;  %4247 = vmatprep.subr.bf16.mxu0 %v7096_v42  ;;  %v7162_v33 = vld [vmem:[#allocation9 + $0x314] ss:$24 sps:$4 sm:$0xff]  }
 0x299   :  { %4288 = vmatprep.subr.bf16.mxu1 %v7099_v10  ;;  %v2503_v50 = vpop.f32.mrb[12].mxu0  ;;  %v7165_v42 = vld [vmem:[#allocation9 + $0x614] ss:$24 sps:$4 sm:$0xff]   ;;  %v7160_v10 = vld [vmem:[#allocation9 + $0x310] ss:$24 sps:$4 sm:$0xff]  }
 0x29a   :  { %v2544_v51 = vpop.f32.mrb[12].mxu1  ;;  %v2505_v54 = vpop.f32.mrb[13].mxu0 }
 0x29b   :  { %v7847_v53 = vadd.f32 %v2544_v51, %v2503_v50  ;;  %v2546_v55 = vpop.f32.mrb[13].mxu1  ;;  %v2507_v57 = vpop.f32.mrb[14].mxu0  ;;  %4248 = vmatpush1.bf16.msra.mxu0 %v7094_v15  ;;  %v7163_v15 = vld [vmem:[#allocation9 + $0x610] ss:$24 sps:$4 sm:$0xff]   ;;  %v7169_v50 = vld [vmem:[#allocation9 + $0x640] ss:$24 sps:$4 sm:$0xff]  }
 0x29c   :  { %v7849_v17 = vadd.f32 %v2546_v55, %v2505_v54  ;;  %v2548_v58 = vpop.f32.mrb[14].mxu1  ;;  %4289 = vmatpush1.bf16.msra.mxu1 %v7097_v44  ;;  %v2508_v62 = vpop.f32.mrb[15].mxu0  ;;  %4249 = vmatprep.subr.bf16.mxu0 %v7102_v45  ;;  %v7168_v44 = vld [vmem:[#allocation9 + $0x344] ss:$24 sps:$4 sm:$0xff]   ;;  %v7174_v51 = vld [vmem:[#allocation9 + $0x374] ss:$24 sps:$4 sm:$0xff]  }
 0x29d   :  { %v2549_v1 = vpop.f32.mrb[15].mxu1  ;;  %4290 = vmatprep.subr.bf16.mxu1 %v7105_v48  ;;  %v7171_v45 = vld [vmem:[#allocation9 + $0x644] ss:$24 sps:$4 sm:$0xff]   ;;  %v7166_v48 = vld [vmem:[#allocation9 + $0x340] ss:$24 sps:$4 sm:$0xff]  }
 0x29e   :  { %v7177_v54 = vld [vmem:[#allocation9 + $0x674] ss:$24 sps:$4 sm:$0xff]   ;;  %v7172_v55 = vld [vmem:[#allocation9 + $0x370] ss:$24 sps:$4 sm:$0xff]   ;;  %v7180_v58 = vld [vmem:[#allocation9 + $0x3a4] ss:$24 sps:$4 sm:$0xff]  }
 0x29f   :  { %4250 = vmatpush1.bf16.msra.mxu0 %v7100_v60  ;;  %v7175_v57 = vld [vmem:[#allocation9 + $0x670] ss:$24 sps:$4 sm:$0xff]   ;;  %v7178_v60 = vld [vmem:[#allocation9 + $0x3a0] ss:$24 sps:$4 sm:$0xff]   ;;  %v7186_v62 = vld [vmem:[#allocation9 + $0x3d4] ss:$24 sps:$4 sm:$0xff]  }
 0x2a0   :  { %4291 = vmatpush1.bf16.msra.mxu1 %v7103_v61  ;;  %4251 = vmatprep.subr.bf16.mxu0 %v7108_v2  ;;  %v7181_v61 = vld [vmem:[#allocation9 + $0x6a0] ss:$24 sps:$4 sm:$0xff]   ;;  %v7189_v1 = vld [vmem:[#allocation9 + $0x6d4] ss:$24 sps:$4 sm:$0xff]   ;;  %v7192_v2 = vld [vmem:[#allocation9 + $0x404] ss:$24 sps:$4 sm:$0xff]  }
 0x2a1   :  { %4292 = vmatprep.subr.bf16.mxu1 %v7111_v3  ;;  %v7195_v3 = vld [vmem:[#allocation9 + $0x704] ss:$24 sps:$4 sm:$0xff]  }
 0x2a3   :  { %4252 = vmatpush1.bf16.msra.mxu0 %v7106_v4  ;;  %v7190_v4 = vld [vmem:[#allocation9 + $0x400] ss:$24 sps:$4 sm:$0xff]  }
 0x2a4   :  { %4293 = vmatpush1.bf16.msra.mxu1 %v7109_v5  ;;  %4253 = vmatprep.subr.bf16.mxu0 %v7114_v6  ;;  %v7193_v5 = vld [vmem:[#allocation9 + $0x700] ss:$24 sps:$4 sm:$0xff]   ;;  %v7198_v6 = vld [vmem:[#allocation9 + $0x434] ss:$24 sps:$4 sm:$0xff]  }
 0x2a5   :  { %4294 = vmatprep.subr.bf16.mxu1 %v7117_v7  ;;  %v7201_v7 = vld [vmem:[#allocation9 + $0x734] ss:$24 sps:$4 sm:$0xff]  }
 0x2a7   :  { %4254 = vmatpush1.bf16.msra.mxu0 %v7112_v11 }
 0x2a8   :  { %4295 = vmatpush1.bf16.msra.mxu1 %v7115_v12  ;;  %4255 = vmatprep.subr.bf16.mxu0 %v7120_v14 }
 0x2a9   :  { %4296 = vmatprep.subr.bf16.mxu1 %v7123_v18 }
 0x2ab   :  { %4256 = vmatpush1.bf16.msra.mxu0 %v7118_v19 }
 0x2ac   :  { %4297 = vmatpush1.bf16.msra.mxu1 %v7121_v20  ;;  %4257 = vmatprep.subr.bf16.mxu0 %v7126_v21 }
 0x2ad   :  { %4298 = vmatprep.subr.bf16.mxu1 %v7129_v22 }
 0x2af   :  { %4258 = vmatpush1.bf16.msra.mxu0 %v7124_v23 }
 0x2b0   :  { %4299 = vmatpush1.bf16.msra.mxu1 %v7127_v56  ;;  %4259 = vmatprep.subr.bf16.mxu0 %v7132_v24  ;;  %v7196_v24 = vld [vmem:[#allocation9 + $0x430] ss:$24 sps:$4 sm:$0xff]  }
 0x2b1   :  { %4300 = vmatprep.subr.bf16.mxu1 %v7135_v25  ;;  %v7199_v25 = vld [vmem:[#allocation9 + $0x730] ss:$24 sps:$4 sm:$0xff]  }
 0x2b3   :  { %4260 = vmatpush1.bf16.msra.mxu0 %v7130_v26 }
 0x2b4   :  { %4301 = vmatpush1.bf16.msra.mxu1 %v7133_v59  ;;  %4261 = vmatprep.subr.bf16.mxu0 %v7138_v27  ;;  %v7207_v59 = vld [vmem:[#allocation9 + $0x764] ss:$24 sps:$4 sm:$0xff]   ;;  %v7202_v27 = vld [vmem:[#allocation9 + $0x460] ss:$24 sps:$4 sm:$0xff]  }
 0x2b5   :  { %4302 = vmatprep.subr.bf16.mxu1 %v7141_v28  ;;  %v7213_v28 = vld [vmem:[#allocation9 + $0x794] ss:$24 sps:$4 sm:$0xff]  }
 0x2b7   :  { %4262 = vmatpush1.bf16.msra.mxu0 %v7136_v29  ;;  %v7208_v29 = vld [vmem:[#allocation9 + $0x490] ss:$24 sps:$4 sm:$0xff]  }
 0x2b8   :  { %4303 = vmatpush1.bf16.msra.mxu1 %v7139_v30  ;;  %4263 = vmatprep.subr.bf16.mxu0 %v7144_v31  ;;  %v7211_v30 = vld [vmem:[#allocation9 + $0x790] ss:$24 sps:$4 sm:$0xff]   ;;  %v7216_v31 = vld [vmem:[#allocation9 + $0x4c4] ss:$24 sps:$4 sm:$0xff]  }
 0x2b9   :  { %4304 = vmatprep.subr.bf16.mxu1 %v7147_v32  ;;  %v7219_v32 = vld [vmem:[#allocation9 + $0x7c4] ss:$24 sps:$4 sm:$0xff]  }
 0x2bb   :  { %4264 = vmatpush1.bf16.msra.mxu0 %v7142_v34  ;;  %v7214_v34 = vld [vmem:[#allocation9 + $0x4c0] ss:$24 sps:$4 sm:$0xff]  }
 0x2bc   :  { %4305 = vmatpush1.bf16.msra.mxu1 %v7145_v36  ;;  %4265 = vmatprep.subr.bf16.mxu0 %v7150_v37  ;;  %v7217_v36 = vld [vmem:[#allocation9 + $0x7c0] ss:$24 sps:$4 sm:$0xff]   ;;  %v7222_v37 = vld [vmem:[#allocation9 + $0x4f4] ss:$24 sps:$4 sm:$0xff]  }
 0x2bd   :  { %4306 = vmatprep.subr.bf16.mxu1 %v7153_v38  ;;  %v7225_v38 = vld [vmem:[#allocation9 + $0x7f4] ss:$24 sps:$4 sm:$0xff]  }
 0x2bf   :  { %4266 = vmatpush1.bf16.msra.mxu0 %v7148_v39  ;;  %v7220_v39 = vld [vmem:[#allocation9 + $0x4f0] ss:$24 sps:$4 sm:$0xff]  }
 0x2c0   :  { %4307 = vmatpush1.bf16.msra.mxu1 %v7151_v40  ;;  %4267 = vmatprep.subr.bf16.mxu0 %v7156_v49  ;;  %v7223_v40 = vld [vmem:[#allocation9 + $0x7f0] ss:$24 sps:$4 sm:$0xff]   ;;  %v7228_v49 = vld [vmem:[#allocation9 + $0x524] ss:$24 sps:$4 sm:$0xff]  }
 0x2c1   :  { %4308 = vmatprep.subr.bf16.mxu1 %v7159_v9  ;;  %v7231_v9 = vld [vmem:[#allocation9 + $0x824] ss:$24 sps:$4 sm:$0xff]  }
 0x2c3   :  { %4268 = vmatpush1.bf16.msra.mxu0 %v7154_v52  ;;  %v7226_v52 = vld [vmem:[#allocation9 + $0x520] ss:$24 sps:$4 sm:$0xff]  }
 0x2c4   :  { %4309 = vmatpush1.bf16.msra.mxu1 %v7157_v41  ;;  %4319 = vmatprep.subr.bf16.mxu0 %v7162_v33  ;;  %v7229_v41 = vld [vmem:[#allocation9 + $0x820] ss:$24 sps:$4 sm:$0xff]   ;;  %v7234_v33 = vld [vmem:[#allocation9 + $0x554] ss:$24 sps:$4 sm:$0xff]  }
 0x2c5   :  { %4360 = vmatprep.subr.bf16.mxu1 %v7165_v42  ;;  %v7237_v42 = vld [vmem:[#allocation9 + $0x854] ss:$24 sps:$4 sm:$0xff]  }
 0x2c6   :  { %4270 = vmatmul.mubr.bf16.vlgmr.msra.gmra.mrb[28].mxu0 %v7831_v0 }
 0x2c7   :  { %4311 = vmatmul.mubr.bf16.vlgmr.msra.gmra.mrb[28].mxu1 %v7809_v43  ;;  %4320 = vmatpush1.bf16.msra.mxu0 %v7160_v10  ;;  %v7183_v43 = vld [vmem:[#allocation9 + $0x6a4] ss:$24 sps:$4 sm:$0xff]   ;;  %v7232_v10 = vld [vmem:[#allocation9 + $0x550] ss:$24 sps:$4 sm:$0xff]  }
 0x2c8   :  { %4361 = vmatpush1.bf16.msra.mxu1 %v7163_v15  ;;  %4321 = vmatprep.subr.bf16.mxu0 %v7168_v44  ;;  %v7235_v15 = vld [vmem:[#allocation9 + $0x850] ss:$24 sps:$4 sm:$0xff]   ;;  %v7240_v44 = vld [vmem:[#allocation9 + $0x584] ss:$24 sps:$4 sm:$0xff]  }
 0x2c9   :  { %4362 = vmatprep.subr.bf16.mxu1 %v7171_v45  ;;  %4351 = vmatprep.mubr.bf16.mxu0 %v7811_v46  ;;  %v7184_v46 = vld [vmem:[#allocation9 + $0x3d0] ss:$24 sps:$4 sm:$0xff]   ;;  %v7243_v45 = vld [vmem:[#allocation9 + $0x884] ss:$24 sps:$4 sm:$0xff]  }
 0x2ca   :  { %4392 = vmatprep.mubr.bf16.mxu1 %v7813_v47  ;;  %v7187_v47 = vld [vmem:[#allocation9 + $0x6d0] ss:$24 sps:$4 sm:$0xff]  }
 0x2cb   :  { %4322 = vmatpush1.bf16.msra.mxu0 %v7166_v48  ;;  %v7238_v48 = vld [vmem:[#allocation9 + $0x580] ss:$24 sps:$4 sm:$0xff]  }
 0x2cc   :  { %4363 = vmatpush1.bf16.msra.mxu1 %v7169_v50  ;;  %4323 = vmatprep.subr.bf16.mxu0 %v7174_v51  ;;  %v7241_v50 = vld [vmem:[#allocation9 + $0x880] ss:$24 sps:$4 sm:$0xff]   ;;  %v7246_v51 = vld [vmem:[#allocation9 + $0x5b4] ss:$24 sps:$4 sm:$0xff]  }
 0x2cd   :  { %4364 = vmatprep.subr.bf16.mxu1 %v7177_v54  ;;  %v7249_v54 = vld [vmem:[#allocation9 + $0x8b4] ss:$24 sps:$4 sm:$0xff]  }
 0x2cf   :  { %4324 = vmatpush1.bf16.msra.mxu0 %v7172_v55  ;;  %v7244_v55 = vld [vmem:[#allocation9 + $0x5b0] ss:$24 sps:$4 sm:$0xff]  }
 0x2d0   :  { %4365 = vmatpush1.bf16.msra.mxu1 %v7175_v57  ;;  %4325 = vmatprep.subr.bf16.mxu0 %v7180_v58  ;;  %v7247_v57 = vld [vmem:[#allocation9 + $0x8b0] ss:$24 sps:$4 sm:$0xff]   ;;  %v7252_v58 = vld [vmem:[#allocation9 + $0x5e4] ss:$24 sps:$4 sm:$0xff]  }
 0x2d1   :  { %4366 = vmatprep.subr.bf16.mxu1 %v7183_v43  ;;  %v7255_v43 = vld [vmem:[#allocation9 + $0x8e4] ss:$24 sps:$4 sm:$0xff]  }
 0x2d3   :  { %4326 = vmatpush1.bf16.msra.mxu0 %v7178_v60  ;;  %v4563_v60 = vld [vmem:[%s8518_s8 + $0x80] sm:$0xff] }
 0x2d4   :  { %4367 = vmatpush1.bf16.msra.mxu1 %v7181_v61  ;;  %4327 = vmatprep.subr.bf16.mxu0 %v7186_v62  ;;  %v4564_v61 = vld [vmem:[%s8518_s8 + $0x88] sm:$0xff]  ;;  %v4595_v62 = vld [vmem:[%s8518_s8 + $0x180] sm:$0xff] }
 0x2d5   :  { %4368 = vmatprep.subr.bf16.mxu1 %v7189_v1  ;;  %v4596_v1 = vld [vmem:[%s8518_s8 + $0x188] sm:$0xff] }
 0x2d7   :  { %4328 = vmatpush1.bf16.msra.mxu0 %v7184_v46  ;;  %v7250_v46 = vld [vmem:[#allocation9 + $0x5e0] ss:$24 sps:$4 sm:$0xff]  }
 0x2d8   :  { %4369 = vmatpush1.bf16.msra.mxu1 %v7187_v47  ;;  %4329 = vmatprep.subr.bf16.mxu0 %v7192_v2  ;;  %v7253_v47 = vld [vmem:[#allocation9 + $0x8e0] ss:$24 sps:$4 sm:$0xff]   ;;  %v4547_v2 = vld [vmem:[%s8518_s8] sm:$0xff] }
 0x2d9   :  { %4370 = vmatprep.subr.bf16.mxu1 %v7195_v3  ;;  %v2585_v11 = vpop.f32.mrb[16].mxu0  ;;  %v4548_v3 = vld [vmem:[%s8518_s8 + $0x8] sm:$0xff] }
 0x2da   :  { %v4066_v12 = vpop.f32.mrb[16].mxu1  ;;  %v7856_v14 = vadd.f32 %v2585_v11, %v7847_v53  ;;  %v2587_v19 = vpop.f32.mrb[17].mxu0  ;;  %v4580_v11 = vld [vmem:[%s8518_s8 + $0x108] sm:$0xff] }
 0x2db   :  { %v7859_v18 = vadd.f32 %v4066_v12, %v7822_v13  ;;  %v4068_v20 = vpop.f32.mrb[17].mxu1  ;;  %v7862_v21 = vadd.f32 %v2587_v19, %v7849_v17  ;;  %v2589_v23 = vpop.f32.mrb[18].mxu0  ;;  %4330 = vmatpush1.bf16.msra.mxu0 %v7190_v4  ;;  %v7204_v13 = vld [vmem:[#allocation9 + $0x464] ss:$24 sps:$4 sm:$0xff]   ;;  %v7205_v17 = vld [vmem:[#allocation9 + $0x760] ss:$24 sps:$4 sm:$0xff]   ;;  %v6169_v4 = vpack.c.bf16 %v4564_v61, %v4563_v60 }
 0x2dc   :  { %v7865_v22 = vadd.f32 %v4068_v20, %v7827_v16  ;;  %v4070_v56 = vpop.f32.mrb[18].mxu1  ;;  %4371 = vmatpush1.bf16.msra.mxu1 %v7193_v5  ;;  %v2590_v26 = vpop.f32.mrb[19].mxu0  ;;  %4331 = vmatprep.subr.bf16.mxu0 %v7198_v6  ;;  %v7210_v16 = vld [vmem:[#allocation9 + $0x494] ss:$24 sps:$4 sm:$0xff]   ;;  %v4565_v5 = vld [vmem:[%s8518_s8 + $0x90] sm:$0xff]  ;;  %v6201_v6 = vpack.c.bf16 %v4596_v1, %v4595_v62  ;;  %v4566_v12 = vld [vmem:[%s8518_s8 + $0x98] sm:$0xff]  ;;  %v6171_v23 = vpack.c.bf16 %v4548_v3, %v4547_v2 }
 0x2dd   :  { %v4071_v53 = vpop.f32.mrb[19].mxu1  ;;  %4372 = vmatprep.subr.bf16.mxu1 %v7201_v7  ;;  %v4579_v7 = vld [vmem:[%s8518_s8 + $0x100] sm:$0xff]  ;;  %v4597_v19 = vld [vmem:[%s8518_s8 + $0x190] sm:$0xff]  ;;  %v4598_v20 = vld [vmem:[%s8518_s8 + $0x198] sm:$0xff]  ;;  %v6173_v26 = vpack.c.bf16 %v4566_v12, %v4565_v5 }
 0x2de   :  { %v4549_v56 = vld [vmem:[%s8518_s8 + $0x10] sm:$0xff]  ;;  %v4567_v53 = vld [vmem:[%s8518_s8 + $0xa0] sm:$0xff]  ;;  %v4588_v1 = vld [vmem:[%s8518_s8 + $0x148] sm:$0xff] }
 0x2df   :  { %4332 = vmatpush1.bf16.msra.mxu0 %v7196_v24  ;;  %v4550_v24 = vld [vmem:[%s8518_s8 + $0x18] sm:$0xff]  ;;  %v4573_v60 = vld [vmem:[%s8518_s8 + $0xd0] sm:$0xff]  ;;  %v4587_v62 = vld [vmem:[%s8518_s8 + $0x140] sm:$0xff] }
 0x2e0   :  { %4373 = vmatpush1.bf16.msra.mxu1 %v7199_v25  ;;  %4333 = vmatprep.subr.bf16.mxu0 %v7204_v13  ;;  %v6203_v25 = vpack.c.bf16 %v4580_v11, %v4579_v7  ;;  %v6205_v13 = vpack.c.bf16 %v4598_v20, %v4597_v19  ;;  %v4606_v2 = vld [vmem:[%s8518_s8 + $0x1d8] sm:$0xff]  ;;  %v4557_v5 = vld [vmem:[%s8518_s8 + $0x50] sm:$0xff] }
 0x2e1   :  { %4374 = vmatprep.subr.bf16.mxu1 %v7207_v59  ;;  %v4581_v59 = vld [vmem:[%s8518_s8 + $0x110] sm:$0xff]  ;;  %v4558_v11 = vld [vmem:[%s8518_s8 + $0x58] sm:$0xff] }
 0x2e2   :  { %v4589_v19 = vld [vmem:[%s8518_s8 + $0x150] sm:$0xff]  ;;  %v4590_v20 = vld [vmem:[%s8518_s8 + $0x158] sm:$0xff] }
 0x2e3   :  { %4334 = vmatpush1.bf16.msra.mxu0 %v7202_v27  ;;  %v4582_v27 = vld [vmem:[%s8518_s8 + $0x118] sm:$0xff] }
 0x2e4   :  { %4375 = vmatpush1.bf16.msra.mxu1 %v7205_v17  ;;  %4335 = vmatprep.subr.bf16.mxu0 %v7210_v16  ;;  %v4568_v17 = vld [vmem:[%s8518_s8 + $0xa8] sm:$0xff]  ;;  %v4599_v16 = vld [vmem:[%s8518_s8 + $0x1a0] sm:$0xff] }
 0x2e5   :  { %4376 = vmatprep.subr.bf16.mxu1 %v7213_v28  ;;  %v4600_v28 = vld [vmem:[%s8518_s8 + $0x1a8] sm:$0xff] }
 0x2e7   :  { %4336 = vmatpush1.bf16.msra.mxu0 %v7208_v29  ;;  %v6175_v29 = vpack.c.bf16 %v4550_v24, %v4549_v56  ;;  %v4576_v56 = vld [vmem:[%s8518_s8 + $0xe8] sm:$0xff]  ;;  %v8021_v24 = vld [vmem:[#allocation12] sm:$0x3f] }
 0x2e8   :  { %4377 = vmatpush1.bf16.msra.mxu1 %v7211_v30  ;;  %4337 = vmatprep.subr.bf16.mxu0 %v7216_v31  ;;  %v4551_v30 = vld [vmem:[%s8518_s8 + $0x20] sm:$0xff]  ;;  %v4552_v31 = vld [vmem:[%s8518_s8 + $0x28] sm:$0xff] }
 0x2e9   :  { %4378 = vmatprep.subr.bf16.mxu1 %v7219_v32  ;;  %v6207_v32 = vpack.c.bf16 %v4582_v27, %v4581_v59  ;;  %v6223_v59 = vpack.c.bf16 %v4590_v20, %v4589_v19  ;;  %v4607_v27 = vld [vmem:[%s8518_s8 + $0x1e0] sm:$0xff]  ;;  %v4630_v19 = vld [vmem:[%s8518_s8 + $0x298] sm:$0xff]  ;;  %v4613_v20 = vld [vmem:[%s8518_s8 + $0x210] sm:$0xff] }
 0x2eb   :  { %4338 = vmatpush1.bf16.msra.mxu0 %v7214_v34  ;;  %v6177_v34 = vpack.c.bf16 %v4568_v17, %v4567_v53  ;;  %v6191_v53 = vpack.c.bf16 %v4558_v11, %v4557_v5  ;;  %v4608_v17 = vld [vmem:[%s8518_s8 + $0x1e8] sm:$0xff] }
 0x2ec   :  { %4379 = vmatpush1.bf16.msra.mxu1 %v7217_v36  ;;  %4339 = vmatprep.subr.bf16.mxu0 %v7222_v37  ;;  %v4583_v36 = vld [vmem:[%s8518_s8 + $0x120] sm:$0xff]  ;;  %v4584_v37 = vld [vmem:[%s8518_s8 + $0x128] sm:$0xff] }
 0x2ed   :  { %4380 = vmatprep.subr.bf16.mxu1 %v7225_v38  ;;  %v4570_v38 = vld [vmem:[%s8518_s8 + $0xb8] sm:$0xff]  ;;  %v4468_v5 = vld [vmem:[%s8517_s7 + $0x88] sm:$0xff] }
 0x2ef   :  { %4340 = vmatpush1.bf16.msra.mxu0 %v7220_v39  ;;  %v4601_v39 = vld [vmem:[%s8518_s8 + $0x1b0] sm:$0xff] }
 0x2f0   :  { %4381 = vmatpush1.bf16.msra.mxu1 %v7223_v40  ;;  %4341 = vmatprep.subr.bf16.mxu0 %v7228_v49  ;;  %v4602_v40 = vld [vmem:[%s8518_s8 + $0x1b8] sm:$0xff]  ;;  %v6179_v49 = vpack.c.bf16 %v4552_v31, %v4551_v30  ;;  %v4591_v30 = vld [vmem:[%s8518_s8 + $0x160] sm:$0xff]  ;;  %v4592_v31 = vld [vmem:[%s8518_s8 + $0x168] sm:$0xff] }
 0x2f1   :  { %4382 = vmatprep.subr.bf16.mxu1 %v7231_v9  ;;  %v4553_v9 = vld [vmem:[%s8518_s8 + $0x30] sm:$0xff] }
 0x2f3   :  { %4342 = vmatpush1.bf16.msra.mxu0 %v7226_v52  ;;  %v4554_v52 = vld [vmem:[%s8518_s8 + $0x38] sm:$0xff] }
 0x2f4   :  { %4383 = vmatpush1.bf16.msra.mxu1 %v7229_v41  ;;  %4343 = vmatprep.subr.bf16.mxu0 %v7234_v33  ;;  %v6211_v41 = vpack.c.bf16 %v4584_v37, %v4583_v36 }
 0x2f5   :  { %4384 = vmatprep.subr.bf16.mxu1 %v7237_v42  ;;  %v4571_v42 = vld [vmem:[%s8518_s8 + $0xc0] sm:$0xff] }
 0x2f7   :  { %4344 = vmatpush1.bf16.msra.mxu0 %v7232_v10  ;;  %v6213_v10 = vpack.c.bf16 %v4602_v40, %v4601_v39 }
 0x2f8   :  { %4385 = vmatpush1.bf16.msra.mxu1 %v7235_v15  ;;  %4345 = vmatprep.subr.bf16.mxu0 %v7240_v44  ;;  %v4585_v15 = vld [vmem:[%s8518_s8 + $0x130] sm:$0xff]  ;;  %v4586_v44 = vld [vmem:[%s8518_s8 + $0x138] sm:$0xff] }
 0x2f9   :  { %4386 = vmatprep.subr.bf16.mxu1 %v7243_v45  ;;  %v4572_v45 = vld [vmem:[%s8518_s8 + $0xc8] sm:$0xff] }
 0x2fb   :  { %4346 = vmatpush1.bf16.msra.mxu0 %v7238_v48  ;;  %v4603_v48 = vld [vmem:[%s8518_s8 + $0x1c0] sm:$0xff] }
 0x2fc   :  { %4387 = vmatpush1.bf16.msra.mxu1 %v7241_v50  ;;  %4347 = vmatprep.subr.bf16.mxu0 %v7246_v51  ;;  %v4604_v50 = vld [vmem:[%s8518_s8 + $0x1c8] sm:$0xff]  ;;  %v4403_v51 = vlaneseq }
 0x2fd   :  { %4388 = vmatprep.subr.bf16.mxu1 %v7249_v54  ;;  %v6183_v54 = vpack.c.bf16 %v4554_v52, %v4553_v9  ;;  %v6217_v61 = vpack.c.bf16 %v4604_v50, %v4603_v48  ;;  %v4562_v48 = vld [vmem:[%s8518_s8 + $0x78] sm:$0xff] }
 0x2fe   :  { %v8001_v3 = vshrl.u32 %v4403_v51, 7 }
 0x2ff   :  { %4348 = vmatpush1.bf16.msra.mxu0 %v7244_v55  ;;  %v4555_v55 = vld [vmem:[%s8518_s8 + $0x40] sm:$0xff] }
 0x300   :  { %4389 = vmatpush1.bf16.msra.mxu1 %v7247_v57  ;;  %4349 = vmatprep.subr.bf16.mxu0 %v7252_v58  ;;  %v4556_v57 = vld [vmem:[%s8518_s8 + $0x48] sm:$0xff]  ;;  %v6215_v58 = vpack.c.bf16 %v4586_v44, %v4585_v15 }
 0x301   :  { %4390 = vmatprep.subr.bf16.mxu1 %v7255_v43  ;;  %v6185_v43 = vpack.c.bf16 %v4572_v45, %v4571_v42  ;;  %v4609_v42 = vld [vmem:[%s8518_s8 + $0x1f0] sm:$0xff] }
 0x303   :  { %4350 = vmatpush1.bf16.msra.mxu0 %v7250_v46  ;;  %v4574_v46 = vld [vmem:[%s8518_s8 + $0xd8] sm:$0xff] }
 0x304   :  { %4391 = vmatpush1.bf16.msra.mxu1 %v7253_v47  ;;  %6170 = vmatprep.subr.bf16.mxu0 %v6169_v4  ;;  %v4605_v47 = vld [vmem:[%s8518_s8 + $0x1d0] sm:$0xff]  ;;  %v6187_v4 = vpack.c.bf16 %v4556_v57, %v4555_v55  ;;  %v6189_v7 = vpack.c.bf16 %v4574_v46, %v4573_v60  ;;  %v4594_v55 = vld [vmem:[%s8518_s8 + $0x178] sm:$0xff]  ;;  %v4611_v46 = vld [vmem:[%s8518_s8 + $0x200] sm:$0xff] }
 0x305   :  { %6202 = vmatprep.subr.bf16.mxu1 %v6201_v6  ;;  %v6219_v6 = vpack.c.bf16 %v4588_v1, %v4587_v62  ;;  %v6221_v12 = vpack.c.bf16 %v4606_v2, %v4605_v47  ;;  %v4627_v62 = vld [vmem:[%s8518_s8 + $0x280] sm:$0xff]  ;;  %v4628_v1 = vld [vmem:[%s8518_s8 + $0x288] sm:$0xff] }
 0x306   :  { %4352 = vmatmul.mubr.bf16.vlgmr.msra.gmra.mrb[32].mxu0 %v7829_v63  ;;  %v4569_v63 = vld [vmem:[%s8518_s8 + $0xb0] sm:$0xff]  ;;  %v6233_v47 = vpack.c.bf16 %v4628_v1, %v4627_v62  ;;  %v4612_v2 = vld [vmem:[%s8518_s8 + $0x208] sm:$0xff] }
 0x307   :  { %4393 = vmatmul.mubr.bf16.vlgmr.msra.gmra.mrb[32].mxu1 %v7831_v0  ;;  %6172 = vmatpush3.bf16.msra.mxu0 %v6171_v23  ;;  %v6209_v0 = vpack.c.bf16 %v4600_v28, %v4599_v16  ;;  %v6181_v33 = vpack.c.bf16 %v4570_v38, %v4569_v63  ;;  %v4575_v23 = vld [vmem:[%s8518_s8 + $0xe0] sm:$0xff]  ;;  %v4560_v28 = vld [vmem:[%s8518_s8 + $0x68] sm:$0xff]  ;;  %v4577_v63 = vld [vmem:[%s8518_s8 + $0xf0] sm:$0xff] }
 0x308   :  { %6204 = vmatpush3.bf16.msra.mxu1 %v6203_v25  ;;  %6174 = vmatprep.subr.bf16.mxu0 %v6173_v26  ;;  %v4405_v25 = vsub.s32 0, %v8001_v3  ;;  %v4409_v26 = vsub.s32 1, %v8001_v3  ;;  %v6193_v16 = vpack.c.bf16 %v4576_v56, %v4575_v23  ;;  %v4614_v23 = vld [vmem:[%s8518_s8 + $0x218] sm:$0xff] }
 0x309   :  { %6206 = vmatprep.subr.bf16.mxu1 %v6205_v13  ;;  %v4559_v13 = vld [vmem:[%s8518_s8 + $0x60] sm:$0xff] }
 0x30a   :  { %v4406_v37 = vrot.slane %v8021_v24, %v4405_v25  ;;  %v4410_v40 = vrot.slane %v8021_v24, %v4409_v26  ;;  %v6239_v25 = vpack.c.bf16 %v4614_v23, %v4613_v20  ;;  %v4631_v26 = vld [vmem:[%s8518_s8 + $0x2a0] sm:$0xff] }
 0x30b   :  { %6176 = vmatpush3.bf16.msra.mxu0 %v6175_v29  ;;  %v6225_v29 = vpack.c.bf16 %v4608_v17, %v4607_v27  ;;  %v4616_v27 = vld [vmem:[%s8518_s8 + $0x228] sm:$0xff] }
 0x30c   :  { %6208 = vmatpush3.bf16.msra.mxu1 %v6207_v32  ;;  %6178 = vmatprep.subr.bf16.mxu0 %v6177_v34 }
 0x30d   :  { %6210 = vmatprep.subr.bf16.mxu1 %v6209_v0  ;;  %v4578_v0 = vld [vmem:[%s8518_s8 + $0xf8] sm:$0xff] }
 0x30e   :  { %v6197_v45 = vpack.c.bf16 %v4578_v0, %v4577_v63  ;;  %v4636_v63 = vld [vmem:[%s8518_s8 + $0x2c8] sm:$0xff] }
 0x30f   :  { %6180 = vmatpush3.bf16.msra.mxu0 %v6179_v49 }
 0x310   :  { %6212 = vmatpush3.bf16.msra.mxu1 %v6211_v41  ;;  %6182 = vmatprep.subr.bf16.mxu0 %v6181_v33  ;;  %v6195_v41 = vpack.c.bf16 %v4560_v28, %v4559_v13  ;;  %v6227_v33 = vpack.c.bf16 %v4592_v31, %v4591_v30  ;;  %v4634_v28 = vld [vmem:[%s8518_s8 + $0x2b8] sm:$0xff]  ;;  %v4617_v30 = vld [vmem:[%s8518_s8 + $0x230] sm:$0xff] }
 0x311   :  { %6214 = vmatprep.subr.bf16.mxu1 %v6213_v10  ;;  %v4618_v31 = vld [vmem:[%s8518_s8 + $0x238] sm:$0xff] }
 0x313   :  { %6184 = vmatpush3.bf16.msra.mxu0 %v6183_v54  ;;  %v4593_v54 = vld [vmem:[%s8518_s8 + $0x170] sm:$0xff] }
 0x314   :  { %6216 = vmatpush3.bf16.msra.mxu1 %v6215_v58  ;;  %6186 = vmatprep.subr.bf16.mxu0 %v6185_v43  ;;  %v6231_v60 = vpack.c.bf16 %v4594_v55, %v4593_v54 }
 0x315   :  { %6218 = vmatprep.subr.bf16.mxu1 %v6217_v61 }
 0x317   :  { %6188 = vmatpush3.bf16.msra.mxu0 %v6187_v4  ;;  %v4467_v4 = vld [vmem:[%s8517_s7 + $0x80] sm:$0xff] }
 0x318   :  { %6220 = vmatpush3.bf16.msra.mxu1 %v6219_v6  ;;  %6190 = vmatprep.subr.bf16.mxu0 %v6189_v7  ;;  %v6235_v7 = vpack.c.bf16 %v4612_v2, %v4611_v46  ;;  %v6265_v11 = vpack.c.bf16 %v4468_v5, %v4467_v4  ;;  %v4626_v46 = vld [vmem:[%s8518_s8 + $0x278] sm:$0xff]  ;;  %v4499_v2 = vld [vmem:[%s8517_s7 + $0x180] sm:$0xff]  ;;  %v4500_v4 = vld [vmem:[%s8517_s7 + $0x188] sm:$0xff] }
 0x319   :  { %6222 = vmatprep.subr.bf16.mxu1 %v6221_v12  ;;  %v4107_v32 = vpop.f32.mrb[20].mxu0  ;;  %v4629_v12 = vld [vmem:[%s8518_s8 + $0x290] sm:$0xff]  ;;  %v6297_v5 = vpack.c.bf16 %v4500_v4, %v4499_v2  ;;  %v4482_v4 = vld [vmem:[%s8517_s7 + $0xf8] sm:$0xff] }
 0x31a   :  { %v4148_v34 = vpop.f32.mrb[20].mxu1  ;;  %v4108_v36 = vadd.f32 %v4107_v32, %v7859_v18  ;;  %v4109_v38 = vpop.f32.mrb[21].mxu0  ;;  %v4610_v18 = vld [vmem:[%s8518_s8 + $0x1f8] sm:$0xff]  ;;  %v6237_v56 = vpack.c.bf16 %v4630_v19, %v4629_v12  ;;  %v6247_v32 = vpack.c.bf16 %v4618_v31, %v4617_v30  ;;  %v4469_v31 = vld [vmem:[%s8517_s7 + $0x90] sm:$0xff] }
 0x31b   :  { %v4150_v39 = vpop.f32.mrb[21].mxu1  ;;  %v4110_v49 = vadd.f32 %v4109_v38, %v7865_v22  ;;  %v4111_v9 = vpop.f32.mrb[22].mxu0  ;;  %6192 = vmatpush3.bf16.msra.mxu0 %v6191_v53  ;;  %v4561_v22 = vld [vmem:[%s8518_s8 + $0x70] sm:$0xff]  ;;  %v6229_v50 = vpack.c.bf16 %v4610_v18, %v4609_v42  ;;  %v4632_v53 = vld [vmem:[%s8518_s8 + $0x2a8] sm:$0xff] }
 0x31c   :  { %v4152_v52 = vpop.f32.mrb[22].mxu1  ;;  %6224 = vmatpush3.bf16.msra.mxu1 %v6223_v59  ;;  %v4149_v10 = vadd.f32 %v4148_v34, %v4108_v36  ;;  %v4112_v15 = vpop.f32.mrb[23].mxu0  ;;  %6194 = vmatprep.subr.bf16.mxu0 %v6193_v16  ;;  %v6199_v58 = vpack.c.bf16 %v4562_v48, %v4561_v22  ;;  %v6241_v13 = vpack.c.bf16 %v4632_v53, %v4631_v26  ;;  %v4615_v59 = vld [vmem:[%s8518_s8 + $0x220] sm:$0xff]  ;;  %v4633_v16 = vld [vmem:[%s8518_s8 + $0x2b0] sm:$0xff]  ;;  %v4640_v42 = vld [vmem:[%s8518_s8 + $0x2e8] sm:$0xff] }
 0x31d   :  { %v4153_v44 = vpop.f32.mrb[23].mxu1  ;;  %6226 = vmatprep.subr.bf16.mxu1 %v6225_v29  ;;  %v4151_v51 = vadd.f32 %v4150_v39, %v4110_v49  ;;  %v6243_v17 = vpack.c.bf16 %v4616_v27, %v4615_v59  ;;  %v6245_v29 = vpack.c.bf16 %v4634_v28, %v4633_v16  ;;  %v4635_v34 = vld [vmem:[%s8518_s8 + $0x2c0] sm:$0xff]  ;;  %v4637_v39 = vld [vmem:[%s8518_s8 + $0x2d0] sm:$0xff]  ;;  %v4622_v52 = vld [vmem:[%s8518_s8 + $0x258] sm:$0xff] }
 0x31e   :  { %v4433_v43 = vadd.f32 %v4406_v37, %v4149_v10  ;;  %v6249_v0 = vpack.c.bf16 %v4636_v63, %v4635_v34  ;;  %v4619_v36 = vld [vmem:[%s8518_s8 + $0x240] sm:$0xff]  ;;  %v4620_v37 = vld [vmem:[%s8518_s8 + $0x248] sm:$0xff]  ;;  %v4621_v9 = vld [vmem:[%s8518_s8 + $0x250] sm:$0xff] }
 0x31f   :  { %v4434_v57 = vadd.f32 %v4410_v40, %v4151_v51  ;;  %6196 = vmatpush3.bf16.msra.mxu0 %v6195_v41  ;;  %v6251_v38 = vpack.c.bf16 %v4620_v37, %v4619_v36  ;;  %v4638_v40 = vld [vmem:[%s8518_s8 + $0x2d8] sm:$0xff]  ;;  %v6255_v41 = vpack.c.bf16 %v4622_v52, %v4621_v9  ;;  %v4623_v44 = vld [vmem:[%s8518_s8 + $0x260] sm:$0xff]  ;;  %v4453_v36 = vld [vmem:[%s8517_s7 + $0x10] sm:$0xff] }
 0x320   :  { %6228 = vmatpush3.bf16.msra.mxu1 %v6227_v33  ;;  %6198 = vmatprep.subr.bf16.mxu0 %v6197_v45  ;;  %v4439_v6 = vmax.f32 %v4433_v43, 0.0  ;;  %v6253_v49 = vpack.c.bf16 %v4638_v40, %v4637_v39  ;;  %v4639_v33 = vld [vmem:[%s8518_s8 + $0x2e0] sm:$0xff]  ;;  %v4624_v45 = vld [vmem:[%s8518_s8 + $0x268] sm:$0xff]  ;;  %v4454_v37 = vld [vmem:[%s8517_s7 + $0x18] sm:$0xff] }
 0x321   :  { %6230 = vmatprep.subr.bf16.mxu1 %v6229_v50  ;;  %v4440_v61 = vmax.f32 %v4434_v57, 0.0  ;;  %v6257_v15 = vpack.c.bf16 %v4640_v42, %v4639_v33  ;;  %v6259_v51 = vpack.c.bf16 %v4624_v45, %v4623_v44  ;;  %v4471_v39 = vld [vmem:[%s8517_s7 + $0xa0] sm:$0xff]  ;;  %v4472_v40 = vld [vmem:[%s8517_s7 + $0xa8] sm:$0xff]  ;;  %v4473_v33 = vld [vmem:[%s8517_s7 + $0xb0] sm:$0xff] }
 0x322   :  { %v6273_v9 = vpack.c.bf16 %v4472_v40, %v4471_v39  ;;  %v4455_v52 = vld [vmem:[%s8517_s7 + $0x20] sm:$0xff]  ;;  %v4474_v42 = vld [vmem:[%s8517_s7 + $0xb8] sm:$0xff]  ;;  %v4481_v2 = vld [vmem:[%s8517_s7 + $0xf0] sm:$0xff] }
 0x323   :  { %6200 = vmatpush3.bf16.msra.mxu0 %v6199_v58  ;;  %4707 = vmatprep.mubr.f32.mxu0 %v4440_v61  ;;  %v4641_v61 = vld [vmem:[%s8518_s8 + $0x2f0] sm:$0xff]  ;;  %v4458_v44 = vld [vmem:[%s8517_s7 + $0x38] sm:$0xff]  ;;  %v4475_v45 = vld [vmem:[%s8517_s7 + $0xc0] sm:$0xff] }
 0x324   :  { %6232 = vmatpush3.bf16.msra.mxu1 %v6231_v60  ;;  %6234 = vmatprep.subr.bf16.mxu0 %v6233_v47  ;;  %v4521_v39 = vld [vmem:[%s8517_s7 + $0x230] sm:$0xff]  ;;  %v4522_v40 = vld [vmem:[%s8517_s7 + $0x238] sm:$0xff] }
 0x325   :  { %6266 = vmatprep.subr.bf16.mxu1 %v6265_v11 }
 0x326   :  { %4708 = vmatmul.mubr.f32.vlgmr.msra.gmra.mrb[36].mxu0 %v4439_v6  ;;  %v4413_v6 = vsub.s32 2, %v8001_v3 }
 0x327   :  { %6236 = vmatpush3.bf16.msra.mxu0 %v6235_v7  ;;  %v4417_v7 = vsub.s32 3, %v8001_v3 }
 0x328   :  { %6238 = vmatprep.subr.bf16.mxu0 %v6237_v56  ;;  %v4414_v11 = vrot.slane %v8021_v24, %v4413_v6  ;;  %v6293_v6 = vpack.c.bf16 %v4482_v4, %v4481_v2 }
 0x329   :  { %v4418_v20 = vrot.slane %v8021_v24, %v4417_v7  ;;  %v4465_v7 = vld [vmem:[%s8517_s7 + $0x70] sm:$0xff] }
 0x32b   :  { %6240 = vmatpush3.bf16.msra.mxu0 %v6239_v25 }
 0x32c   :  { %6242 = vmatprep.subr.bf16.mxu0 %v6241_v13 }
 0x32f   :  { %6244 = vmatpush3.bf16.msra.mxu0 %v6243_v17 }
 0x330   :  { %6246 = vmatprep.subr.bf16.mxu0 %v6245_v29  ;;  %v4451_v29 = vld [vmem:[%s8517_s7] sm:$0xff] }
 0x333   :  { %6248 = vmatpush3.bf16.msra.mxu0 %v6247_v32 }
 0x334   :  { %6250 = vmatprep.subr.bf16.mxu0 %v6249_v0 }
 0x337   :  { %6252 = vmatpush3.bf16.msra.mxu0 %v6251_v38  ;;  %v4446_v38 = vld [vmem:[#allocation2 + $0x8] sm:$0xff] }
 0x338   :  { %6254 = vmatprep.subr.bf16.mxu0 %v6253_v49  ;;  %v6271_v49 = vpack.c.bf16 %v4454_v37, %v4453_v36  ;;  %v4538_v36 = vld [vmem:[%s8517_s7 + $0x2b8] sm:$0xff] }
 0x33b   :  { %6256 = vmatpush3.bf16.msra.mxu0 %v6255_v41  ;;  %v4456_v41 = vld [vmem:[%s8517_s7 + $0x28] sm:$0xff] }
 0x33c   :  { %6258 = vmatprep.subr.bf16.mxu0 %v6257_v15  ;;  %v4457_v15 = vld [vmem:[%s8517_s7 + $0x30] sm:$0xff] }
 0x33f   :  { %6260 = vmatpush3.bf16.msra.mxu0 %v6259_v51  ;;  %v4459_v51 = vld [vmem:[%s8517_s7 + $0x40] sm:$0xff] }
 0x359   :  { %v4189_v18 = vpop.f32.mrb[24].mxu0 }
 0x35a   :  { %v4230_v10 = vpop.f32.mrb[24].mxu1  ;;  %v4190_v22 = vadd.f32 %v4189_v18, %v7839_v8  ;;  %v4191_v48 = vpop.f32.mrb[25].mxu0  ;;  %v4642_v8 = vld [vmem:[%s8518_s8 + $0x2f8] sm:$0xff]  ;;  %v6275_v18 = vpack.c.bf16 %v4456_v41, %v4455_v52  ;;  %v6343_v52 = vpack.c.bf16 %v4522_v40, %v4521_v39  ;;  %v4488_v39 = vld [vmem:[%s8517_s7 + $0x128] sm:$0xff]  ;;  %v4505_v40 = vld [vmem:[%s8517_s7 + $0x1b0] sm:$0xff] }
 0x35b   :  { %v4232_v50 = vpop.f32.mrb[25].mxu1  ;;  %v4192_v54 = vadd.f32 %v4191_v48, %v7841_v35  ;;  %v4193_v55 = vpop.f32.mrb[26].mxu0  ;;  %v6261_v1 = vpack.c.bf16 %v4642_v8, %v4641_v61  ;;  %v4625_v35 = vld [vmem:[%s8518_s8 + $0x270] sm:$0xff]  ;;  %v6279_v48 = vpack.c.bf16 %v4458_v44, %v4457_v15  ;;  %v4462_v61 = vld [vmem:[%s8517_s7 + $0x58] sm:$0xff]  ;;  %v4479_v8 = vld [vmem:[%s8517_s7 + $0xe0] sm:$0xff] }
 0x35c   :  { %v4234_v57 = vpop.f32.mrb[26].mxu1  ;;  %v4231_v58 = vadd.f32 %v4230_v10, %v4190_v22  ;;  %v4194_v43 = vpop.f32.mrb[27].mxu0  ;;  %v6263_v47 = vpack.c.bf16 %v4626_v46, %v4625_v35  ;;  %v6277_v10 = vpack.c.bf16 %v4474_v42, %v4473_v33  ;;  %v4476_v22 = vld [vmem:[%s8517_s7 + $0xc8] sm:$0xff]  ;;  %v4477_v55 = vld [vmem:[%s8517_s7 + $0xd0] sm:$0xff]  ;;  %v4463_v46 = vld [vmem:[%s8517_s7 + $0x60] sm:$0xff] }
 0x35d   :  { %v4235_v60 = vpop.f32.mrb[27].mxu1  ;;  %v4233_v62 = vadd.f32 %v4232_v50, %v4192_v54  ;;  %6262 = vmatprep.subr.bf16.mxu0 %v6261_v1  ;;  %v6281_v50 = vpack.c.bf16 %v4476_v22, %v4475_v45  ;;  %v4460_v54 = vld [vmem:[%s8517_s7 + $0x48] sm:$0xff]  ;;  %v4478_v57 = vld [vmem:[%s8517_s7 + $0xd8] sm:$0xff]  ;;  %v4523_v33 = vld [vmem:[%s8517_s7 + $0x240] sm:$0xff] }
 0x35e   :  { %6264 = vmatpush3.bf16.msra.mxu0 %v6263_v47  ;;  %v6285_v43 = vpack.c.bf16 %v4478_v57, %v4477_v55  ;;  %v4461_v60 = vld [vmem:[%s8517_s7 + $0x50] sm:$0xff]  ;;  %v4464_v47 = vld [vmem:[%s8517_s7 + $0x68] sm:$0xff]  ;;  %v4526_v22 = vld [vmem:[%s8517_s7 + $0x258] sm:$0xff] }
 0x35f   :  { %6298 = vmatprep.subr.bf16.mxu0 %v6297_v5  ;;  %v6287_v1 = vpack.c.bf16 %v4462_v61, %v4461_v60  ;;  %v6291_v5 = vpack.c.bf16 %v4464_v47, %v4463_v46  ;;  %v4524_v42 = vld [vmem:[%s8517_s7 + $0x248] sm:$0xff]  ;;  %v4525_v45 = vld [vmem:[%s8517_s7 + $0x250] sm:$0xff]  ;;  %v4527_v55 = vld [vmem:[%s8517_s7 + $0x260] sm:$0xff]  ;;  %v4421_v60 = vsub.s32 4, %v8001_v3  ;;  %v4425_v61 = vsub.s32 5, %v8001_v3 }
 0x360   :  { %v6347_v15 = vpack.c.bf16 %v4524_v42, %v4523_v33  ;;  %v4528_v57 = vld [vmem:[%s8517_s7 + $0x268] sm:$0xff]  ;;  %v4490_v33 = vld [vmem:[%s8517_s7 + $0x138] sm:$0xff]  ;;  %v4507_v42 = vld [vmem:[%s8517_s7 + $0x1c0] sm:$0xff] }
 0x361   :  { %v4422_v4 = vrot.slane %v8021_v24, %v4421_v60 }
 0x399   :  { %v4271_v12 = vpop.f32.mrb[28].mxu0 }
 0x39a   :  { %v4312_v19 = vpop.f32.mrb[28].mxu1  ;;  %v4272_v23 = vadd.f32 %v4271_v12, %v4231_v58  ;;  %v4273_v25 = vpop.f32.mrb[29].mxu0  ;;  %v6283_v58 = vpack.c.bf16 %v4460_v54, %v4459_v51  ;;  %v4531_v12 = vld [vmem:[%s8517_s7 + $0x280] sm:$0xff]  ;;  %v6351_v51 = vpack.c.bf16 %v4526_v22, %v4525_v45  ;;  %v4492_v45 = vld [vmem:[%s8517_s7 + $0x148] sm:$0xff]  ;;  %v4509_v22 = vld [vmem:[%s8517_s7 + $0x1d0] sm:$0xff] }
 0x39b   :  { %v8186_v56 = vadd.f32 %v4312_v19, %v7856_v14  ;;  %v4314_v26 = vpop.f32.mrb[29].mxu1  ;;  %v4274_v53 = vadd.f32 %v4273_v25, %v4233_v62  ;;  %v4275_v59 = vpop.f32.mrb[30].mxu0  ;;  %v4452_v14 = vld [vmem:[%s8517_s7 + $0x8] sm:$0xff]  ;;  %v4515_v25 = vld [vmem:[%s8517_s7 + $0x200] sm:$0xff] }
 0x39c   :  { %v8189_v13 = vadd.f32 %v4314_v26, %v7862_v21  ;;  %v4316_v27 = vpop.f32.mrb[30].mxu1  ;;  %v4435_v17 = vadd.f32 %v4414_v11, %v4272_v23  ;;  %v4276_v16 = vpop.f32.mrb[31].mxu0  ;;  %v4470_v21 = vld [vmem:[%s8517_s7 + $0x98] sm:$0xff]  ;;  %v6267_v34 = vpack.c.bf16 %v4452_v14, %v4451_v29  ;;  %v4480_v62 = vld [vmem:[%s8517_s7 + $0xe8] sm:$0xff] }
 0x39d   :  { %v4317_v28 = vpop.f32.mrb[31].mxu1  ;;  %v4436_v30 = vadd.f32 %v4418_v20, %v4274_v53  ;;  %v6269_v0 = vpack.c.bf16 %v4470_v21, %v4469_v31  ;;  %v6289_v35 = vpack.c.bf16 %v4480_v62, %v4479_v8  ;;  %v4466_v11 = vld [vmem:[%s8517_s7 + $0x78] sm:$0xff]  ;;  %v4532_v19 = vld [vmem:[%s8517_s7 + $0x288] sm:$0xff]  ;;  %v4533_v53 = vld [vmem:[%s8517_s7 + $0x290] sm:$0xff]  ;;  %v6355_v8 = vpack.c.bf16 %v4528_v57, %v4527_v55 }
 0x39e   :  { %v4441_v63 = vmax.f32 %v4435_v17, 0.0  ;;  %v6295_v20 = vpack.c.bf16 %v4466_v11, %v4465_v7  ;;  %v6329_v23 = vpack.c.bf16 %v4532_v19, %v4531_v12  ;;  %v4516_v26 = vld [vmem:[%s8517_s7 + $0x208] sm:$0xff]  ;;  %v4534_v59 = vld [vmem:[%s8517_s7 + $0x298] sm:$0xff]  ;;  %v4445_v27 = vld [vmem:[#allocation2] sm:$0xff]  ;;  %v4426_v7 = vrot.slane %v8021_v24, %v4425_v61 }
 0x39f   :  { %v4442_v32 = vmax.f32 %v4436_v30, 0.0  ;;  %v6331_v17 = vpack.c.bf16 %v4516_v26, %v4515_v25  ;;  %v6333_v16 = vpack.c.bf16 %v4534_v59, %v4533_v53  ;;  %v4517_v28 = vld [vmem:[%s8517_s7 + $0x210] sm:$0xff]  ;;  %v4518_v29 = vld [vmem:[%s8517_s7 + $0x218] sm:$0xff]  ;;  %v4450_v14 = vld [vmem:[#allocation2 + $0x28] sm:$0xff] }
 0x3a0   :  { %v4535_v30 = vld [vmem:[%s8517_s7 + $0x2a0] sm:$0xff]  ;;  %v4536_v31 = vld [vmem:[%s8517_s7 + $0x2a8] sm:$0xff]  ;;  %v6335_v21 = vpack.c.bf16 %v4518_v29, %v4517_v28  ;;  %v4501_v24 = vld [vmem:[%s8517_s7 + $0x190] sm:$0xff] }
 0x3a1   :  { %4777 = vmatprep.mubr.f32.mxu1 %v4442_v32  ;;  %v6337_v32 = vpack.c.bf16 %v4536_v31, %v4535_v30  ;;  %v4485_v31 = vld [vmem:[%s8517_s7 + $0x110] sm:$0xff]  ;;  %v4494_v55 = vld [vmem:[%s8517_s7 + $0x158] sm:$0xff]  ;;  %v4511_v57 = vld [vmem:[%s8517_s7 + $0x1e0] sm:$0xff] }
 0x3a2   :  { %4778 = vmatmul.mubr.f32.vlgmr.msra.gmra.mrb[36].mxu1 %v4441_v63  ;;  %v4520_v63 = vld [vmem:[%s8517_s7 + $0x228] sm:$0xff]  ;;  %v4495_v61 = vld [vmem:[%s8517_s7 + $0x160] sm:$0xff] }
 0x3a3   :  { %6268 = vmatpush3.bf16.msra.mxu1 %v6267_v34  ;;  %4917 = vmatprep.mubr.f32.mxu1 %v4446_v38  ;;  %v4519_v34 = vld [vmem:[%s8517_s7 + $0x220] sm:$0xff] }
 0x3a4   :  { %6270 = vmatprep.subr.bf16.mxu1 %v6269_v0  ;;  %v4537_v0 = vld [vmem:[%s8517_s7 + $0x2b0] sm:$0xff]  ;;  %v6339_v37 = vpack.c.bf16 %v4520_v63, %v4519_v34  ;;  %v4503_v34 = vld [vmem:[%s8517_s7 + $0x1a0] sm:$0xff]  ;;  %v4504_v63 = vld [vmem:[%s8517_s7 + $0x1a8] sm:$0xff] }
 0x3a5   :  { %v6341_v38 = vpack.c.bf16 %v4538_v36, %v4537_v0  ;;  %v7531_v0 = vmov 0.0  }
 0x3a7   :  { %6272 = vmatpush3.bf16.msra.mxu1 %v6271_v49  ;;  %v4539_v49 = vld [vmem:[%s8517_s7 + $0x2c0] sm:$0xff] }
 0x3a8   :  { %6274 = vmatprep.subr.bf16.mxu1 %v6273_v9  ;;  %v4540_v9 = vld [vmem:[%s8517_s7 + $0x2c8] sm:$0xff] }
 0x3a9   :  { %v6345_v41 = vpack.c.bf16 %v4540_v9, %v4539_v49  ;;  %v4506_v49 = vld [vmem:[%s8517_s7 + $0x1b8] sm:$0xff] }
 0x3ab   :  { %6276 = vmatpush3.bf16.msra.mxu1 %v6275_v18  ;;  %v4541_v18 = vld [vmem:[%s8517_s7 + $0x2d0] sm:$0xff] }
 0x3ac   :  { %6278 = vmatprep.subr.bf16.mxu1 %v6277_v10  ;;  %v4542_v10 = vld [vmem:[%s8517_s7 + $0x2d8] sm:$0xff] }
 0x3ad   :  { %v6349_v44 = vpack.c.bf16 %v4542_v10, %v4541_v18  ;;  %v4508_v18 = vld [vmem:[%s8517_s7 + $0x1c8] sm:$0xff] }
 0x3af   :  { %6280 = vmatpush3.bf16.msra.mxu1 %v6279_v48  ;;  %v4543_v48 = vld [vmem:[%s8517_s7 + $0x2e0] sm:$0xff] }
 0x3b0   :  { %6282 = vmatprep.subr.bf16.mxu1 %v6281_v50  ;;  %v4544_v50 = vld [vmem:[%s8517_s7 + $0x2e8] sm:$0xff] }
 0x3b1   :  { %v6353_v54 = vpack.c.bf16 %v4544_v50, %v4543_v48  ;;  %v4510_v48 = vld [vmem:[%s8517_s7 + $0x1d8] sm:$0xff] }
 0x3b3   :  { %6284 = vmatpush3.bf16.msra.mxu1 %v6283_v58  ;;  %v4545_v58 = vld [vmem:[%s8517_s7 + $0x2f0] sm:$0xff] }
 0x3b4   :  { %6286 = vmatprep.subr.bf16.mxu1 %v6285_v43  ;;  %v4546_v43 = vld [vmem:[%s8517_s7 + $0x2f8] sm:$0xff] }
 0x3b5   :  { %v6357_v62 = vpack.c.bf16 %v4546_v43, %v4545_v58  ;;  %v4512_v58 = vld [vmem:[%s8517_s7 + $0x1e8] sm:$0xff] }
 0x3b6   :  { %v6321_v60 = vpack.c.bf16 %v4512_v58, %v4511_v57 }
 0x3b7   :  { %6288 = vmatpush3.bf16.msra.mxu1 %v6287_v1  ;;  %v4529_v1 = vld [vmem:[%s8517_s7 + $0x270] sm:$0xff] }
 0x3b8   :  { %6290 = vmatprep.subr.bf16.mxu1 %v6289_v35  ;;  %v4530_v35 = vld [vmem:[%s8517_s7 + $0x278] sm:$0xff] }
 0x3b9   :  { %v6359_v19 = vpack.c.bf16 %v4530_v35, %v4529_v1  ;;  %v4514_v1 = vld [vmem:[%s8517_s7 + $0x1f8] sm:$0xff] }
 0x3bb   :  { %6292 = vmatpush3.bf16.msra.mxu1 %v6291_v5 }
 0x3bc   :  { %6294 = vmatprep.subr.bf16.mxu1 %v6293_v6 }
 0x3bf   :  { %6296 = vmatpush3.bf16.msra.mxu1 %v6295_v20 }
 0x3c0   :  { %6330 = vmatprep.subr.bf16.mxu1 %v6329_v23 }
 0x3c2   :  { %4918 = vmatmul.mubr.f32.vlgmr.msra.gmra.mrb[38].mxu1 %v4445_v27  ;;  %v4502_v27 = vld [vmem:[%s8517_s7 + $0x198] sm:$0xff] }
 0x3c3   :  { %6332 = vmatpush3.bf16.msra.mxu1 %v6331_v17  ;;  %5057 = vmatprep.mubr.f32.mxu1 %v4450_v14  ;;  %v4449_v17 = vld [vmem:[#allocation2 + $0x20] sm:$0xff]  ;;  %v6301_v30 = vpack.c.bf16 %v4502_v27, %v4501_v24 }
 0x3c4   :  { %6334 = vmatprep.subr.bf16.mxu1 %v6333_v16  ;;  %v7529_v16 = vmov 0.0|0.0  }
 0x3c7   :  { %6336 = vmatpush3.bf16.msra.mxu1 %v6335_v21  ;;  %v4486_v21 = vld [vmem:[%s8517_s7 + $0x118] sm:$0xff] }
 0x3c8   :  { %6338 = vmatprep.subr.bf16.mxu1 %v6337_v32  ;;  %v4448_v32 = vld [vmem:[#allocation2 + $0x18] sm:$0xff]  ;;  %v6303_v36 = vpack.c.bf16 %v4486_v21, %v4485_v31 }
 0x3cb   :  { %6340 = vmatpush3.bf16.msra.mxu1 %v6339_v37  ;;  %v6305_v37 = vpack.c.bf16 %v4504_v63, %v4503_v34 }
 0x3cc   :  { %6342 = vmatprep.subr.bf16.mxu1 %v6341_v38  ;;  %v4487_v38 = vld [vmem:[%s8517_s7 + $0x120] sm:$0xff] }
 0x3cd   :  { %v6307_v9 = vpack.c.bf16 %v4488_v39, %v4487_v38 }
 0x3cf   :  { %6344 = vmatpush3.bf16.msra.mxu1 %v6343_v52  ;;  %v6309_v52 = vpack.c.bf16 %v4506_v49, %v4505_v40  ;;  %v5920_v40 = vld [vmem:[#allocation16] ss:$0 sm:$0xff] }
 0x3d0   :  { %6346 = vmatprep.subr.bf16.mxu1 %v6345_v41  ;;  %v4489_v41 = vld [vmem:[%s8517_s7 + $0x130] sm:$0xff] }
 0x3d1   :  { %v6311_v10 = vpack.c.bf16 %v4490_v33, %v4489_v41 }
 0x3d3   :  { %6348 = vmatpush3.bf16.msra.mxu1 %v6347_v15  ;;  %v6313_v15 = vpack.c.bf16 %v4508_v18, %v4507_v42 }
 0x3d4   :  { %6350 = vmatprep.subr.bf16.mxu1 %v6349_v44  ;;  %v4491_v44 = vld [vmem:[%s8517_s7 + $0x140] sm:$0xff] }
 0x3d5   :  { %v6315_v50 = vpack.c.bf16 %v4492_v45, %v4491_v44 }
 0x3d7   :  { %6352 = vmatpush3.bf16.msra.mxu1 %v6351_v51  ;;  %v6317_v51 = vpack.c.bf16 %v4510_v48, %v4509_v22  ;;  %v5927_v48 = vld [vmem:[#allocation18] ss:$0 sm:$0xff] }
 0x3d8   :  { %6354 = vmatprep.subr.bf16.mxu1 %v6353_v54  ;;  %v4493_v54 = vld [vmem:[%s8517_s7 + $0x150] sm:$0xff] }
 0x3d9   :  { %v4353_v46 = vpop.f32.mrb[32].mxu0  ;;  %v6319_v43 = vpack.c.bf16 %v4494_v55, %v4493_v54 }
 0x3da   :  { %v4394_v47 = vpop.f32.mrb[32].mxu1  ;;  %v4354_v2 = vadd.f32 %v4353_v46, %v8186_v56  ;;  %v4355_v5 = vpop.f32.mrb[33].mxu0  ;;  %v4483_v56 = vld [vmem:[%s8517_s7 + $0x100] sm:$0xff] }
 0x3db   :  { %v4396_v3 = vpop.f32.mrb[33].mxu1  ;;  %v4356_v6 = vadd.f32 %v4355_v5, %v8189_v13  ;;  %v4357_v11 = vpop.f32.mrb[34].mxu0  ;;  %6356 = vmatpush3.bf16.msra.mxu1 %v6355_v8  ;;  %v4484_v13 = vld [vmem:[%s8517_s7 + $0x108] sm:$0xff]  ;;  %v4498_v5 = vld [vmem:[%s8517_s7 + $0x178] sm:$0xff] }
 0x3dc   :  { %v4398_v12 = vpop.f32.mrb[34].mxu1  ;;  %v4395_v20 = vadd.f32 %v4394_v47, %v4354_v2  ;;  %v4358_v23 = vpop.f32.mrb[35].mxu0  ;;  %6358 = vmatprep.subr.bf16.mxu1 %v6357_v62  ;;  %v6299_v29 = vpack.c.bf16 %v4484_v13, %v4483_v56  ;;  %v4496_v8 = vld [vmem:[%s8517_s7 + $0x168] sm:$0xff]  ;;  %v4513_v62 = vld [vmem:[%s8517_s7 + $0x1f0] sm:$0xff]  ;;  %v5161_v56 = vld [vmem:[%s8522_s12] sm:$0xff] }
 0x3dd   :  { %v4399_v25 = vpop.f32.mrb[35].mxu1  ;;  %v4397_v26 = vadd.f32 %v4396_v3, %v4356_v6  ;;  %v6323_v46 = vpack.c.bf16 %v4496_v8, %v4495_v61  ;;  %v6325_v2 = vpack.c.bf16 %v4514_v1, %v4513_v62  ;;  %v5074_v11 = vld [vmem:[#allocation15 + $0x8] sm:$0xf]  ;;  %v4447_v12 = vld [vmem:[#allocation2 + $0x10] sm:$0xff] }
 0x3de   :  { %v4437_v53 = vadd.f32 %v4422_v4, %v4395_v20  ;;  %v4497_v4 = vld [vmem:[%s8517_s7 + $0x170] sm:$0xff]  ;;  %v5163_v25 = vld [vmem:[%s8523_s13] sm:$0xff]  ;;  %v5162_v13 = vld [vmem:[%s8522_s12 + $0x8] sm:$0xf] }
 0x3df   :  { %v4438_v59 = vadd.f32 %v4426_v7, %v4397_v26  ;;  %6360 = vmatpush3.bf16.msra.mxu1 %v6359_v19  ;;  %v6327_v6 = vpack.c.bf16 %v4498_v5, %v4497_v4  ;;  %v5073_v7 = vld [vmem:[#allocation15] sm:$0xff]  ;;  %v5072_v23 = vld [vmem:[#allocation7] sm:$0xff]  ;;  %v5164_v26 = vld [vmem:[%s8523_s13 + $0x8] sm:$0xf] }
 0x3e0   :  { %6365 = vmatprep.subr.bf16.mxu1 %v7529_v16  ;;  %v4443_v14 = vmax.f32 %v4437_v53, 0.0  ;;  %v6362_v19 = vpack.c.bf16 %v5074_v11, %v5073_v7  ;;  %v6366_v53 = vpack.c.bf16 %v5164_v26, %v5163_v25 }
 0x3e1   :  { %v4444_v28 = vmax.f32 %v4438_v59, 0.0  ;;  %v6370_v59 = vpack.c.bf16 %v5162_v13, %v5161_v56 }
 0x3e2   :  { %5058 = vmatmul.mubr.f32.vlgmr.msra.gmra.mrb[40].mxu1 %v4449_v17 }
 0x3e3   :  { %4847 = vmatprep.mubr.f32.mxu0 %v4444_v28  ;;  %6159 = vmatprep.mubr.msk.f32.mxu1 %vm7530_vm0, %v7531_v0 }
 0x3e4   :  { %4848 = vmatmul.mubr.f32.vlgmr.msra.gmra.mrb[38].mxu0 %v4443_v14  ;;  %6368 = vmatpush3.bf16.msk.msra.mxu1 %vm8477_vm3, %v6366_v53 }
 0x3e5   :  { %6300 = vmatpush3.bf16.msra.mxu0 %v6299_v29  ;;  %4987 = vmatprep.mubr.f32.mxu0 %v4448_v32 }
 0x3e6   :  { %6302 = vmatprep.subr.bf16.mxu0 %v6301_v30 }
 0x3e9   :  { %6304 = vmatpush3.bf16.msra.mxu0 %v6303_v36 }
 0x3ea   :  { %6306 = vmatprep.subr.bf16.mxu0 %v6305_v37 }
 0x3ed   :  { %6308 = vmatpush3.bf16.msra.mxu0 %v6307_v9 }
 0x3ee   :  { %6310 = vmatprep.subr.bf16.mxu0 %v6309_v52  ;;  %v5919_v52 = vld [vmem:[#allocation13] ss:$0 sm:$0xff] }
 0x3f1   :  { %6312 = vmatpush3.bf16.msra.mxu0 %v6311_v10 }
 0x3f2   :  { %6314 = vmatprep.subr.bf16.mxu0 %v6313_v15 }
 0x3f5   :  { %6316 = vmatpush3.bf16.msra.mxu0 %v6315_v50 }
 0x3f6   :  { %6318 = vmatprep.subr.bf16.mxu0 %v6317_v51 }
 0x3f9   :  { %6320 = vmatpush3.bf16.msra.mxu0 %v6319_v43  ;;  %v5961_v35 = vpop.f32.mrb[36].mxu0 }
 0x3fa   :  { %v5962_v47 = vpop.f32.mrb[37].mxu0  ;;  %6322 = vmatprep.subr.bf16.mxu0 %v6321_v60 }
 0x3fb   :  { %v5963_v3 = vadd.f32 %v5962_v47, %v5961_v35 }
 0x3fd   :  { %6324 = vmatpush3.bf16.msra.mxu0 %v6323_v46 }
 0x3fe   :  { %6326 = vmatprep.subr.bf16.mxu0 %v6325_v2 }
 0x401   :  { %6328 = vmatpush3.bf16.msra.mxu0 %v6327_v6 }
 0x402   :  { %6361 = vmatprep.subr.bf16.mxu0 %v7529_v16 }
 0x404   :  { %4988 = vmatmul.mubr.f32.vlgmr.msra.gmra.mrb[40].mxu0 %v4447_v12 }
 0x405   :  { %6364 = vmatpush3.bf16.msk.msra.mxu0 %vm8477_vm3, %v6362_v19  ;;  %6152 = vmatprep.mubr.msk.f32.mxu0 %vm7530_vm0, %v7531_v0 }
 0x406   :  { %6369 = vmatprep.subr.bf16.mxu0 %v7529_v16 }
 0x408   :  { %6153 = vmatmul.mubr.msk.f32.vlgmr.msra.gmra.mrb[42].mxu0 %vm5082_vm4, %v5072_v23 }
 0x409   :  { %6166 = vmatprep.mubr.msk.f32.mxu0 %vm7530_vm0, %v7531_v0  ;;  %6372 = vmatpush3.bf16.msk.msra.mxu0 %vm8477_vm3, %v6370_v59 }
 0x475   :  { %v5996_v24 = vpop.f32.mrb[36].mxu1 }
 0x476   :  { %v5997_v27 = vpop.f32.mrb[37].mxu1 }
 0x477   :  { %v5998_v17 = vadd.f32 %v5997_v27, %v5996_v24 }
 0x479   :  { %v4780_v16 = vadd.f32 %v5998_v17, %v5963_v3 }
 0x495   :  { %v6066_v28 = vpop.f32.mrb[38].mxu1 }
 0x496   :  { %v6067_v29 = vpop.f32.mrb[39].mxu1 }
 0x497   :  { %v6068_v14 = vadd.f32 %v6067_v29, %v6066_v28 }
 0x4b5   :  { %v6136_v30 = vpop.f32.mrb[40].mxu1 }
 0x4b6   :  { %v6137_v31 = vpop.f32.mrb[41].mxu1 }
 0x4b7   :  { %v6031_v21 = vpop.f32.mrb[38].mxu0  ;;  %v6138_v32 = vadd.f32 %v6137_v31, %v6136_v30 }
 0x4b8   :  { %v6032_v34 = vpop.f32.mrb[39].mxu0 }
 0x4b9   :  { %v6033_v63 = vadd.f32 %v6032_v34, %v6031_v21 }
 0x4bb   :  { %v4850_v0 = vadd.f32 %v6033_v63, %v4780_v16 }
 0x4bd   :  { %v4920_v36 = vadd.f32 %v6068_v14, %v4850_v0 }
 0x4d7   :  { %v6101_v37 = vpop.f32.mrb[40].mxu0 }
 0x4d8   :  { %v6102_v38 = vpop.f32.mrb[41].mxu0 }
 0x4d9   :  { %v6103_v39 = vadd.f32 %v6102_v38, %v6101_v37 }
 0x4db   :  { %v4990_v49 = vadd.f32 %v6103_v39, %v4920_v36  ;;  %v5156_v9 = vpop.f32.mrb[42].mxu0 }
 0x4dc   :  { %v5157_v41 = vadd.f32 %v5920_v40, %v5156_v9  ;;  %v6154_v33 = vpop.f32.mrb[43].mxu0 }
 0x4dd   :  { %v5060_v42 = vadd.f32 %v6138_v32, %v4990_v49 }
 0x4de   :  { %v5160_v18 = vmax.f32 %v5157_v41, 0.0 }
 0x4df   :  { %v5070_v10 = vadd.f32 %v5919_v52, %v5060_v42 }
 0x4e0   :  { %6160 = vmatmul.mubr.msk.f32.vlgmr.msra.gmra.mrb[42].mxu1 %vm5082_vm4, %v5160_v18 }
 0x4e1   :  { %v5071_v15 = vmax.f32 %v5070_v10, 0.0 }
 0x4e3   :  { %6167 = vmatmul.mubr.msk.f32.vlgmr.msra.gmra.mrb[44].mxu0 %vm5082_vm4, %v5071_v15 }
 0x5b3   :  { %v5237_v44 = vpop.f32.mrb[42].mxu1 }
 0x5b4   :  { %v6161_v45 = vpop.f32.mrb[43].mxu1 }
 0x5b6   :  { %v5313_v22 = vpop.f32.mrb[44].mxu0 }
 0x5b7   :  { %v5314_v50 = vadd.f32 %v5313_v22, %v5237_v44  ;;  %v6168_v51 = vpop.f32.mrb[45].mxu0 }
 0x5b9   :  { %v5324_v54 = vadd.f32 %v5927_v48, %v5314_v50 }
 0x5bb   :  { %v5928_v55 = vmul.f32 -1.442695, %v5324_v54 }
 0x5bd   :  { %7256 = vpow2.f32 %v5928_v55 }
 0x5c7   :  { %v7257_v57 = vpop.eup %7256 }
 0x5c8   :  { %v5328_v58 = vadd.f32 1.0, %v7257_v57 }
 0x5ca   :  { %7258 = vrcp.f32 %v5328_v58 }
 0x5d4   :  { %v7259_v43 = vpop.eup %7258 }
 0x5d5   :  { %5332 = vst.msk [vmem:[%s8525_s15] sm:$0xff] %vm5331_vm5, %v7259_v43 }
 0x5d6   :  { %5337 = vsyncpa [#allocation3], 1 }
 0x5d7   :  { %5338 = vsyncpa [#allocation5], 1 }
 0x5d8   :  { %5339 = vsyncpa [#allocation8], 1 }
 0x5d9   :  { %5340 = vsyncpa [#allocation11], 1 }
 0x5da   :  { %5341 = vsyncpa [#allocation14], 1 }
 0x5db   :  { %5342 = vsyncpa [#allocation17], 1 }

</bundles_post_ra>
